<compile_context>
chip_gen: v7x
topology: tpu7x:2x2x1
jax: 0.10.0
libtpu: 0.0.40
codegen_flags: <defaults>
</compile_context>

<pallas_src>
import numpy as np
import jax
import jax.numpy as jnp
from jax.experimental import pallas as pl
from jax.experimental.pallas import tpu as pltpu

LEAK = 0.2
BN_EPS = 1e-5
K = 5               # ConvTranspose1d_meta kernel size
KOFF = (K - 1) // 2  # centered kernel offset


def _lrelu(x):
    return jnp.where(x > 0, x, LEAK * x)


def _roll_lanes(x, shift):
    """Circular shift along the lane (last) axis: result[:, m] = x[:, (m - shift) % L].

    Implemented as two static lane slices + one lane concat (robust Mosaic
    lowering, XLU/VPU work only — no MXU, no dense shift matrix).
    """
    length = x.shape[-1]
    s = shift % length
    if s == 0:
        return x
    return jnp.concatenate([x[:, length - s:], x[:, :length - s]], axis=-1)


# ---------------------------------------------------------------------------
# Fused kernel: FC head + 4 periodic transposed-conv layers + tanh tail.
# ---------------------------------------------------------------------------
def generator0_kernel(noise_ref,
                      w1t_ref, b1_ref, w2t_ref, t2_ref,
                      uup1_ref, wrow1_ref, bias1_ref,
                      uup2_ref, wrow2_ref, bias2_ref,
                      uup3_ref, wrow3_ref, bias3_ref,
                      wrow4_ref, bias4_ref,
                      out_ref):
    noise = noise_ref[...]                                                 # (B, N)

    # ---------------- FC head ----------------
    h = jnp.dot(noise, w1t_ref[...], preferred_element_type=jnp.float32) + b1_ref[...]
    h = _lrelu(h)                                                          # Linear(N,N) + LeakyReLU
    # Dropout(p=0.2): eval-mode forward -> identity.
    h = jnp.dot(h, w2t_ref[...], preferred_element_type=jnp.float32) + t2_ref[...]
    h = _lrelu(h)                                                          # Linear(N,2N) w/ BN folded, (B, 2N)

    # torch: net.view(-1, 16, N//8)  ->  conv layout (16*B, L0), row = c*B + b
    l0 = h.shape[1] // 16
    x = jnp.concatenate([h[:, c * l0:(c + 1) * l0] for c in range(16)], axis=0)

    def convt_up2(xin, uup_ref, wrow_ref, bias_ref):
        # Periodic ConvTranspose1d_meta(stride=2), BN folded into wrow/bias:
        #   1) zero-stuffing upsample via a tiny (Lin, 2Lin) 0/1 matrix
        #   2) K circular taps realised as static lane rolls
        #   3) one stacked channel-mix matmul (batch handled by block-diag weight)
        u = jnp.dot(xin, uup_ref[...], preferred_element_type=jnp.float32)          # (Cin*B, Lout)
        stack = jnp.concatenate([_roll_lanes(u, j - KOFF) for j in range(K)], axis=0)
        return jnp.dot(wrow_ref[...], stack, preferred_element_type=jnp.float32) + bias_ref[...]

    x = _lrelu(convt_up2(x, uup1_ref, wrow1_ref, bias1_ref))               # (16*B, 2*L0)
    x = _lrelu(convt_up2(x, uup2_ref, wrow2_ref, bias2_ref))               # ( 8*B, 4*L0)
    x = _lrelu(convt_up2(x, uup3_ref, wrow3_ref, bias3_ref))               # ( 4*B, 8*L0 = N)

    # Final ConvTranspose1d_meta(4, 1, 5), stride=1, with bias, no BN.
    stack = jnp.concatenate([_roll_lanes(x, j - KOFF) for j in range(K)], axis=0)
    y = jnp.dot(wrow4_ref[...], stack, preferred_element_type=jnp.float32) + bias4_ref[...]  # (B, N)

    # torch: tanh((net + noise.unsqueeze(1)) * 100) * 1.05
    out_ref[...] = jnp.tanh((y + noise) * 100.0) * 1.05


# ---------------------------------------------------------------------------
# Host-side parameter construction: random torch-equivalent params, then
# fold BatchNorm and pack per-tap weights into batched block matrices.
# ---------------------------------------------------------------------------
def _upsample_mat(l_in, stride=2):
    """0/1 zero-stuffing matrix U: (x @ U)[:, i*stride] = x[:, i], other columns 0."""
    m = np.zeros((l_in, l_in * stride), np.float32)
    m[np.arange(l_in), stride * np.arange(l_in)] = 1.0
    return jnp.asarray(m)


def init_params(key, n, batch):
    l0 = n // 8
    keys = iter(jax.random.split(key, 32))

    def rnd(shape, scale=0.1):
        return scale * jax.random.normal(next(keys), shape, dtype=jnp.float32)

    def bn_fold(c):  # eval-mode BatchNorm1d -> per-channel (scale, shift)
        gamma = 1.0 + rnd((c,))
        beta = rnd((c,))
        mean = rnd((c,))
        var = 1.0 + jnp.abs(rnd((c,)))
        s = gamma * jax.lax.rsqrt(var + BN_EPS)
        return s, beta - mean * s

    eye_b = jnp.eye(batch, dtype=jnp.float32)

    def convt_pack(cin, cout, with_bn, with_bias):
        w = rnd((cin, cout, K))                       # torch ConvTranspose1d weight (Cin, Cout, K)
        if with_bn:
            s, t = bn_fold(cout)
        else:
            s = jnp.ones((cout,), jnp.float32)
            t = rnd((cout,)) if with_bias else jnp.zeros((cout,), jnp.float32)
        blocks = []
        for j in range(K):
            m_j = w[:, :, j].T * s[:, None]           # (Cout, Cin), BN scale folded into rows
            blocks.append(jnp.kron(m_j, eye_b))       # batch block-diag (Cout*B, Cin*B)
        wrow = jnp.concatenate(blocks, axis=1)        # (Cout*B, K*Cin*B)
        bias = jnp.repeat(t, batch).reshape(cout * batch, 1)   # row c*B+b gets t[c]
        return wrow, bias

    # FC: Linear(n, n) + bias, Linear(n, 2n, bias=False) with BatchNorm1d(2n) folded.
    w1 = rnd((n, n))                                  # torch Linear weight (out, in)
    b1 = rnd((n,))
    w2 = rnd((2 * n, n))
    s_fc, t_fc = bn_fold(2 * n)

    wrow1, bias1 = convt_pack(16, 16, True, False)
    wrow2, bias2 = convt_pack(16, 8, True, False)
    wrow3, bias3 = convt_pack(8, 4, True, False)
    wrow4, bias4 = convt_pack(4, 1, False, True)

    return dict(
        w1t=w1.T, b1=b1.reshape(1, n),
        w2t=(w2 * s_fc[:, None]).T, t2=t_fc.reshape(1, 2 * n),
        uup1=_upsample_mat(l0), wrow1=wrow1, bias1=bias1,
        uup2=_upsample_mat(2 * l0), wrow2=wrow2, bias2=bias2,
        uup3=_upsample_mat(4 * l0), wrow3=wrow3, bias3=bias3,
        wrow4=wrow4, bias4=bias4,
    )


def generator0_forward(noise, params):
    b, n = noise.shape
    vmem = pl.BlockSpec(memory_space=pltpu.MemorySpace.VMEM)
    args = (noise,
            params["w1t"], params["b1"], params["w2t"], params["t2"],
            params["uup1"], params["wrow1"], params["bias1"],
            params["uup2"], params["wrow2"], params["bias2"],
            params["uup3"], params["wrow3"], params["bias3"],
            params["wrow4"], params["bias4"])
    # Single fused, grid-less call: everything (a few hundred KB) sits in VMEM.
    # (On v7x a size-2 "parallel" batch-split axis could use both TCs, but at
    #  these shapes launch/DMA overhead dominates, so one program is kept.)
    out = pl.pallas_call(
        generator0_kernel,
        out_shape=jax.ShapeDtypeStruct((b, n), jnp.float32),
        in_specs=[vmem] * len(args),
        out_specs=vmem,
    )(*args)
    return out.reshape(b, 1, n)   # torch output layout (B, 1, N)


if __name__ == "__main__":
    # noise_dim must be divisible by 8; B=8 keeps all sublane tiles aligned.
    B, NOISE_DIM = 8, 64
    key = jax.random.PRNGKey(0)
    pkey, nkey = jax.random.split(key)
    params = init_params(pkey, NOISE_DIM, B)
    noise = jax.random.normal(nkey, (B, NOISE_DIM), dtype=jnp.float32)

    out = jax.block_until_ready(generator0_forward(noise, params))

    assert out.shape == (B, 1, NOISE_DIM), out.shape
    assert bool(jnp.all(jnp.isfinite(out)))
    assert bool(jnp.all(jnp.abs(out) <= 1.05 + 1e-5))
    print("KERNEL_OK")
</pallas_src>

<mosaic_0001>
module attributes {stable_mosaic.version = 11 : i64} {
  func.func @generator0_kernel(%arg0: memref<8x64xf32, #tpu.memory_space<vmem>>, %arg1: memref<64x64xf32, #tpu.memory_space<vmem>>, %arg2: memref<1x64xf32, #tpu.memory_space<vmem>>, %arg3: memref<64x128xf32, #tpu.memory_space<vmem>>, %arg4: memref<1x128xf32, #tpu.memory_space<vmem>>, %arg5: memref<8x16xf32, #tpu.memory_space<vmem>>, %arg6: memref<128x640xf32, #tpu.memory_space<vmem>>, %arg7: memref<128x1xf32, #tpu.memory_space<vmem>>, %arg8: memref<16x32xf32, #tpu.memory_space<vmem>>, %arg9: memref<64x640xf32, #tpu.memory_space<vmem>>, %arg10: memref<64x1xf32, #tpu.memory_space<vmem>>, %arg11: memref<32x64xf32, #tpu.memory_space<vmem>>, %arg12: memref<32x320xf32, #tpu.memory_space<vmem>>, %arg13: memref<32x1xf32, #tpu.memory_space<vmem>>, %arg14: memref<8x160xf32, #tpu.memory_space<vmem>>, %arg15: memref<8x1xf32, #tpu.memory_space<vmem>>, %arg16: memref<8x64xf32, #tpu.memory_space<vmem>>) attributes {dimension_semantics = [], scalar_prefetch = 0 : i64, scratch_operands = 0 : i64, tpu.core_type = #tpu.core_type<tc>} {
    %c0 = arith.constant 0 : index
    %c0_0 = arith.constant 0 : index
    %0 = vector.load %arg0[%c0, %c0_0] : memref<8x64xf32, #tpu.memory_space<vmem>>, vector<8x64xf32>
    %c0_1 = arith.constant 0 : index
    %c0_2 = arith.constant 0 : index
    %1 = vector.load %arg1[%c0_1, %c0_2] : memref<64x64xf32, #tpu.memory_space<vmem>>, vector<64x64xf32>
    %cst = arith.constant dense<0.000000e+00> : vector<8x64xf32>
    %2 = tpu.matmul %0, %1, %cst {dimension_numbers = #tpu.dot_dimension_numbers<[1], [0], [0], [1], [0, 0, 1, 1], [], []>} : vector<8x64xf32>, vector<64x64xf32>, vector<8x64xf32> -> vector<8x64xf32>
    %c0_3 = arith.constant 0 : index
    %c0_4 = arith.constant 0 : index
    %3 = vector.load %arg2[%c0_3, %c0_4] : memref<1x64xf32, #tpu.memory_space<vmem>>, vector<1x64xf32>
    %4 = vector.broadcast %3 : vector<1x64xf32> to vector<8x64xf32>
    %5 = arith.addf %2, %4 : vector<8x64xf32>
    %cst_5 = arith.constant 0.000000e+00 : f32
    %6 = vector.broadcast %cst_5 : f32 to vector<8x64xf32>
    %7 = arith.cmpf ogt, %5, %6 : vector<8x64xf32>
    %cst_6 = arith.constant 2.000000e-01 : f32
    %8 = vector.broadcast %cst_6 : f32 to vector<8x64xf32>
    %9 = arith.mulf %8, %5 : vector<8x64xf32>
    %10 = arith.select %7, %5, %9 : vector<8x64xi1>, vector<8x64xf32>
    %c0_7 = arith.constant 0 : index
    %c0_8 = arith.constant 0 : index
    %11 = vector.load %arg3[%c0_7, %c0_8] : memref<64x128xf32, #tpu.memory_space<vmem>>, vector<64x128xf32>
    %cst_9 = arith.constant dense<0.000000e+00> : vector<8x128xf32>
    %12 = tpu.matmul %10, %11, %cst_9 {dimension_numbers = #tpu.dot_dimension_numbers<[1], [0], [0], [1], [0, 0, 1, 1], [], []>} : vector<8x64xf32>, vector<64x128xf32>, vector<8x128xf32> -> vector<8x128xf32>
    %c0_10 = arith.constant 0 : index
    %c0_11 = arith.constant 0 : index
    %13 = vector.load %arg4[%c0_10, %c0_11] : memref<1x128xf32, #tpu.memory_space<vmem>>, vector<1x128xf32>
    %14 = vector.broadcast %13 : vector<1x128xf32> to vector<8x128xf32>
    %15 = arith.addf %12, %14 : vector<8x128xf32>
    %cst_12 = arith.constant 0.000000e+00 : f32
    %16 = vector.broadcast %cst_12 : f32 to vector<8x128xf32>
    %17 = arith.cmpf ogt, %15, %16 : vector<8x128xf32>
    %cst_13 = arith.constant 2.000000e-01 : f32
    %18 = vector.broadcast %cst_13 : f32 to vector<8x128xf32>
    %19 = arith.mulf %18, %15 : vector<8x128xf32>
    %20 = arith.select %17, %15, %19 : vector<8x128xi1>, vector<8x128xf32>
    %21 = vector.extract_strided_slice %20 {offsets = [0, 0], sizes = [8, 8], strides = [1, 1]} : vector<8x128xf32> to vector<8x8xf32>
    %22 = vector.extract_strided_slice %20 {offsets = [0, 8], sizes = [8, 8], strides = [1, 1]} : vector<8x128xf32> to vector<8x8xf32>
    %23 = vector.extract_strided_slice %20 {offsets = [0, 16], sizes = [8, 8], strides = [1, 1]} : vector<8x128xf32> to vector<8x8xf32>
    %24 = vector.extract_strided_slice %20 {offsets = [0, 24], sizes = [8, 8], strides = [1, 1]} : vector<8x128xf32> to vector<8x8xf32>
    %25 = vector.extract_strided_slice %20 {offsets = [0, 32], sizes = [8, 8], strides = [1, 1]} : vector<8x128xf32> to vector<8x8xf32>
    %26 = vector.extract_strided_slice %20 {offsets = [0, 40], sizes = [8, 8], strides = [1, 1]} : vector<8x128xf32> to vector<8x8xf32>
    %27 = vector.extract_strided_slice %20 {offsets = [0, 48], sizes = [8, 8], strides = [1, 1]} : vector<8x128xf32> to vector<8x8xf32>
    %28 = vector.extract_strided_slice %20 {offsets = [0, 56], sizes = [8, 8], strides = [1, 1]} : vector<8x128xf32> to vector<8x8xf32>
    %29 = vector.extract_strided_slice %20 {offsets = [0, 64], sizes = [8, 8], strides = [1, 1]} : vector<8x128xf32> to vector<8x8xf32>
    %30 = vector.extract_strided_slice %20 {offsets = [0, 72], sizes = [8, 8], strides = [1, 1]} : vector<8x128xf32> to vector<8x8xf32>
    %31 = vector.extract_strided_slice %20 {offsets = [0, 80], sizes = [8, 8], strides = [1, 1]} : vector<8x128xf32> to vector<8x8xf32>
    %32 = vector.extract_strided_slice %20 {offsets = [0, 88], sizes = [8, 8], strides = [1, 1]} : vector<8x128xf32> to vector<8x8xf32>
    %33 = vector.extract_strided_slice %20 {offsets = [0, 96], sizes = [8, 8], strides = [1, 1]} : vector<8x128xf32> to vector<8x8xf32>
    %34 = vector.extract_strided_slice %20 {offsets = [0, 104], sizes = [8, 8], strides = [1, 1]} : vector<8x128xf32> to vector<8x8xf32>
    %35 = vector.extract_strided_slice %20 {offsets = [0, 112], sizes = [8, 8], strides = [1, 1]} : vector<8x128xf32> to vector<8x8xf32>
    %36 = vector.extract_strided_slice %20 {offsets = [0, 120], sizes = [8, 8], strides = [1, 1]} : vector<8x128xf32> to vector<8x8xf32>
    %37 = tpu.concatenate %21, %22, %23, %24, %25, %26, %27, %28, %29, %30, %31, %32, %33, %34, %35, %36 in 0 : vector<8x8xf32>, vector<8x8xf32>, vector<8x8xf32>, vector<8x8xf32>, vector<8x8xf32>, vector<8x8xf32>, vector<8x8xf32>, vector<8x8xf32>, vector<8x8xf32>, vector<8x8xf32>, vector<8x8xf32>, vector<8x8xf32>, vector<8x8xf32>, vector<8x8xf32>, vector<8x8xf32>, vector<8x8xf32> -> vector<128x8xf32>
    %c0_14 = arith.constant 0 : index
    %c0_15 = arith.constant 0 : index
    %38 = vector.load %arg5[%c0_14, %c0_15] : memref<8x16xf32, #tpu.memory_space<vmem>>, vector<8x16xf32>
    %cst_16 = arith.constant dense<0.000000e+00> : vector<128x16xf32>
    %39 = tpu.matmul %37, %38, %cst_16 {dimension_numbers = #tpu.dot_dimension_numbers<[1], [0], [0], [1], [0, 0, 1, 1], [], []>} : vector<128x8xf32>, vector<8x16xf32>, vector<128x16xf32> -> vector<128x16xf32>
    %40 = vector.extract_strided_slice %39 {offsets = [0, 2], sizes = [128, 14], strides = [1, 1]} : vector<128x16xf32> to vector<128x14xf32>
    %41 = vector.extract_strided_slice %39 {offsets = [0, 0], sizes = [128, 2], strides = [1, 1]} : vector<128x16xf32> to vector<128x2xf32>
    %42 = tpu.concatenate %40, %41 in 1 : vector<128x14xf32>, vector<128x2xf32> -> vector<128x16xf32>
    %43 = vector.extract_strided_slice %39 {offsets = [0, 1], sizes = [128, 15], strides = [1, 1]} : vector<128x16xf32> to vector<128x15xf32>
    %44 = vector.extract_strided_slice %39 {offsets = [0, 0], sizes = [128, 1], strides = [1, 1]} : vector<128x16xf32> to vector<128x1xf32>
    %45 = tpu.concatenate %43, %44 in 1 : vector<128x15xf32>, vector<128x1xf32> -> vector<128x16xf32>
    %46 = vector.extract_strided_slice %39 {offsets = [0, 15], sizes = [128, 1], strides = [1, 1]} : vector<128x16xf32> to vector<128x1xf32>
    %47 = vector.extract_strided_slice %39 {offsets = [0, 0], sizes = [128, 15], strides = [1, 1]} : vector<128x16xf32> to vector<128x15xf32>
    %48 = tpu.concatenate %46, %47 in 1 : vector<128x1xf32>, vector<128x15xf32> -> vector<128x16xf32>
    %49 = vector.extract_strided_slice %39 {offsets = [0, 14], sizes = [128, 2], strides = [1, 1]} : vector<128x16xf32> to vector<128x2xf32>
    %50 = vector.extract_strided_slice %39 {offsets = [0, 0], sizes = [128, 14], strides = [1, 1]} : vector<128x16xf32> to vector<128x14xf32>
    %51 = tpu.concatenate %49, %50 in 1 : vector<128x2xf32>, vector<128x14xf32> -> vector<128x16xf32>
    %52 = tpu.concatenate %42, %45, %39, %48, %51 in 0 : vector<128x16xf32>, vector<128x16xf32>, vector<128x16xf32>, vector<128x16xf32>, vector<128x16xf32> -> vector<640x16xf32>
    %c0_17 = arith.constant 0 : index
    %c0_18 = arith.constant 0 : index
    %53 = vector.load %arg6[%c0_17, %c0_18] : memref<128x640xf32, #tpu.memory_space<vmem>>, vector<128x640xf32>
    %cst_19 = arith.constant dense<0.000000e+00> : vector<128x16xf32>
    %54 = tpu.matmul %53, %52, %cst_19 {dimension_numbers = #tpu.dot_dimension_numbers<[1], [0], [0], [1], [0, 0, 1, 1], [], []>} : vector<128x640xf32>, vector<640x16xf32>, vector<128x16xf32> -> vector<128x16xf32>
    %c0_20 = arith.constant 0 : index
    %c0_21 = arith.constant 0 : index
    %55 = vector.load %arg7[%c0_20, %c0_21] : memref<128x1xf32, #tpu.memory_space<vmem>>, vector<128x1xf32>
    %56 = vector.broadcast %55 : vector<128x1xf32> to vector<128x16xf32>
    %57 = arith.addf %54, %56 : vector<128x16xf32>
    %cst_22 = arith.constant 0.000000e+00 : f32
    %58 = vector.broadcast %cst_22 : f32 to vector<128x16xf32>
    %59 = arith.cmpf ogt, %57, %58 : vector<128x16xf32>
    %cst_23 = arith.constant 2.000000e-01 : f32
    %60 = vector.broadcast %cst_23 : f32 to vector<128x16xf32>
    %61 = arith.mulf %60, %57 : vector<128x16xf32>
    %62 = arith.select %59, %57, %61 : vector<128x16xi1>, vector<128x16xf32>
    %c0_24 = arith.constant 0 : index
    %c0_25 = arith.constant 0 : index
    %63 = vector.load %arg8[%c0_24, %c0_25] : memref<16x32xf32, #tpu.memory_space<vmem>>, vector<16x32xf32>
    %cst_26 = arith.constant dense<0.000000e+00> : vector<128x32xf32>
    %64 = tpu.matmul %62, %63, %cst_26 {dimension_numbers = #tpu.dot_dimension_numbers<[1], [0], [0], [1], [0, 0, 1, 1], [], []>} : vector<128x16xf32>, vector<16x32xf32>, vector<128x32xf32> -> vector<128x32xf32>
    %65 = vector.extract_strided_slice %64 {offsets = [0, 2], sizes = [128, 30], strides = [1, 1]} : vector<128x32xf32> to vector<128x30xf32>
    %66 = vector.extract_strided_slice %64 {offsets = [0, 0], sizes = [128, 2], strides = [1, 1]} : vector<128x32xf32> to vector<128x2xf32>
    %67 = tpu.concatenate %65, %66 in 1 : vector<128x30xf32>, vector<128x2xf32> -> vector<128x32xf32>
    %68 = vector.extract_strided_slice %64 {offsets = [0, 1], sizes = [128, 31], strides = [1, 1]} : vector<128x32xf32> to vector<128x31xf32>
    %69 = vector.extract_strided_slice %64 {offsets = [0, 0], sizes = [128, 1], strides = [1, 1]} : vector<128x32xf32> to vector<128x1xf32>
    %70 = tpu.concatenate %68, %69 in 1 : vector<128x31xf32>, vector<128x1xf32> -> vector<128x32xf32>
    %71 = vector.extract_strided_slice %64 {offsets = [0, 31], sizes = [128, 1], strides = [1, 1]} : vector<128x32xf32> to vector<128x1xf32>
    %72 = vector.extract_strided_slice %64 {offsets = [0, 0], sizes = [128, 31], strides = [1, 1]} : vector<128x32xf32> to vector<128x31xf32>
    %73 = tpu.concatenate %71, %72 in 1 : vector<128x1xf32>, vector<128x31xf32> -> vector<128x32xf32>
    %74 = vector.extract_strided_slice %64 {offsets = [0, 30], sizes = [128, 2], strides = [1, 1]} : vector<128x32xf32> to vector<128x2xf32>
    %75 = vector.extract_strided_slice %64 {offsets = [0, 0], sizes = [128, 30], strides = [1, 1]} : vector<128x32xf32> to vector<128x30xf32>
    %76 = tpu.concatenate %74, %75 in 1 : vector<128x2xf32>, vector<128x30xf32> -> vector<128x32xf32>
    %77 = tpu.concatenate %67, %70, %64, %73, %76 in 0 : vector<128x32xf32>, vector<128x32xf32>, vector<128x32xf32>, vector<128x32xf32>, vector<128x32xf32> -> vector<640x32xf32>
    %c0_27 = arith.constant 0 : index
    %c0_28 = arith.constant 0 : index
    %78 = vector.load %arg9[%c0_27, %c0_28] : memref<64x640xf32, #tpu.memory_space<vmem>>, vector<64x640xf32>
    %cst_29 = arith.constant dense<0.000000e+00> : vector<64x32xf32>
    %79 = tpu.matmul %78, %77, %cst_29 {dimension_numbers = #tpu.dot_dimension_numbers<[1], [0], [0], [1], [0, 0, 1, 1], [], []>} : vector<64x640xf32>, vector<640x32xf32>, vector<64x32xf32> -> vector<64x32xf32>
    %c0_30 = arith.constant 0 : index
    %c0_31 = arith.constant 0 : index
    %80 = vector.load %arg10[%c0_30, %c0_31] : memref<64x1xf32, #tpu.memory_space<vmem>>, vector<64x1xf32>
    %81 = vector.broadcast %80 : vector<64x1xf32> to vector<64x32xf32>
    %82 = arith.addf %79, %81 : vector<64x32xf32>
    %cst_32 = arith.constant 0.000000e+00 : f32
    %83 = vector.broadcast %cst_32 : f32 to vector<64x32xf32>
    %84 = arith.cmpf ogt, %82, %83 : vector<64x32xf32>
    %cst_33 = arith.constant 2.000000e-01 : f32
    %85 = vector.broadcast %cst_33 : f32 to vector<64x32xf32>
    %86 = arith.mulf %85, %82 : vector<64x32xf32>
    %87 = arith.select %84, %82, %86 : vector<64x32xi1>, vector<64x32xf32>
    %c0_34 = arith.constant 0 : index
    %c0_35 = arith.constant 0 : index
    %88 = vector.load %arg11[%c0_34, %c0_35] : memref<32x64xf32, #tpu.memory_space<vmem>>, vector<32x64xf32>
    %cst_36 = arith.constant dense<0.000000e+00> : vector<64x64xf32>
    %89 = tpu.matmul %87, %88, %cst_36 {dimension_numbers = #tpu.dot_dimension_numbers<[1], [0], [0], [1], [0, 0, 1, 1], [], []>} : vector<64x32xf32>, vector<32x64xf32>, vector<64x64xf32> -> vector<64x64xf32>
    %90 = vector.extract_strided_slice %89 {offsets = [0, 2], sizes = [64, 62], strides = [1, 1]} : vector<64x64xf32> to vector<64x62xf32>
    %91 = vector.extract_strided_slice %89 {offsets = [0, 0], sizes = [64, 2], strides = [1, 1]} : vector<64x64xf32> to vector<64x2xf32>
    %92 = tpu.concatenate %90, %91 in 1 : vector<64x62xf32>, vector<64x2xf32> -> vector<64x64xf32>
    %93 = vector.extract_strided_slice %89 {offsets = [0, 1], sizes = [64, 63], strides = [1, 1]} : vector<64x64xf32> to vector<64x63xf32>
    %94 = vector.extract_strided_slice %89 {offsets = [0, 0], sizes = [64, 1], strides = [1, 1]} : vector<64x64xf32> to vector<64x1xf32>
    %95 = tpu.concatenate %93, %94 in 1 : vector<64x63xf32>, vector<64x1xf32> -> vector<64x64xf32>
    %96 = vector.extract_strided_slice %89 {offsets = [0, 63], sizes = [64, 1], strides = [1, 1]} : vector<64x64xf32> to vector<64x1xf32>
    %97 = vector.extract_strided_slice %89 {offsets = [0, 0], sizes = [64, 63], strides = [1, 1]} : vector<64x64xf32> to vector<64x63xf32>
    %98 = tpu.concatenate %96, %97 in 1 : vector<64x1xf32>, vector<64x63xf32> -> vector<64x64xf32>
    %99 = vector.extract_strided_slice %89 {offsets = [0, 62], sizes = [64, 2], strides = [1, 1]} : vector<64x64xf32> to vector<64x2xf32>
    %100 = vector.extract_strided_slice %89 {offsets = [0, 0], sizes = [64, 62], strides = [1, 1]} : vector<64x64xf32> to vector<64x62xf32>
    %101 = tpu.concatenate %99, %100 in 1 : vector<64x2xf32>, vector<64x62xf32> -> vector<64x64xf32>
    %102 = tpu.concatenate %92, %95, %89, %98, %101 in 0 : vector<64x64xf32>, vector<64x64xf32>, vector<64x64xf32>, vector<64x64xf32>, vector<64x64xf32> -> vector<320x64xf32>
    %c0_37 = arith.constant 0 : index
    %c0_38 = arith.constant 0 : index
    %103 = vector.load %arg12[%c0_37, %c0_38] : memref<32x320xf32, #tpu.memory_space<vmem>>, vector<32x320xf32>
    %cst_39 = arith.constant dense<0.000000e+00> : vector<32x64xf32>
    %104 = tpu.matmul %103, %102, %cst_39 {dimension_numbers = #tpu.dot_dimension_numbers<[1], [0], [0], [1], [0, 0, 1, 1], [], []>} : vector<32x320xf32>, vector<320x64xf32>, vector<32x64xf32> -> vector<32x64xf32>
    %c0_40 = arith.constant 0 : index
    %c0_41 = arith.constant 0 : index
    %105 = vector.load %arg13[%c0_40, %c0_41] : memref<32x1xf32, #tpu.memory_space<vmem>>, vector<32x1xf32>
    %106 = vector.broadcast %105 : vector<32x1xf32> to vector<32x64xf32>
    %107 = arith.addf %104, %106 : vector<32x64xf32>
    %cst_42 = arith.constant 0.000000e+00 : f32
    %108 = vector.broadcast %cst_42 : f32 to vector<32x64xf32>
    %109 = arith.cmpf ogt, %107, %108 : vector<32x64xf32>
    %cst_43 = arith.constant 2.000000e-01 : f32
    %110 = vector.broadcast %cst_43 : f32 to vector<32x64xf32>
    %111 = arith.mulf %110, %107 : vector<32x64xf32>
    %112 = arith.select %109, %107, %111 : vector<32x64xi1>, vector<32x64xf32>
    %113 = vector.extract_strided_slice %112 {offsets = [0, 2], sizes = [32, 62], strides = [1, 1]} : vector<32x64xf32> to vector<32x62xf32>
    %114 = vector.extract_strided_slice %112 {offsets = [0, 0], sizes = [32, 2], strides = [1, 1]} : vector<32x64xf32> to vector<32x2xf32>
    %115 = tpu.concatenate %113, %114 in 1 : vector<32x62xf32>, vector<32x2xf32> -> vector<32x64xf32>
    %116 = vector.extract_strided_slice %112 {offsets = [0, 1], sizes = [32, 63], strides = [1, 1]} : vector<32x64xf32> to vector<32x63xf32>
    %117 = vector.extract_strided_slice %112 {offsets = [0, 0], sizes = [32, 1], strides = [1, 1]} : vector<32x64xf32> to vector<32x1xf32>
    %118 = tpu.concatenate %116, %117 in 1 : vector<32x63xf32>, vector<32x1xf32> -> vector<32x64xf32>
    %119 = vector.extract_strided_slice %112 {offsets = [0, 63], sizes = [32, 1], strides = [1, 1]} : vector<32x64xf32> to vector<32x1xf32>
    %120 = vector.extract_strided_slice %112 {offsets = [0, 0], sizes = [32, 63], strides = [1, 1]} : vector<32x64xf32> to vector<32x63xf32>
    %121 = tpu.concatenate %119, %120 in 1 : vector<32x1xf32>, vector<32x63xf32> -> vector<32x64xf32>
    %122 = vector.extract_strided_slice %112 {offsets = [0, 62], sizes = [32, 2], strides = [1, 1]} : vector<32x64xf32> to vector<32x2xf32>
    %123 = vector.extract_strided_slice %112 {offsets = [0, 0], sizes = [32, 62], strides = [1, 1]} : vector<32x64xf32> to vector<32x62xf32>
    %124 = tpu.concatenate %122, %123 in 1 : vector<32x2xf32>, vector<32x62xf32> -> vector<32x64xf32>
    %125 = tpu.concatenate %115, %118, %112, %121, %124 in 0 : vector<32x64xf32>, vector<32x64xf32>, vector<32x64xf32>, vector<32x64xf32>, vector<32x64xf32> -> vector<160x64xf32>
    %c0_44 = arith.constant 0 : index
    %c0_45 = arith.constant 0 : index
    %126 = vector.load %arg14[%c0_44, %c0_45] : memref<8x160xf32, #tpu.memory_space<vmem>>, vector<8x160xf32>
    %cst_46 = arith.constant dense<0.000000e+00> : vector<8x64xf32>
    %127 = tpu.matmul %126, %125, %cst_46 {dimension_numbers = #tpu.dot_dimension_numbers<[1], [0], [0], [1], [0, 0, 1, 1], [], []>} : vector<8x160xf32>, vector<160x64xf32>, vector<8x64xf32> -> vector<8x64xf32>
    %c0_47 = arith.constant 0 : index
    %c0_48 = arith.constant 0 : index
    %128 = vector.load %arg15[%c0_47, %c0_48] : memref<8x1xf32, #tpu.memory_space<vmem>>, vector<8x1xf32>
    %129 = vector.broadcast %128 : vector<8x1xf32> to vector<8x64xf32>
    %130 = arith.addf %127, %129 : vector<8x64xf32>
    %131 = arith.addf %130, %0 : vector<8x64xf32>
    %cst_49 = arith.constant 1.000000e+02 : f32
    %132 = vector.broadcast %cst_49 : f32 to vector<8x64xf32>
    %133 = arith.mulf %131, %132 : vector<8x64xf32>
    %134 = math.tanh %133 : vector<8x64xf32>
    %cst_50 = arith.constant 1.050000e+00 : f32
    %135 = vector.broadcast %cst_50 : f32 to vector<8x64xf32>
    %136 = arith.mulf %134, %135 : vector<8x64xf32>
    %c0_51 = arith.constant 0 : index
    %c0_52 = arith.constant 0 : index
    %137 = vector.load %arg16[%c0_51, %c0_52] : memref<8x64xf32, #tpu.memory_space<vmem>>, vector<8x64xf32>
    tpu.vector_store %arg16[%c0_51, %c0_52], %136 {strides = array<i32>} : memref<8x64xf32, #tpu.memory_space<vmem>>, vector<8x64xf32>,
    return
  }
}

</mosaic_0001>

<bundles_post_ra>
// kernel: tpu_custom_call.1
= control target key start
LH: loop header
LB: loop body
LE: loop exit
PB: predicated region body
PF: predicated region fallthrough
CT: control target
= control target key end

     0   :  { %s6992_s0 = inlined_call_operand.hbm [shape: f32[8,64], index: 0, kind: input, shape index: {}]   ;;  %s6993_s1 = inlined_call_operand.vmem [shape: f32[64,64], index: 1, kind: input, shape index: {}]   ;;  %s6994_s2 = inlined_call_operand.hbm [shape: f32[1,64], index: 2, kind: input, shape index: {}]   ;;  %s6995_s3 = inlined_call_operand.vmem [shape: f32[64,128], index: 3, kind: input, shape index: {}]   ;;  %s6996_s4 = inlined_call_operand.hbm [shape: f32[1,128], index: 4, kind: input, shape index: {}]   ;;  %s6997_s5 = inlined_call_operand.hbm [shape: f32[8,16], index: 5, kind: input, shape index: {}]   ;;  %s6998_s6 = inlined_call_operand.hbm [shape: f32[128,640], index: 6, kind: input, shape index: {}]   ;;  %s6999_s7 = inlined_call_operand.vmem [shape: f32[128,1], index: 7, kind: input, shape index: {}]   ;;  %s7000_s8 = inlined_call_operand.hbm [shape: f32[16,32], index: 8, kind: input, shape index: {}]   ;;  %s7001_s9 = inlined_call_operand.hbm [shape: f32[64,640], index: 9, kind: input, shape index: {}]   ;;  %s7002_s10 = inlined_call_operand.vmem [shape: f32[64,1], index: 10, kind: input, shape index: {}]   ;;  %s7003_s11 = inlined_call_operand.vmem [shape: f32[32,64], index: 11, kind: input, shape index: {}]   ;;  %s7004_s12 = inlined_call_operand.vmem [shape: f32[32,320], index: 12, kind: input, shape index: {}]   ;;  %s7005_s13 = inlined_call_operand.vmem [shape: f32[32,1], index: 13, kind: input, shape index: {}]   ;;  %s7006_s14 = inlined_call_operand.vmem [shape: f32[8,160], index: 14, kind: input, shape index: {}]   ;;  %s7007_s15 = inlined_call_operand.vmem [shape: f32[8,1], index: 15, kind: input, shape index: {}]   ;;  %s7008_s16 = inlined_call_operand.hbm [shape: f32[8,64], index: 16, kind: output, shape index: {}]  }
   0x1   :  { %7010 = sst [smem:[#allocation20_spill]] %s6992_s0 }
   0x2   :  { %21 = vsyncpa [#allocation3], 0 }
   0x3   :  { %22 = vsyncpa [#allocation6], 0 }
   0x4   :  { %23 = vsyncpa [#allocation9], 0 }
   0x5   :  { %24 = vsyncpa [#allocation12], 0 }
   0x6   :  { %25 = vsyncpa [#allocation4], 0  ;;  %s5723_s21 = smov [#allocation5]   ;;  %s5724_s23 = smov [#allocation8]  }
   0x7   :  { %s44_s22 = sshll.u32 %s5723_s21, 4  ;;  %s66_s24 = sshll.u32 %s5724_s23, 4  ;;  %s45_s22 = int_to_ptr.vmem [resolvable:$true] %s44_s22  ;;  %s67_s24 = int_to_ptr.vmem [resolvable:$true] %s66_s24 }
   0x8   :  { %s5537_s27 = scalar_lea.hbm %s6994_s2, 16 }
   0x9   :  { %p5538_p0 = scmp.ne.s32.totalorder %s6994_s2, %s5537_s27  ;;  %p5541_p1 = scmp.lt.u32.totalorder %s5537_s27, %s6994_s2 }
   0xb   :  { %p5543_p2 = pnand %p5541_p1, %p5538_p0 }
   0xd   :  { %5546 = shalt.err (!%p5543_p2)
}
   0xe   :  { %s5547_s17 = scalar_lea.vmem %s45_s22, 16  ;;  %s5551_s18 = scalar_lea.vmem %s45_s22, 32 }
   0xf   :  { %p5548_p3 = scmp.ne.s32.totalorder %s45_s22, %s5547_s17  ;;  %p5552_p4 = scmp.lt.s32.totalorder %s45_s22, %s45_s22 }
  0x10   :  { %p5553_p5 = scmp.lt.s32.totalorder %s5551_s18, %s5547_s17 }
  0x12   :  { %p5554_p6 = por %p5553_p5, %p5552_p4 }
  0x14   :  { %p5555_p7 = pnand %p5554_p6, %p5548_p3 }
  0x16   :  { %5558 = shalt.err (!%p5555_p7)
}
  0x17   :  { %47 = dma.hbm_to_vmem [thread:$0]  %s6994_s2, 16, %s45_s22, [#allocation6]  }
  0x18   :  { %s5559_s25 = scalar_lea.hbm %s6997_s5, 128 }
  0x19   :  { %p5560_p8 = scmp.ne.s32.totalorder %s6997_s5, %s5559_s25  ;;  %p5563_p9 = scmp.lt.u32.totalorder %s5559_s25, %s6997_s5 }
  0x1b   :  { %p5565_p10 = pnand %p5563_p9, %p5560_p8 }
  0x1d   :  { %5568 = shalt.err (!%p5565_p10)
}
  0x1e   :  { %s5569_s30 = scalar_lea.vmem %s67_s24, 128  ;;  %p5574_p12 = scmp.lt.s32.totalorder %s67_s24, %s67_s24 }
  0x1f   :  { %p5570_p11 = scmp.ne.s32.totalorder %s67_s24, %s5569_s30  ;;  %p5575_p13 = scmp.lt.s32.totalorder %s5569_s30, %s5569_s30 }
  0x21   :  { %p5576_p0 = por %p5575_p13, %p5574_p12 }
  0x23   :  { %p5577_p1 = pnand %p5576_p0, %p5570_p11 }
  0x25   :  { %5580 = shalt.err (!%p5577_p1)
}
  0x26   :  { %69 = dma.hbm_to_vmem [thread:$0]  %s6997_s5, 128, %s67_s24, [#allocation9]  }
  0x27   :  { %s5725_s0 = smov [#allocation11]   ;;  %s5581_s20 = scalar_lea.hbm %s7000_s8, 256 }
  0x28   :  { %s89_s17 = sshll.u32 %s5725_s0, 4  ;;  %p5582_p2 = scmp.ne.s32.totalorder %s7000_s8, %s5581_s20  ;;  %s90_s17 = int_to_ptr.vmem [resolvable:$true] %s89_s17 }
  0x29   :  { %p5585_p3 = scmp.lt.u32.totalorder %s5581_s20, %s7000_s8 }
  0x2b   :  { %p5587_p4 = pnand %p5585_p3, %p5582_p2 }
  0x2d   :  { %5590 = shalt.err (!%p5587_p4)
}
  0x2e   :  { %s5591_s27 = scalar_lea.vmem %s90_s17, 256  ;;  %p5596_p6 = scmp.lt.s32.totalorder %s90_s17, %s90_s17 }
  0x2f   :  { %p5592_p5 = scmp.ne.s32.totalorder %s90_s17, %s5591_s27  ;;  %p5597_p7 = scmp.lt.s32.totalorder %s5591_s27, %s5591_s27 }
  0x31   :  { %p5598_p8 = por %p5597_p7, %p5596_p6 }
  0x33   :  { %p5599_p9 = pnand %p5598_p8, %p5592_p5 }
  0x35   :  { %5602 = shalt.err (!%p5599_p9)
}
  0x36   :  { %s5726_s5 = smov 128   ;;  %s5727_s24 = smov 8  }
  0x37   :  { %95 = dma.hbm_to_vmem [thread:$0]  %s7000_s8, 256, %s90_s17, [#allocation12], %s5726_s5, %s5726_s5, %s5727_s24  }
  0x38   :  { %s5728_s30 = smov [#allocation2]   ;;  %s5729_s22 = smov [#allocation7]  }
  0x39   :  { %s32_s2 = sshll.u32 %s5728_s30, 4  ;;  %s56_s0 = sshll.u32 %s5729_s22, 4  ;;  %s33_s2 = int_to_ptr.vmem [resolvable:$true] %s32_s2  ;;  %s57_s0 = int_to_ptr.vmem [resolvable:$true] %s56_s0 }
  0x3a   :  { %s7011_s20 = sld [smem:[#allocation20_spill]] }
  0x40   :  { %s5603_s21 = scalar_lea.hbm %s7011_s20, 128 }
  0x41   :  { %p5604_p10 = scmp.ne.s32.totalorder %s7011_s20, %s5603_s21  ;;  %p5607_p11 = scmp.lt.u32.totalorder %s5603_s21, %s7011_s20 }
  0x43   :  { %p5609_p12 = pnand %p5607_p11, %p5604_p10 }
  0x45   :  { %5612 = shalt.err (!%p5609_p12)
}
  0x46   :  { %s5613_s8 = scalar_lea.vmem %s33_s2, 128  ;;  %p5618_p0 = scmp.lt.s32.totalorder %s33_s2, %s33_s2 }
  0x47   :  { %p5614_p13 = scmp.ne.s32.totalorder %s33_s2, %s5613_s8  ;;  %p5619_p1 = scmp.lt.s32.totalorder %s5613_s8, %s5613_s8 }
  0x49   :  { %p5620_p2 = por %p5619_p1, %p5618_p0 }
  0x4b   :  { %p5621_p3 = pnand %p5620_p2, %p5614_p13 }
  0x4d   :  { %5624 = shalt.err (!%p5621_p3)
}
  0x4e   :  { %35 = dma.hbm_to_vmem [thread:$0]  %s7011_s20, 128, %s33_s2, [#allocation3]  }
  0x4f   :  { %s5625_s30 = scalar_lea.hbm %s6996_s4, 16 }
  0x50   :  { %p5626_p4 = scmp.ne.s32.totalorder %s6996_s4, %s5625_s30  ;;  %p5629_p5 = scmp.lt.u32.totalorder %s5625_s30, %s6996_s4 }
  0x52   :  { %p5631_p6 = pnand %p5629_p5, %p5626_p4 }
  0x54   :  { %5634 = shalt.err (!%p5631_p6)
}
  0x55   :  { %s5635_s23 = scalar_lea.vmem %s57_s0, 16  ;;  %s5639_s25 = scalar_lea.vmem %s57_s0, 32 }
  0x56   :  { %p5636_p7 = scmp.ne.s32.totalorder %s57_s0, %s5635_s23  ;;  %p5640_p8 = scmp.lt.s32.totalorder %s57_s0, %s57_s0 }
  0x57   :  { %p5641_p9 = scmp.lt.s32.totalorder %s5639_s25, %s5635_s23 }
  0x59   :  { %p5642_p10 = por %p5641_p9, %p5640_p8 }
  0x5b   :  { %p5643_p11 = pnand %p5642_p10, %p5636_p7 }
  0x5d   :  { %5646 = shalt.err (!%p5643_p11)
}
  0x5e   :  { %59 = dma.hbm_to_vmem [thread:$0]  %s6996_s4, 16, %s57_s0, [#allocation6]  }
  0x5f   :  { %s5730_s26 = smov [#allocation10]   ;;  %s5647_s5 = scalar_lea.hbm %s6998_s6, 10240 }
  0x60   :  { %s75_s27 = sshll.u32 %s5730_s26, 4  ;;  %p5648_p12 = scmp.ne.s32.totalorder %s6998_s6, %s5647_s5  ;;  %s76_s27 = int_to_ptr.vmem [resolvable:$true] %s75_s27 }
  0x61   :  { %p5651_p13 = scmp.lt.u32.totalorder %s5647_s5, %s6998_s6 }
  0x63   :  { %p5653_p0 = pnand %p5651_p13, %p5648_p12 }
  0x65   :  { %5656 = shalt.err (!%p5653_p0)
}
  0x66   :  { %s5657_s18 = scalar_lea.vmem %s76_s27, 10240  ;;  %p5662_p2 = scmp.lt.s32.totalorder %s76_s27, %s76_s27 }
  0x67   :  { %p5658_p1 = scmp.ne.s32.totalorder %s76_s27, %s5657_s18  ;;  %p5663_p3 = scmp.lt.s32.totalorder %s5657_s18, %s5657_s18 }
  0x69   :  { %p5664_p4 = por %p5663_p3, %p5662_p2 }
  0x6b   :  { %p5665_p5 = pnand %p5664_p4, %p5658_p1 }
  0x6d   :  { %5668 = shalt.err (!%p5665_p5)
}
  0x6e   :  { %s5731_s4 = smov 640   ;;  %s5732_s0 = smov 40  }
  0x6f   :  { %81 = dma.hbm_to_vmem [thread:$0]  %s6998_s6, 10240, %s76_s27, [#allocation9], %s5731_s4, %s5731_s4, %s5732_s0  }
  0x70   :  { %s5733_s23 = smov [#allocation13]   ;;  %s5669_s26 = scalar_lea.hbm %s7001_s9, 5120 }
  0x71   :  { %s101_s25 = sshll.u32 %s5733_s23, 4  ;;  %p5670_p6 = scmp.ne.s32.totalorder %s7001_s9, %s5669_s26  ;;  %s102_s25 = int_to_ptr.vmem [resolvable:$true] %s101_s25 }
  0x72   :  { %p5673_p7 = scmp.lt.u32.totalorder %s5669_s26, %s7001_s9 }
  0x74   :  { %p5675_p8 = pnand %p5673_p7, %p5670_p6 }
  0x76   :  { %5678 = shalt.err (!%p5675_p8)
}
  0x77   :  { %s5679_s29 = scalar_lea.vmem %s102_s25, 5120  ;;  %p5684_p10 = scmp.lt.s32.totalorder %s102_s25, %s102_s25 }
  0x78   :  { %p5680_p9 = scmp.ne.s32.totalorder %s102_s25, %s5679_s29  ;;  %p5685_p11 = scmp.lt.s32.totalorder %s5679_s29, %s5679_s29 }
  0x7a   :  { %p5686_p12 = por %p5685_p11, %p5684_p10 }
  0x7c   :  { %p5687_p13 = pnand %p5686_p12, %p5680_p9 }
  0x7e   :  { %5690 = shalt.err (!%p5687_p13)
}
  0x7f   :  { %107 = dma.hbm_to_vmem [thread:$0]  %s7001_s9, 5120, %s102_s25, [#allocation12], %s5731_s4, %s5731_s4, %s5732_s0  }
  0x80   :  { %5713 = dma.done.wait [#allocation3], 128  }
  0x81   :  { %5714 = vsyncadd [#allocation3], 4294967168 }
  0x82   :  { %5715 = dma.done.wait [#allocation6], 32  }
  0x83   :  { %5716 = vsyncadd [#allocation6], 4294967264 }
  0x84   :  { %5717 = dma.done.wait [#allocation9], 10368  }
  0x85   :  { %5718 = vsyncadd [#allocation9], 4294956928 }
  0x86   :  { %5719 = dma.done.wait [#allocation12], 5376  }
  0x87   :  { %5720 = vsyncadd [#allocation12], 4294961920  ;;  %v5734_v0 = vmov 0.0|0.0   ;;  %vm5735_vm0 = vmmov 0   ;;  %v5736_v1 = vmov 0.0   ;;  %v142_v2 = vld [vmem:[%s6993_s1] sm:$0xff] }
  0x88   :  { %4301 = vmatprep.subr.bf16.mxu0 %v5734_v0  ;;  %4083 = vmatprep.mubr.msk.f32.mxu0 %vm5735_vm0, %v5736_v1  ;;  %v143_v3 = vld [vmem:[%s6993_s1 + $0x8] sm:$0xff]  ;;  %v144_v4 = vld [vmem:[%s6993_s1 + $0x10] sm:$0xff]  ;;  %v145_v6 = vld [vmem:[%s6993_s1 + $0x18] sm:$0xff]  ;;  %vm157_vm1 = vcmask 523264   ;;  %vm357_vm4 = vcmask 64512   ;;  %s5738_s8 = smov 120  }
  0x89   :  { %4313 = vmatprep.subr.bf16.mxu1 %v5734_v0  ;;  %4102 = vmatprep.mubr.msk.f32.mxu1 %vm5735_vm0, %v5736_v1  ;;  %v4302_v5 = vpack.c.bf16 %v143_v3, %v142_v2  ;;  %v4305_v7 = vpack.c.bf16 %v145_v6, %v144_v4  ;;  %v234_v8 = vld [vmem:[%s6995_s3] sm:$0xff]  ;;  %v235_v9 = vld [vmem:[%s6995_s3 + $0x8] sm:$0xff]  ;;  %v236_v10 = vld [vmem:[%s6995_s3 + $0x10] sm:$0xff]  ;;  %s5739_s17 = smov 96   ;;  %s5740_s5 = smov 112   ;;  %vm760_vm5 = vcmask 121856  }
  0x8a   :  { %v146_v11 = vld [vmem:[%s6993_s1 + $0x20] sm:$0xff]  ;;  %v147_v12 = vld [vmem:[%s6993_s1 + $0x28] sm:$0xff]  ;;  %v4314_v13 = vpack.c.bf16 %v235_v9, %v234_v8  ;;  %v237_v14 = vld [vmem:[%s6995_s3 + $0x18] sm:$0xff]  ;;  %s5741_s28 = smov 80   ;;  %s5742_s29 = smov 88   ;;  %vm647_vm6 = vcmask 113664  }
  0x8b   :  { %4303 = vmatpush3.bf16.msra.mxu0 %v4302_v5  ;;  %v4317_v15 = vpack.c.bf16 %v237_v14, %v236_v10  ;;  %v4308_v16 = vpack.c.bf16 %v147_v12, %v146_v11  ;;  %v238_v17 = vld [vmem:[%s6995_s3 + $0x20] sm:$0xff]  ;;  %v239_v18 = vld [vmem:[%s6995_s3 + $0x28] sm:$0xff]  ;;  %v148_v19 = vld [vmem:[%s6993_s1 + $0x30] sm:$0xff]  ;;  %s5743_s6 = smov 64   ;;  %s5744_s27 = smov 72   ;;  %vm873_vm7 = vcmask 7168  }
  0x8c   :  { %4304 = vmatprep.subr.bf16.mxu0 %v5734_v0  ;;  %4315 = vmatpush3.bf16.msra.mxu1 %v4314_v13  ;;  %v149_v20 = vld [vmem:[%s6993_s1 + $0x38] sm:$0xff]  ;;  %v4320_v21 = vpack.c.bf16 %v239_v18, %v238_v17  ;;  %v141_v23 = vld [vmem:[#allocation2] sm:$0xff]  ;;  %v240_v24 = vld [vmem:[%s6995_s3 + $0x30] sm:$0xff]  ;;  %s5745_s30 = smov 48   ;;  %s5746_s22 = smov 56   ;;  %vm986_vm8 = vcmask 15360  }
  0x8d   :  { %4316 = vmatprep.subr.bf16.mxu1 %v5734_v0  ;;  %v4311_v22 = vpack.c.bf16 %v149_v20, %v148_v19  ;;  %v241_v25 = vld [vmem:[%s6995_s3 + $0x38] sm:$0xff]  ;;  %v3569_v27 = vld [vmem:[#allocation5] ss:$0 sm:$0xff]  ;;  %v356_v33 = vld [vmem:[#allocation8] sm:$0xff]  ;;  %s5737_s3 = smov 104   ;;  %s5747_s9 = smov 32  }
  0x8e   :  { %v4323_v26 = vpack.c.bf16 %v241_v25, %v240_v24  ;;  %v3571_v34 = vld [vmem:[#allocation7] ss:$0 sm:$0xff]  ;;  %s5748_s18 = smov 16   ;;  %s5749_s4 = smov 24   ;;  %v1004_v24 = vld [vmem:[#allocation10 + $0x8] sm:$0xff]  ;;  %v1006_v25 = vld [vmem:[#allocation10 + $0x18] sm:$0xff] }
  0x8f   :  { %4306 = vmatpush3.bf16.msra.mxu0 %v4305_v7  ;;  %s5752_s19 = smov 14   ;;  %s5753_s21 = smov 126   ;;  %vm1664_vm11 = vcmask 130048  }
  0x90   :  { %4307 = vmatprep.subr.bf16.mxu0 %v5734_v0  ;;  %4318 = vmatpush3.bf16.msra.mxu1 %v4317_v15  ;;  %s5754_s23 = smov 1   ;;  %s5755_s25 = smov 113  }
  0x91   :  { %4319 = vmatprep.subr.bf16.mxu1 %v5734_v0  ;;  %s5756_s2 = smov 2   ;;  %s5757_s20 = smov 114  }
  0x92   :  { %s5764_s1 = smov 65   ;;  %s5765_s26 = smov 63  }
  0x93   :  { %4309 = vmatpush3.bf16.msra.mxu0 %v4308_v16 }
  0x94   :  { %4310 = vmatprep.subr.bf16.mxu0 %v5734_v0  ;;  %4321 = vmatpush3.bf16.msra.mxu1 %v4320_v21 }
  0x95   :  { %4322 = vmatprep.subr.bf16.mxu1 %v5734_v0 }
  0x97   :  { %4312 = vmatpush3.bf16.msra.mxu0 %v4311_v22 }
  0x98   :  { %4324 = vmatpush3.bf16.msra.mxu1 %v4323_v26  ;;  %4105 = vmatprep.subr.mxu0 %v356_v33 }
  0x9a   :  { %4084 = vmatmul.mubr.msk.f32.vlgmr.msra.gmra.mrb[0].mxu0 %vm157_vm1, %v141_v23 }
  0x9b   :  { %4106 = vmatpush3.msra.mxu0 %v356_v33 }
 0x16d   :  { %v227_v28 = vpop.f32.mrb[0].mxu0 }
 0x16e   :  { %v228_v29 = vadd.f32 %v3569_v27, %v227_v28  ;;  %v4085_v30 = vpop.f32.mrb[1].mxu0 }
 0x170   :  { %vm231_vm2 = vcmp.gt.f32.partialorder %v228_v29, 0.0  ;;  %v232_v31 = vmul.f32 0.2, %v228_v29 }
 0x172   :  { %v233_v32 = vsel %vm231_vm2, %v228_v29, %v232_v31 }
 0x173   :  { %4103 = vmatmul.mubr.msk.f32.vlgmr.msra.gmra.mrb[0].mxu1 %vm157_vm1, %v233_v32 }
 0x174   :  { %1243 = vmatprep.mubr.f32.mxu1 %v1004_v24 }
 0x246   :  { %v318_v35 = vpop.f32.mrb[0].mxu1 }
 0x247   :  { %v319_v36 = vadd.f32 %v3571_v34, %v318_v35  ;;  %v4104_v37 = vpop.f32.mrb[1].mxu1 }
 0x249   :  { %vm322_vm3 = vcmp.gt.f32.partialorder %v319_v36, 0.0  ;;  %v323_v38 = vmul.f32 0.2, %v319_v36 }
 0x24b   :  { %v324_v39 = vsel %vm322_vm3, %v319_v36, %v323_v38 }
 0x24c   :  { %330 = vrot.lane.b32.xlu1 %v324_v39, %s5737_s3  ;;  %326 = vrot.lane.b32.xlu0 %v324_v39, %s5738_s8 }
 0x24d   :  { %4107 = vmatprep.mubr.msk.f32.mxu0 %vm357_vm4, %v324_v39 }
 0x250   :  { %332 = vrot.lane.b32.xlu1 %v324_v39, %s5739_s17  ;;  %328 = vrot.lane.b32.xlu0 %v324_v39, %s5740_s5  ;;  %s5766_s17 = smov 66  }
 0x254   :  { %336 = vrot.lane.b32.xlu1 %v324_v39, %s5741_s28  ;;  %334 = vrot.lane.b32.xlu0 %v324_v39, %s5742_s29 }
 0x258   :  { %340 = vrot.lane.b32.xlu1 %v324_v39, %s5743_s6  ;;  %338 = vrot.lane.b32.xlu0 %v324_v39, %s5744_s27 }
 0x25c   :  { %344 = vrot.lane.b32.xlu1 %v324_v39, %s5745_s30  ;;  %342 = vrot.lane.b32.xlu0 %v324_v39, %s5746_s22 }
 0x260   :  { %348 = vrot.lane.b32.xlu1 %v324_v39, %s5747_s9  ;;  %346 = vrot.lane.b32.xlu0 %v324_v39, %s5732_s0  ;;  %s5751_s0 = smov 127  }
 0x264   :  { %352 = vrot.lane.b32.xlu1 %v324_v39, %s5748_s18  ;;  %350 = vrot.lane.b32.xlu0 %v324_v39, %s5749_s4  ;;  %s5760_s18 = smov 30   ;;  %s5761_s4 = smov 97  }
 0x268   :  { %354 = vrot.lane.b32.xlu0 %v324_v39, %s5727_s24  ;;  %s5750_s24 = smov 15  }
 0x2be   :  { %v331_v40 = vpop.permute.xlu1 %330  ;;  %v327_v41 = vpop.permute.xlu0 %326 }
 0x2bf   :  { %4108 = vmatmul.mubr.msk.f32.vlgmr.msra.gmra.mrb[2].mxu0 %vm357_vm4, %v327_v41 }
 0x2c2   :  { %v333_v42 = vpop.permute.xlu1 %332  ;;  %v329_v43 = vpop.permute.xlu0 %328 }
 0x2c3   :  { %4110 = vmatprep.mubr.msk.f32.mxu0 %vm357_vm4, %v329_v43 }
 0x2c4   :  { %4111 = vmatmul.mubr.msk.f32.gmra.mrb[4].mxu0 %vm357_vm4, %v331_v40 }
 0x2c5   :  { %4113 = vmatprep.mubr.msk.f32.mxu0 %vm357_vm4, %v333_v42 }
 0x2c6   :  { %v337_v44 = vpop.permute.xlu1 %336  ;;  %v335_v45 = vpop.permute.xlu0 %334 }
 0x2c8   :  { %4114 = vmatmul.mubr.msk.f32.gmra.mrb[6].mxu0 %vm357_vm4, %v335_v45 }
 0x2c9   :  { %4116 = vmatprep.mubr.msk.f32.mxu0 %vm357_vm4, %v337_v44 }
 0x2ca   :  { %v341_v46 = vpop.permute.xlu1 %340  ;;  %v339_v47 = vpop.permute.xlu0 %338 }
 0x2cc   :  { %4117 = vmatmul.mubr.msk.f32.gmra.mrb[8].mxu0 %vm357_vm4, %v339_v47 }
 0x2cd   :  { %4119 = vmatprep.mubr.msk.f32.mxu0 %vm357_vm4, %v341_v46 }
 0x2ce   :  { %v345_v48 = vpop.permute.xlu1 %344  ;;  %v343_v49 = vpop.permute.xlu0 %342 }
 0x2d0   :  { %4120 = vmatmul.mubr.msk.f32.gmra.mrb[10].mxu0 %vm357_vm4, %v343_v49 }
 0x2d1   :  { %4122 = vmatprep.mubr.msk.f32.mxu0 %vm357_vm4, %v345_v48 }
 0x2d2   :  { %v349_v50 = vpop.permute.xlu1 %348  ;;  %v347_v51 = vpop.permute.xlu0 %346 }
 0x2d4   :  { %4123 = vmatmul.mubr.msk.f32.gmra.mrb[12].mxu0 %vm357_vm4, %v347_v51 }
 0x2d5   :  { %4125 = vmatprep.mubr.msk.f32.mxu0 %vm357_vm4, %v349_v50 }
 0x2d6   :  { %v351_v52 = vpop.permute.xlu0 %350  ;;  %v353_v53 = vpop.permute.xlu1 %352 }
 0x2d8   :  { %4126 = vmatmul.mubr.msk.f32.gmra.mrb[14].mxu0 %vm357_vm4, %v351_v52 }
 0x2d9   :  { %4128 = vmatprep.mubr.msk.f32.mxu0 %vm357_vm4, %v353_v53 }
 0x2da   :  { %v355_v54 = vpop.permute.xlu0 %354 }
 0x2dc   :  { %4129 = vmatmul.mubr.msk.f32.gmra.mrb[16].mxu0 %vm357_vm4, %v355_v54 }
 0x2dd   :  { %1388 = vmatprep.mubr.f32.mxu0 %v1006_v25 }
 0x392   :  { %v6016_v55 = vpop.f32.mrb[2].mxu0 }
 0x393   :  { %v6018_v56 = vpop.f32.mrb[3].mxu0 }
 0x394   :  { %v6022_v57 = vpack.i.bf16 %v6016_v55, %v6018_v56  ;;  %v4359_v58 = vpack.c.bf16 %v6016_v55, %v6018_v56 }
 0x396   :  { %4658 = vrot.lane.b32.xlu0 %v6022_v57, %s5750_s24  ;;  %4653 = vrot.lane.b32.xlu1 %v6022_v57, %s5751_s0 }
 0x397   :  { %v6030_v59 = vpop.f32.mrb[4].mxu0 }
 0x398   :  { %v6032_v60 = vpop.f32.mrb[5].mxu0 }
 0x399   :  { %v6036_v61 = vpack.i.bf16 %v6030_v59, %v6032_v60  ;;  %v4363_v63 = vpack.c.bf16 %v6030_v59, %v6032_v60 }
 0x39a   :  { %4668 = vrot.lane.b32.xlu0 %v6022_v57, %s5752_s19  ;;  %4663 = vrot.lane.b32.xlu1 %v6022_v57, %s5753_s21 }
 0x39b   :  { %v6042_v62 = vpop.f32.mrb[6].mxu0 }
 0x39c   :  { %v6046_v1 = vpop.f32.mrb[7].mxu0 }
 0x39d   :  { %v6050_v2 = vpack.i.bf16 %v6042_v62, %v6046_v1  ;;  %v4367_v4 = vpack.c.bf16 %v6042_v62, %v6046_v1 }
 0x39e   :  { %4678 = vrot.lane.b32.xlu0 %v6022_v57, %s5754_s23  ;;  %4673 = vrot.lane.b32.xlu1 %v6022_v57, %s5755_s25 }
 0x39f   :  { %v6056_v3 = vpop.f32.mrb[8].mxu0 }
 0x3a0   :  { %v6060_v5 = vpop.f32.mrb[9].mxu0 }
 0x3a1   :  { %v6064_v6 = vpack.i.bf16 %v6056_v3, %v6060_v5  ;;  %v4371_v8 = vpack.c.bf16 %v6056_v3, %v6060_v5 }
 0x3a2   :  { %4688 = vrot.lane.b32.xlu0 %v6036_v61, %s5750_s24  ;;  %4683 = vrot.lane.b32.xlu1 %v6036_v61, %s5751_s0 }
 0x3a3   :  { %v6070_v7 = vpop.f32.mrb[10].mxu0 }
 0x3a4   :  { %v6074_v9 = vpop.f32.mrb[11].mxu0 }
 0x3a5   :  { %v6078_v10 = vpack.i.bf16 %v6070_v7, %v6074_v9  ;;  %v4375_v12 = vpack.c.bf16 %v6070_v7, %v6074_v9 }
 0x3a6   :  { %4698 = vrot.lane.b32.xlu0 %v6036_v61, %s5752_s19  ;;  %4693 = vrot.lane.b32.xlu1 %v6036_v61, %s5753_s21 }
 0x3a7   :  { %v6084_v11 = vpop.f32.mrb[12].mxu0 }
 0x3a8   :  { %v6088_v13 = vpop.f32.mrb[13].mxu0 }
 0x3a9   :  { %v6092_v14 = vpack.i.bf16 %v6084_v11, %v6088_v13  ;;  %v4379_v16 = vpack.c.bf16 %v6084_v11, %v6088_v13 }
 0x3aa   :  { %4708 = vrot.lane.b32.xlu0 %v6050_v2, %s5750_s24  ;;  %4703 = vrot.lane.b32.xlu1 %v6050_v2, %s5751_s0 }
 0x3ab   :  { %v6098_v15 = vpop.f32.mrb[14].mxu0 }
 0x3ac   :  { %v6102_v17 = vpop.f32.mrb[15].mxu0 }
 0x3ad   :  { %v6106_v18 = vpack.i.bf16 %v6098_v15, %v6102_v17  ;;  %v4383_v20 = vpack.c.bf16 %v6098_v15, %v6102_v17  ;;  %v1005_v15 = vld [vmem:[#allocation10 + $0x10] sm:$0xff] }
 0x3ae   :  { %4718 = vrot.lane.b32.xlu0 %v6050_v2, %s5752_s19  ;;  %4713 = vrot.lane.b32.xlu1 %v6050_v2, %s5753_s21 }
 0x3af   :  { %v6112_v19 = vpop.f32.mrb[16].mxu0 }
 0x3b0   :  { %v6116_v21 = vpop.f32.mrb[17].mxu0 }
 0x3b1   :  { %v6120_v22 = vpack.i.bf16 %v6112_v19, %v6116_v21  ;;  %v4387_v23 = vpack.c.bf16 %v6112_v19, %v6116_v21  ;;  %v1010_v19 = vld [vmem:[#allocation10 + $0x38] sm:$0xff] }
 0x3b2   :  { %4728 = vrot.lane.b32.xlu0 %v6064_v6, %s5750_s24  ;;  %4723 = vrot.lane.b32.xlu1 %v6064_v6, %s5751_s0 }
 0x3b6   :  { %4738 = vrot.lane.b32.xlu0 %v6064_v6, %s5752_s19  ;;  %4733 = vrot.lane.b32.xlu1 %v6064_v6, %s5753_s21 }
 0x3ba   :  { %4748 = vrot.lane.b32.xlu0 %v6078_v10, %s5750_s24  ;;  %4743 = vrot.lane.b32.xlu1 %v6078_v10, %s5751_s0 }
 0x3be   :  { %4758 = vrot.lane.b32.xlu0 %v6078_v10, %s5752_s19  ;;  %4753 = vrot.lane.b32.xlu1 %v6078_v10, %s5753_s21 }
 0x3c2   :  { %4768 = vrot.lane.b32.xlu0 %v6092_v14, %s5750_s24  ;;  %4763 = vrot.lane.b32.xlu1 %v6092_v14, %s5751_s0 }
 0x3c6   :  { %4778 = vrot.lane.b32.xlu0 %v6092_v14, %s5752_s19  ;;  %4773 = vrot.lane.b32.xlu1 %v6092_v14, %s5753_s21 }
 0x3ca   :  { %4788 = vrot.lane.b32.xlu0 %v6106_v18, %s5750_s24  ;;  %4783 = vrot.lane.b32.xlu1 %v6106_v18, %s5751_s0 }
 0x3ce   :  { %4798 = vrot.lane.b32.xlu0 %v6106_v18, %s5752_s19  ;;  %4793 = vrot.lane.b32.xlu1 %v6106_v18, %s5753_s21 }
 0x3d2   :  { %4808 = vrot.lane.b32.xlu0 %v6120_v22, %s5750_s24  ;;  %4803 = vrot.lane.b32.xlu1 %v6120_v22, %s5751_s0  ;;  %s5762_s24 = smov 98  }
 0x3d6   :  { %4823 = vrot.lane.b32.xlu0 %v6120_v22, %s5752_s19  ;;  %4813 = vrot.lane.b32.xlu1 %v6120_v22, %s5753_s21 }
 0x3da   :  { %4828 = vrot.lane.b32.xlu0 %v6036_v61, %s5754_s23  ;;  %4818 = vrot.lane.b32.xlu1 %v6036_v61, %s5755_s25 }
 0x3de   :  { %4838 = vrot.lane.b32.xlu0 %v6050_v2, %s5754_s23  ;;  %4833 = vrot.lane.b32.xlu1 %v6050_v2, %s5755_s25 }
 0x3e2   :  { %4848 = vrot.lane.b32.xlu0 %v6064_v6, %s5754_s23  ;;  %4843 = vrot.lane.b32.xlu1 %v6064_v6, %s5755_s25 }
 0x3e6   :  { %4858 = vrot.lane.b32.xlu0 %v6078_v10, %s5754_s23  ;;  %4853 = vrot.lane.b32.xlu1 %v6078_v10, %s5755_s25 }
 0x3ea   :  { %4868 = vrot.lane.b32.xlu0 %v6092_v14, %s5754_s23  ;;  %4863 = vrot.lane.b32.xlu1 %v6092_v14, %s5755_s25 }
 0x3ee   :  { %4878 = vrot.lane.b32.xlu0 %v6106_v18, %s5754_s23  ;;  %4873 = vrot.lane.b32.xlu1 %v6106_v18, %s5755_s25 }
 0x3f2   :  { %4888 = vrot.lane.b32.xlu0 %v6120_v22, %s5754_s23  ;;  %4883 = vrot.lane.b32.xlu1 %v6120_v22, %s5755_s25 }
 0x3f6   :  { %4898 = vrot.lane.b32.xlu0 %v6022_v57, %s5756_s2  ;;  %4893 = vrot.lane.b32.xlu1 %v6022_v57, %s5757_s20 }
 0x3fa   :  { %4908 = vrot.lane.b32.xlu0 %v6036_v61, %s5756_s2  ;;  %4903 = vrot.lane.b32.xlu1 %v6036_v61, %s5757_s20 }
 0x3fe   :  { %4918 = vrot.lane.b32.xlu0 %v6050_v2, %s5756_s2  ;;  %4913 = vrot.lane.b32.xlu1 %v6050_v2, %s5757_s20 }
 0x402   :  { %4928 = vrot.lane.b32.xlu0 %v6064_v6, %s5756_s2  ;;  %4923 = vrot.lane.b32.xlu1 %v6064_v6, %s5757_s20 }
 0x406   :  { %4938 = vrot.lane.b32.xlu0 %v6078_v10, %s5756_s2  ;;  %4933 = vrot.lane.b32.xlu1 %v6078_v10, %s5757_s20 }
 0x408   :  { %v4659_v26 = vpop.permute.xlu0 %4658  ;;  %v4654_v27 = vpop.permute.xlu1 %4653 }
 0x409   :  { %v4661_v28 = vunpack.i.h.bf16 %v4659_v26  ;;  %v4660_v29 = vunpack.i.l.bf16 %v4659_v26  ;;  %v4656_v30 = vunpack.i.h.bf16 %v4654_v27  ;;  %v4655_v31 = vunpack.i.l.bf16 %v4654_v27 }
 0x40a   :  { %4948 = vrot.lane.b32.xlu0 %v6092_v14, %s5756_s2  ;;  %4943 = vrot.lane.b32.xlu1 %v6092_v14, %s5757_s20 }
 0x40b   :  { %v761_v32 = vsel %vm760_vm5, %v4655_v31, %v4660_v29  ;;  %v762_v33 = vsel %vm760_vm5, %v4656_v30, %v4661_v28 }
 0x40c   :  { %v4669_v34 = vpop.permute.xlu0 %4668  ;;  %v4664_v35 = vpop.permute.xlu1 %4663  ;;  %v4325_v36 = vpack.c.bf16 %v762_v33, %v761_v32 }
 0x40d   :  { %v4671_v37 = vunpack.i.h.bf16 %v4669_v34  ;;  %v4670_v38 = vunpack.i.l.bf16 %v4669_v34  ;;  %v4666_v39 = vunpack.i.h.bf16 %v4664_v35  ;;  %v4665_v40 = vunpack.i.l.bf16 %v4664_v35 }
 0x40e   :  { %4326 = vmatprep.subr.bf16.mxu1 %v4325_v36  ;;  %4958 = vrot.lane.b32.xlu0 %v6106_v18, %s5756_s2 }
 0x40f   :  { %v649_v41 = vsel %vm647_vm6, %v4666_v39, %v4671_v37  ;;  %v648_v42 = vsel %vm647_vm6, %v4665_v40, %v4670_v38  ;;  %4953 = vrot.lane.b32.xlu1 %v6106_v18, %s5757_s20 }
 0x410   :  { %v4679_v43 = vpop.permute.xlu0 %4678  ;;  %v4674_v44 = vpop.permute.xlu1 %4673  ;;  %v4327_v45 = vpack.c.bf16 %v649_v41, %v648_v42 }
 0x411   :  { %v4681_v46 = vunpack.i.h.bf16 %v4679_v43  ;;  %v4680_v47 = vunpack.i.l.bf16 %v4679_v43  ;;  %v4676_v48 = vunpack.i.h.bf16 %v4674_v44  ;;  %v4675_v49 = vunpack.i.l.bf16 %v4674_v44 }
 0x412   :  { %4328 = vmatpush3.bf16.msra.mxu1 %v4327_v45  ;;  %4968 = vrot.lane.b32.xlu0 %v6120_v22, %s5756_s2 }
 0x413   :  { %4963 = vrot.lane.b32.xlu1 %v6120_v22, %s5757_s20  ;;  %v874_v50 = vsel %vm873_vm7, %v4675_v49, %v4680_v47  ;;  %v875_v51 = vsel %vm873_vm7, %v4676_v48, %v4681_v46 }
 0x414   :  { %v4689_v52 = vpop.permute.xlu0 %4688  ;;  %v4684_v53 = vpop.permute.xlu1 %4683  ;;  %v4357_v54 = vpack.c.bf16 %v875_v51, %v874_v50 }
 0x415   :  { %v4691_v57 = vunpack.i.h.bf16 %v4689_v52  ;;  %v4690_v61 = vunpack.i.l.bf16 %v4689_v52  ;;  %v4686_v2 = vunpack.i.h.bf16 %v4684_v53  ;;  %v4685_v6 = vunpack.i.l.bf16 %v4684_v53 }
 0x416   :  { %4358 = vmatprep.subr.bf16.mxu0 %v4357_v54 }
 0x417   :  { %4360 = vmatpush3.bf16.msra.mxu0 %v4359_v58  ;;  %v763_v10 = vsel %vm760_vm5, %v4685_v6, %v4690_v61  ;;  %v764_v14 = vsel %vm760_vm5, %v4686_v2, %v4691_v57 }
 0x418   :  { %v4699_v18 = vpop.permute.xlu0 %4698  ;;  %v4694_v22 = vpop.permute.xlu1 %4693  ;;  %v4329_v24 = vpack.c.bf16 %v764_v14, %v763_v10 }
 0x419   :  { %v4701_v25 = vunpack.i.h.bf16 %v4699_v18  ;;  %v4700_v26 = vunpack.i.l.bf16 %v4699_v18  ;;  %v4696_v27 = vunpack.i.h.bf16 %v4694_v22  ;;  %v4695_v28 = vunpack.i.l.bf16 %v4694_v22 }
 0x41a   :  { %4330 = vmatprep.subr.bf16.mxu1 %v4329_v24  ;;  %v5758_v22 = vmov 0   ;;  %v1083_v24 = vld [vmem:[%s6999_s7] sm:$0xff] }
 0x41b   :  { %v651_v29 = vsel %vm647_vm6, %v4696_v27, %v4701_v25  ;;  %v650_v30 = vsel %vm647_vm6, %v4695_v28, %v4700_v26  ;;  %4972 = vset.pattern.permute.xlu1 %v5758_v22  ;;  %4973 = vset.pattern.permute.xlu0 %v5758_v22 }
 0x41c   :  { %v4709_v31 = vpop.permute.xlu0 %4708  ;;  %v4704_v32 = vpop.permute.xlu1 %4703  ;;  %v4331_v55 = vpack.c.bf16 %v651_v29, %v650_v30  ;;  %1101 = vperm.xlu1 %4972, %v1083_v24  }
 0x41d   :  { %v4711_v56 = vunpack.i.h.bf16 %v4709_v31  ;;  %v4710_v58 = vunpack.i.l.bf16 %v4709_v31  ;;  %v4706_v33 = vunpack.i.h.bf16 %v4704_v32  ;;  %v4705_v34 = vunpack.i.l.bf16 %v4704_v32 }
 0x41e   :  { %4332 = vmatpush3.bf16.msra.mxu1 %v4331_v55 }
 0x41f   :  { %v765_v35 = vsel %vm760_vm5, %v4705_v34, %v4710_v58  ;;  %v766_v36 = vsel %vm760_vm5, %v4706_v33, %v4711_v56  ;;  %v1084_v56 = vld [vmem:[%s6999_s7 + $0x8] sm:$0xff]  ;;  %v1085_v58 = vld [vmem:[%s6999_s7 + $0x10] sm:$0xff] }
 0x420   :  { %v4719_v37 = vpop.permute.xlu0 %4718  ;;  %v4714_v38 = vpop.permute.xlu1 %4713  ;;  %v4333_v39 = vpack.c.bf16 %v766_v36, %v765_v35  ;;  %1106 = vperm.xlu0 %4973, %v1084_v56   ;;  %1111 = vperm.xlu1 %4972, %v1085_v58   ;;  %v1087_v35 = vld [vmem:[%s6999_s7 + $0x20] sm:$0xff] }
 0x421   :  { %v4721_v40 = vunpack.i.h.bf16 %v4719_v37  ;;  %v4720_v41 = vunpack.i.l.bf16 %v4719_v37  ;;  %v4716_v42 = vunpack.i.h.bf16 %v4714_v38  ;;  %v4715_v43 = vunpack.i.l.bf16 %v4714_v38 }
 0x422   :  { %4334 = vmatprep.subr.bf16.mxu1 %v4333_v39  ;;  %v1086_v39 = vld [vmem:[%s6999_s7 + $0x18] sm:$0xff] }
 0x423   :  { %v653_v44 = vsel %vm647_vm6, %v4716_v42, %v4721_v40  ;;  %v652_v45 = vsel %vm647_vm6, %v4715_v43, %v4720_v41 }
 0x424   :  { %v4729_v46 = vpop.permute.xlu0 %4728  ;;  %v4724_v47 = vpop.permute.xlu1 %4723  ;;  %v4335_v48 = vpack.c.bf16 %v653_v44, %v652_v45  ;;  %1121 = vperm.xlu0 %4973, %v1087_v35   ;;  %1116 = vperm.xlu1 %4972, %v1086_v39  }
 0x425   :  { %v4731_v49 = vunpack.i.h.bf16 %v4729_v46  ;;  %v4730_v50 = vunpack.i.l.bf16 %v4729_v46  ;;  %v4726_v51 = vunpack.i.h.bf16 %v4724_v47  ;;  %v4725_v52 = vunpack.i.l.bf16 %v4724_v47  ;;  %v1089_v46 = vld [vmem:[%s6999_s7 + $0x30] sm:$0xff] }
 0x426   :  { %4336 = vmatpush3.bf16.msra.mxu1 %v4335_v48 }
 0x427   :  { %v767_v53 = vsel %vm760_vm5, %v4725_v52, %v4730_v50  ;;  %v768_v54 = vsel %vm760_vm5, %v4726_v51, %v4731_v49  ;;  %v1088_v50 = vld [vmem:[%s6999_s7 + $0x28] sm:$0xff] }
 0x428   :  { %v4739_v57 = vpop.permute.xlu0 %4738  ;;  %v4734_v61 = vpop.permute.xlu1 %4733  ;;  %v4337_v2 = vpack.c.bf16 %v768_v54, %v767_v53  ;;  %1131 = vperm.xlu0 %4973, %v1089_v46   ;;  %1126 = vperm.xlu1 %4972, %v1088_v50  }
 0x429   :  { %v4741_v6 = vunpack.i.h.bf16 %v4739_v57  ;;  %v4740_v10 = vunpack.i.l.bf16 %v4739_v57  ;;  %v4736_v14 = vunpack.i.h.bf16 %v4734_v61  ;;  %v4735_v18 = vunpack.i.l.bf16 %v4734_v61 }
 0x42a   :  { %4338 = vmatprep.subr.bf16.mxu1 %v4337_v2  ;;  %v1091_v2 = vld [vmem:[%s6999_s7 + $0x40] sm:$0xff] }
 0x42b   :  { %v655_v25 = vsel %vm647_vm6, %v4736_v14, %v4741_v6  ;;  %v654_v26 = vsel %vm647_vm6, %v4735_v18, %v4740_v10  ;;  %v1090_v18 = vld [vmem:[%s6999_s7 + $0x38] sm:$0xff] }
 0x42c   :  { %v4749_v27 = vpop.permute.xlu0 %4748  ;;  %v4744_v28 = vpop.permute.xlu1 %4743  ;;  %v4339_v29 = vpack.c.bf16 %v655_v25, %v654_v26  ;;  %1141 = vperm.xlu0 %4973, %v1091_v2   ;;  %1136 = vperm.xlu1 %4972, %v1090_v18  }
 0x42d   :  { %v4751_v30 = vunpack.i.h.bf16 %v4749_v27  ;;  %v4750_v31 = vunpack.i.l.bf16 %v4749_v27  ;;  %v4746_v32 = vunpack.i.h.bf16 %v4744_v28  ;;  %v4745_v55 = vunpack.i.l.bf16 %v4744_v28 }
 0x42e   :  { %4340 = vmatpush3.bf16.msra.mxu1 %v4339_v29  ;;  %v1093_v29 = vld [vmem:[%s6999_s7 + $0x50] sm:$0xff] }
 0x42f   :  { %v769_v33 = vsel %vm760_vm5, %v4745_v55, %v4750_v31  ;;  %v770_v34 = vsel %vm760_vm5, %v4746_v32, %v4751_v30  ;;  %v1092_v55 = vld [vmem:[%s6999_s7 + $0x48] sm:$0xff] }
 0x430   :  { %v4759_v36 = vpop.permute.xlu0 %4758  ;;  %v4754_v37 = vpop.permute.xlu1 %4753  ;;  %v4341_v38 = vpack.c.bf16 %v770_v34, %v769_v33  ;;  %1151 = vperm.xlu0 %4973, %v1093_v29   ;;  %1146 = vperm.xlu1 %4972, %v1092_v55  }
 0x431   :  { %v4761_v40 = vunpack.i.h.bf16 %v4759_v36  ;;  %v4760_v41 = vunpack.i.l.bf16 %v4759_v36  ;;  %v4756_v42 = vunpack.i.h.bf16 %v4754_v37  ;;  %v4755_v43 = vunpack.i.l.bf16 %v4754_v37  ;;  %v1095_v37 = vld [vmem:[%s6999_s7 + $0x60] sm:$0xff] }
 0x432   :  { %4342 = vmatprep.subr.bf16.mxu1 %v4341_v38 }
 0x433   :  { %v657_v44 = vsel %vm647_vm6, %v4756_v42, %v4761_v40  ;;  %v656_v45 = vsel %vm647_vm6, %v4755_v43, %v4760_v41  ;;  %v1094_v41 = vld [vmem:[%s6999_s7 + $0x58] sm:$0xff] }
 0x434   :  { %v4769_v47 = vpop.permute.xlu0 %4768  ;;  %v4764_v48 = vpop.permute.xlu1 %4763  ;;  %v4343_v49 = vpack.c.bf16 %v657_v44, %v656_v45  ;;  %1161 = vperm.xlu0 %4973, %v1095_v37   ;;  %1156 = vperm.xlu1 %4972, %v1094_v41   ;;  %v1009_v37 = vld [vmem:[#allocation10 + $0x30] sm:$0xff] }
 0x435   :  { %v4771_v51 = vunpack.i.h.bf16 %v4769_v47  ;;  %v4770_v52 = vunpack.i.l.bf16 %v4769_v47  ;;  %v4766_v53 = vunpack.i.h.bf16 %v4764_v48  ;;  %v4765_v54 = vunpack.i.l.bf16 %v4764_v48  ;;  %v1097_v48 = vld [vmem:[%s6999_s7 + $0x70] sm:$0xff] }
 0x436   :  { %4344 = vmatpush3.bf16.msra.mxu1 %v4343_v49 }
 0x437   :  { %v771_v57 = vsel %vm760_vm5, %v4765_v54, %v4770_v52  ;;  %v772_v61 = vsel %vm760_vm5, %v4766_v53, %v4771_v51  ;;  %v1096_v52 = vld [vmem:[%s6999_s7 + $0x68] sm:$0xff] }
 0x438   :  { %v4779_v6 = vpop.permute.xlu0 %4778  ;;  %v4774_v10 = vpop.permute.xlu1 %4773  ;;  %v4345_v14 = vpack.c.bf16 %v772_v61, %v771_v57  ;;  %1171 = vperm.xlu0 %4973, %v1097_v48   ;;  %1166 = vperm.xlu1 %4972, %v1096_v52   ;;  %v1014_v48 = vld [vmem:[#allocation10 + $0x58] sm:$0xff] }
 0x439   :  { %v4781_v22 = vunpack.i.h.bf16 %v4779_v6  ;;  %v4780_v24 = vunpack.i.l.bf16 %v4779_v6  ;;  %v4776_v25 = vunpack.i.h.bf16 %v4774_v10  ;;  %v4775_v26 = vunpack.i.l.bf16 %v4774_v10 }
 0x43a   :  { %4346 = vmatprep.subr.bf16.mxu1 %v4345_v14 }
 0x43b   :  { %v659_v27 = vsel %vm647_vm6, %v4776_v25, %v4781_v22  ;;  %v658_v28 = vsel %vm647_vm6, %v4775_v26, %v4780_v24  ;;  %v1098_v22 = vld [vmem:[%s6999_s7 + $0x78] sm:$0xff]  ;;  %s5759_s7 = smov 31  }
 0x43c   :  { %v4789_v30 = vpop.permute.xlu0 %4788  ;;  %v4784_v31 = vpop.permute.xlu1 %4783  ;;  %v4347_v32 = vpack.c.bf16 %v659_v27, %v658_v28  ;;  %1176 = vperm.xlu1 %4972, %v1098_v22  }
 0x43d   :  { %v4791_v56 = vunpack.i.h.bf16 %v4789_v30  ;;  %v4790_v58 = vunpack.i.l.bf16 %v4789_v30  ;;  %v4786_v33 = vunpack.i.h.bf16 %v4784_v31  ;;  %v4785_v34 = vunpack.i.l.bf16 %v4784_v31 }
 0x43e   :  { %4348 = vmatpush3.bf16.msra.mxu1 %v4347_v32 }
 0x43f   :  { %v773_v35 = vsel %vm760_vm5, %v4785_v34, %v4790_v58  ;;  %v774_v36 = vsel %vm760_vm5, %v4786_v33, %v4791_v56  ;;  %v1003_v34 = vld [vmem:[#allocation10] sm:$0xff] }
 0x440   :  { %v4799_v38 = vpop.permute.xlu0 %4798  ;;  %v4794_v39 = vpop.permute.xlu1 %4793  ;;  %v4349_v40 = vpack.c.bf16 %v774_v36, %v773_v35 }
 0x441   :  { %v4801_v42 = vunpack.i.h.bf16 %v4799_v38  ;;  %v4800_v43 = vunpack.i.l.bf16 %v4799_v38  ;;  %v4796_v44 = vunpack.i.h.bf16 %v4794_v39  ;;  %v4795_v45 = vunpack.i.l.bf16 %v4794_v39 }
 0x442   :  { %4350 = vmatprep.subr.bf16.mxu1 %v4349_v40 }
 0x443   :  { %v661_v46 = vsel %vm647_vm6, %v4796_v44, %v4801_v42  ;;  %v660_v47 = vsel %vm647_vm6, %v4795_v45, %v4800_v43  ;;  %v1008_v45 = vld [vmem:[#allocation10 + $0x28] sm:$0xff] }
 0x444   :  { %v4809_v49 = vpop.permute.xlu0 %4808  ;;  %v4804_v50 = vpop.permute.xlu1 %4803  ;;  %v4351_v51 = vpack.c.bf16 %v661_v46, %v660_v47 }
 0x445   :  { %v4811_v53 = vunpack.i.h.bf16 %v4809_v49  ;;  %v4810_v54 = vunpack.i.l.bf16 %v4809_v49  ;;  %v4806_v57 = vunpack.i.h.bf16 %v4804_v50  ;;  %v4805_v61 = vunpack.i.l.bf16 %v4804_v50 }
 0x446   :  { %4352 = vmatpush3.bf16.msra.mxu1 %v4351_v51 }
 0x447   :  { %v775_v2 = vsel %vm760_vm5, %v4805_v61, %v4810_v54  ;;  %v776_v6 = vsel %vm760_vm5, %v4806_v57, %v4811_v53  ;;  %v1013_v61 = vld [vmem:[#allocation10 + $0x50] sm:$0xff] }
 0x448   :  { %v4824_v10 = vpop.permute.xlu0 %4823  ;;  %v4814_v14 = vpop.permute.xlu1 %4813  ;;  %v4353_v18 = vpack.c.bf16 %v776_v6, %v775_v2 }
 0x449   :  { %v4826_v24 = vunpack.i.h.bf16 %v4824_v10  ;;  %v4825_v25 = vunpack.i.l.bf16 %v4824_v10  ;;  %v4816_v26 = vunpack.i.h.bf16 %v4814_v14  ;;  %v4815_v27 = vunpack.i.l.bf16 %v4814_v14 }
 0x44a   :  { %4354 = vmatprep.subr.bf16.mxu1 %v4353_v18 }
 0x44b   :  { %v663_v28 = vsel %vm647_vm6, %v4816_v26, %v4826_v24  ;;  %v662_v29 = vsel %vm647_vm6, %v4815_v27, %v4825_v25  ;;  %v1018_v25 = vld [vmem:[#allocation10 + $0x78] sm:$0xff] }
 0x44c   :  { %v4829_v30 = vpop.permute.xlu0 %4828  ;;  %v4819_v31 = vpop.permute.xlu1 %4818  ;;  %v4355_v32 = vpack.c.bf16 %v663_v28, %v662_v29 }
 0x44d   :  { %v4831_v55 = vunpack.i.h.bf16 %v4829_v30  ;;  %v4830_v56 = vunpack.i.l.bf16 %v4829_v30  ;;  %v4821_v58 = vunpack.i.h.bf16 %v4819_v31  ;;  %v4820_v33 = vunpack.i.l.bf16 %v4819_v31 }
 0x44e   :  { %4356 = vmatpush3.bf16.msra.mxu1 %v4355_v32 }
 0x44f   :  { %v876_v35 = vsel %vm873_vm7, %v4820_v33, %v4830_v56  ;;  %v877_v36 = vsel %vm873_vm7, %v4821_v58, %v4831_v55  ;;  %v1023_v55 = vld [vmem:[#allocation10 + $0xa0] sm:$0xff] }
 0x450   :  { %v4839_v38 = vpop.permute.xlu0 %4838  ;;  %v4834_v39 = vpop.permute.xlu1 %4833  ;;  %v4361_v40 = vpack.c.bf16 %v877_v36, %v876_v35 }
 0x451   :  { %v4841_v41 = vunpack.i.h.bf16 %v4839_v38  ;;  %v4840_v42 = vunpack.i.l.bf16 %v4839_v38  ;;  %v4836_v43 = vunpack.i.h.bf16 %v4834_v39  ;;  %v4835_v44 = vunpack.i.l.bf16 %v4834_v39  ;;  %1244 = vmatmul.mubr.f32.vlgmr.msra.gmra.mrb[2].mxu1 %v1003_v34  ;;  %v1028_v38 = vld [vmem:[#allocation10 + $0xc8] sm:$0xff] }
 0x452   :  { %4362 = vmatprep.subr.bf16.mxu0 %v4361_v40  ;;  %1248 = vmatprep.mubr.f32.mxu1 %v1009_v37 }
 0x453   :  { %4364 = vmatpush3.bf16.msra.mxu0 %v4363_v63  ;;  %v878_v46 = vsel %vm873_vm7, %v4835_v44, %v4840_v42  ;;  %v879_v47 = vsel %vm873_vm7, %v4836_v43, %v4841_v41  ;;  %v1019_v63 = vld [vmem:[#allocation10 + $0x80] sm:$0xff] }
 0x454   :  { %v4849_v49 = vpop.permute.xlu0 %4848  ;;  %v4844_v50 = vpop.permute.xlu1 %4843  ;;  %v4365_v51 = vpack.c.bf16 %v879_v47, %v878_v46  ;;  %v1033_v46 = vld [vmem:[#allocation10 + $0xf0] sm:$0xff] }
 0x455   :  { %v4851_v52 = vunpack.i.h.bf16 %v4849_v49  ;;  %v4850_v53 = vunpack.i.l.bf16 %v4849_v49  ;;  %v4846_v54 = vunpack.i.h.bf16 %v4844_v50  ;;  %v4845_v57 = vunpack.i.l.bf16 %v4844_v50  ;;  %1249 = vmatmul.mubr.f32.gmra.mrb[4].mxu1 %v1008_v45 }
 0x456   :  { %4366 = vmatprep.subr.bf16.mxu0 %v4365_v51  ;;  %1253 = vmatprep.mubr.f32.mxu1 %v1014_v48 }
 0x457   :  { %4368 = vmatpush3.bf16.msra.mxu0 %v4367_v4  ;;  %v880_v59 = vsel %vm873_vm7, %v4845_v57, %v4850_v53  ;;  %v881_v60 = vsel %vm873_vm7, %v4846_v54, %v4851_v52  ;;  %v1024_v4 = vld [vmem:[#allocation10 + $0xa8] sm:$0xff]  ;;  %v1038_v54 = vld [vmem:[#allocation10 + $0x118] sm:$0xff] }
 0x458   :  { %v4859_v2 = vpop.permute.xlu0 %4858  ;;  %v4854_v6 = vpop.permute.xlu1 %4853  ;;  %v4369_v10 = vpack.c.bf16 %v881_v60, %v880_v59  ;;  %v1044_v60 = vld [vmem:[#allocation10 + $0x148] sm:$0xff] }
 0x459   :  { %v4861_v14 = vunpack.i.h.bf16 %v4859_v2  ;;  %v4860_v18 = vunpack.i.l.bf16 %v4859_v2  ;;  %v4856_v22 = vunpack.i.h.bf16 %v4854_v6  ;;  %v4855_v24 = vunpack.i.l.bf16 %v4854_v6  ;;  %1254 = vmatmul.mubr.f32.gmra.mrb[6].mxu1 %v1013_v61 }
 0x45a   :  { %4370 = vmatprep.subr.bf16.mxu0 %v4369_v10  ;;  %1258 = vmatprep.mubr.f32.mxu1 %v1019_v63 }
 0x45b   :  { %4372 = vmatpush3.bf16.msra.mxu0 %v4371_v8  ;;  %v882_v62 = vsel %vm873_vm7, %v4855_v24, %v4860_v18  ;;  %v883_v1 = vsel %vm873_vm7, %v4856_v22, %v4861_v14  ;;  %v1029_v8 = vld [vmem:[#allocation10 + $0xd0] sm:$0xff]  ;;  %v1011_v14 = vld [vmem:[#allocation10 + $0x40] sm:$0xff] }
 0x45c   :  { %v4869_v26 = vpop.permute.xlu0 %4868  ;;  %v4864_v27 = vpop.permute.xlu1 %4863  ;;  %v4373_v28 = vpack.c.bf16 %v883_v1, %v882_v62  ;;  %v1043_v18 = vld [vmem:[#allocation10 + $0x140] sm:$0xff]  ;;  %v1049_v62 = vld [vmem:[#allocation10 + $0x170] sm:$0xff] }
 0x45d   :  { %v4871_v29 = vunpack.i.h.bf16 %v4869_v26  ;;  %v4870_v30 = vunpack.i.l.bf16 %v4869_v26  ;;  %v4866_v31 = vunpack.i.h.bf16 %v4864_v27  ;;  %v4865_v32 = vunpack.i.l.bf16 %v4864_v27  ;;  %1259 = vmatmul.mubr.f32.gmra.mrb[8].mxu1 %v1018_v25 }
 0x45e   :  { %4374 = vmatprep.subr.bf16.mxu0 %v4373_v28  ;;  %1263 = vmatprep.mubr.f32.mxu1 %v1024_v4  ;;  %v1016_v28 = vld [vmem:[#allocation10 + $0x68] sm:$0xff] }
 0x45f   :  { %4376 = vmatpush3.bf16.msra.mxu0 %v4375_v12  ;;  %v884_v3 = vsel %vm873_vm7, %v4865_v32, %v4870_v30  ;;  %v885_v5 = vsel %vm873_vm7, %v4866_v31, %v4871_v29  ;;  %v1034_v12 = vld [vmem:[#allocation10 + $0xf8] sm:$0xff]  ;;  %v1048_v29 = vld [vmem:[#allocation10 + $0x168] sm:$0xff]  ;;  %v1015_v30 = vld [vmem:[#allocation10 + $0x60] sm:$0xff] }
 0x460   :  { %v4879_v56 = vpop.permute.xlu0 %4878  ;;  %v4874_v58 = vpop.permute.xlu1 %4873  ;;  %v4377_v33 = vpack.c.bf16 %v885_v5, %v884_v3 }
 0x461   :  { %v4881_v34 = vunpack.i.h.bf16 %v4879_v56  ;;  %v4880_v35 = vunpack.i.l.bf16 %v4879_v56  ;;  %v4876_v36 = vunpack.i.h.bf16 %v4874_v58  ;;  %v4875_v37 = vunpack.i.l.bf16 %v4874_v58  ;;  %1264 = vmatmul.mubr.f32.gmra.mrb[10].mxu1 %v1023_v55 }
 0x462   :  { %4378 = vmatprep.subr.bf16.mxu0 %v4377_v33  ;;  %1268 = vmatprep.mubr.f32.mxu1 %v1029_v8  ;;  %v1054_v8 = vld [vmem:[#allocation10 + $0x198] sm:$0xff] }
 0x463   :  { %4380 = vmatpush3.bf16.msra.mxu0 %v4379_v16  ;;  %v886_v7 = vsel %vm873_vm7, %v4875_v37, %v4880_v35  ;;  %v887_v9 = vsel %vm873_vm7, %v4876_v36, %v4881_v34  ;;  %v1039_v16 = vld [vmem:[#allocation10 + $0x120] sm:$0xff]  ;;  %v1021_v35 = vld [vmem:[#allocation10 + $0x90] sm:$0xff]  ;;  %v1020_v37 = vld [vmem:[#allocation10 + $0x88] sm:$0xff] }
 0x464   :  { %v4889_v39 = vpop.permute.xlu0 %4888  ;;  %v4884_v40 = vpop.permute.xlu1 %4883  ;;  %v4381_v41 = vpack.c.bf16 %v887_v9, %v886_v7  ;;  %v1053_v36 = vld [vmem:[#allocation10 + $0x190] sm:$0xff] }
 0x465   :  { %v4891_v42 = vunpack.i.h.bf16 %v4889_v39  ;;  %v4890_v43 = vunpack.i.l.bf16 %v4889_v39  ;;  %v4886_v44 = vunpack.i.h.bf16 %v4884_v40  ;;  %v4885_v45 = vunpack.i.l.bf16 %v4884_v40  ;;  %1269 = vmatmul.mubr.f32.gmra.mrb[12].mxu1 %v1028_v38  ;;  %v1059_v40 = vld [vmem:[#allocation10 + $0x1c0] sm:$0xff] }
 0x466   :  { %4382 = vmatprep.subr.bf16.mxu0 %v4381_v41  ;;  %1273 = vmatprep.mubr.f32.mxu1 %v1034_v12 }
 0x467   :  { %4384 = vmatpush3.bf16.msra.mxu0 %v4383_v20  ;;  %v888_v11 = vsel %vm873_vm7, %v4885_v45, %v4890_v43  ;;  %v889_v13 = vsel %vm873_vm7, %v4886_v44, %v4891_v42  ;;  %v1026_v45 = vld [vmem:[#allocation10 + $0xb8] sm:$0xff] }
 0x468   :  { %v4899_v47 = vpop.permute.xlu0 %4898  ;;  %v4894_v48 = vpop.permute.xlu1 %4893  ;;  %v4385_v49 = vpack.c.bf16 %v889_v13, %v888_v11  ;;  %v1025_v11 = vld [vmem:[#allocation10 + $0xb0] sm:$0xff] }
 0x469   :  { %v4901_v50 = vunpack.i.h.bf16 %v4899_v47  ;;  %v4900_v51 = vunpack.i.l.bf16 %v4899_v47  ;;  %v4896_v52 = vunpack.i.h.bf16 %v4894_v48  ;;  %v4895_v53 = vunpack.i.l.bf16 %v4894_v48  ;;  %1274 = vmatmul.mubr.f32.gmra.mrb[14].mxu1 %v1033_v46  ;;  %v1058_v46 = vld [vmem:[#allocation10 + $0x1b8] sm:$0xff] }
 0x46a   :  { %4386 = vmatprep.subr.bf16.mxu0 %v4385_v49  ;;  %1278 = vmatprep.mubr.f32.mxu1 %v1039_v16 }
 0x46b   :  { %4388 = vmatpush3.bf16.msra.mxu0 %v4387_v23  ;;  %v987_v17 = vsel %vm986_vm8, %v4895_v53, %v4900_v51  ;;  %v988_v20 = vsel %vm986_vm8, %v4896_v52, %v4901_v50  ;;  %v1064_v50 = vld [vmem:[#allocation10 + $0x1e8] sm:$0xff] }
 0x46c   :  { %v4909_v57 = vpop.permute.xlu0 %4908  ;;  %v4904_v61 = vpop.permute.xlu1 %4903  ;;  %v4389_v59 = vpack.c.bf16 %v988_v20, %v987_v17  ;;  %v1063_v17 = vld [vmem:[#allocation10 + $0x1e0] sm:$0xff]  ;;  %v1030_v20 = vld [vmem:[#allocation10 + $0xd8] sm:$0xff] }
 0x46d   :  { %v4911_v63 = vunpack.i.h.bf16 %v4909_v57  ;;  %v4910_v2 = vunpack.i.l.bf16 %v4909_v57  ;;  %v4906_v6 = vunpack.i.h.bf16 %v4904_v61  ;;  %v4905_v10 = vunpack.i.l.bf16 %v4904_v61  ;;  %1279 = vmatmul.mubr.f32.gmra.mrb[16].mxu1 %v1038_v54 }
 0x46e   :  { %1389 = vmatmul.mubr.f32.vlgmr.msra.gmra.mrb[18].mxu0 %v1005_v15  ;;  %4390 = vmatprep.subr.bf16.mxu1 %v4389_v59  ;;  %v1031_v15 = vld [vmem:[#allocation10 + $0xe0] sm:$0xff] }
 0x46f   :  { %4392 = vmatpush3.bf16.msra.mxu1 %v4389_v59  ;;  %1283 = vmatprep.mubr.f32.mxu1 %v1044_v60  ;;  %v989_v21 = vsel %vm986_vm8, %v4905_v10, %v4910_v2  ;;  %v990_v23 = vsel %vm986_vm8, %v4906_v6, %v4911_v63  ;;  %v1069_v63 = vld [vmem:[#allocation10 + $0x210] sm:$0xff] }
 0x470   :  { %v4919_v22 = vpop.permute.xlu0 %4918  ;;  %v4914_v24 = vpop.permute.xlu1 %4913  ;;  %1393 = vmatprep.mubr.f32.mxu0 %v1011_v14  ;;  %v4393_v25 = vpack.c.bf16 %v990_v23, %v989_v21  ;;  %v1036_v14 = vld [vmem:[#allocation10 + $0x108] sm:$0xff]  ;;  %v1035_v23 = vld [vmem:[#allocation10 + $0x100] sm:$0xff] }
 0x471   :  { %v4921_v1 = vunpack.i.h.bf16 %v4919_v22  ;;  %v4920_v4 = vunpack.i.l.bf16 %v4919_v22  ;;  %v4916_v26 = vunpack.i.h.bf16 %v4914_v24  ;;  %v4915_v27 = vunpack.i.l.bf16 %v4914_v24  ;;  %1284 = vmatmul.mubr.f32.gmra.mrb[18].mxu1 %v1043_v18  ;;  %v1068_v21 = vld [vmem:[#allocation10 + $0x208] sm:$0xff]  ;;  %v1074_v22 = vld [vmem:[#allocation10 + $0x238] sm:$0xff] }
 0x472   :  { %1394 = vmatmul.mubr.f32.gmra.mrb[20].mxu0 %v1010_v19  ;;  %4394 = vmatprep.subr.bf16.mxu1 %v4393_v25 }
 0x473   :  { %4396 = vmatpush3.bf16.msra.mxu1 %v4393_v25  ;;  %1288 = vmatprep.mubr.f32.mxu1 %v1049_v62  ;;  %v991_v31 = vsel %vm986_vm8, %v4915_v27, %v4920_v4  ;;  %v992_v32 = vsel %vm986_vm8, %v4916_v26, %v4921_v1  ;;  %v1041_v1 = vld [vmem:[#allocation10 + $0x130] sm:$0xff] }
 0x474   :  { %v4929_v55 = vpop.permute.xlu0 %4928  ;;  %v4924_v3 = vpop.permute.xlu1 %4923  ;;  %1398 = vmatprep.mubr.f32.mxu0 %v1016_v28  ;;  %v4397_v5 = vpack.c.bf16 %v992_v32, %v991_v31  ;;  %v1073_v31 = vld [vmem:[#allocation10 + $0x230] sm:$0xff]  ;;  %v1040_v32 = vld [vmem:[#allocation10 + $0x128] sm:$0xff] }
 0x475   :  { %v4931_v56 = vunpack.i.h.bf16 %v4929_v55  ;;  %v4930_v58 = vunpack.i.l.bf16 %v4929_v55  ;;  %v4926_v33 = vunpack.i.h.bf16 %v4924_v3  ;;  %v4925_v34 = vunpack.i.l.bf16 %v4924_v3  ;;  %1289 = vmatmul.mubr.f32.gmra.mrb[20].mxu1 %v1048_v29  ;;  %v1079_v55 = vld [vmem:[#allocation10 + $0x260] sm:$0xff] }
 0x476   :  { %1399 = vmatmul.mubr.f32.gmra.mrb[22].mxu0 %v1015_v30  ;;  %4398 = vmatprep.subr.bf16.mxu1 %v4397_v5 }
 0x477   :  { %4400 = vmatpush3.bf16.msra.mxu1 %v4397_v5  ;;  %1293 = vmatprep.mubr.f32.mxu1 %v1054_v8  ;;  %v993_v38 = vsel %vm986_vm8, %v4925_v34, %v4930_v58  ;;  %v994_v7 = vsel %vm986_vm8, %v4926_v33, %v4931_v56  ;;  %v1046_v8 = vld [vmem:[#allocation10 + $0x158] sm:$0xff]  ;;  %v1045_v33 = vld [vmem:[#allocation10 + $0x150] sm:$0xff]  ;;  %v1007_v34 = vld [vmem:[#allocation10 + $0x20] sm:$0xff] }
 0x478   :  { %v4939_v9 = vpop.permute.xlu0 %4938  ;;  %v4934_v12 = vpop.permute.xlu1 %4933  ;;  %1403 = vmatprep.mubr.f32.mxu0 %v1021_v35  ;;  %v4401_v39 = vpack.c.bf16 %v994_v7, %v993_v38  ;;  %v1078_v58 = vld [vmem:[#allocation10 + $0x258] sm:$0xff]  ;;  %v1051_v35 = vld [vmem:[#allocation10 + $0x180] sm:$0xff]  ;;  %v1017_v38 = vld [vmem:[#allocation10 + $0x70] sm:$0xff] }
 0x479   :  { %v4941_v41 = vunpack.i.h.bf16 %v4939_v9  ;;  %v4940_v42 = vunpack.i.l.bf16 %v4939_v9  ;;  %v4936_v43 = vunpack.i.h.bf16 %v4934_v12  ;;  %v4935_v44 = vunpack.i.l.bf16 %v4934_v12  ;;  %1294 = vmatmul.mubr.f32.gmra.mrb[22].mxu1 %v1053_v36  ;;  %v1012_v36 = vld [vmem:[#allocation10 + $0x48] sm:$0xff]  ;;  %v1022_v9 = vld [vmem:[#allocation10 + $0x98] sm:$0xff]  ;;  %v1055_v12 = vld [vmem:[#allocation10 + $0x1a0] sm:$0xff] }
 0x47a   :  { %1404 = vmatmul.mubr.f32.gmra.mrb[24].mxu0 %v1020_v37  ;;  %4402 = vmatprep.subr.bf16.mxu1 %v4401_v39  ;;  %v1050_v37 = vld [vmem:[#allocation10 + $0x178] sm:$0xff]  ;;  %v1056_v7 = vld [vmem:[#allocation10 + $0x1a8] sm:$0xff] }
 0x47b   :  { %4404 = vmatpush3.bf16.msra.mxu1 %v4401_v39  ;;  %1298 = vmatprep.mubr.f32.mxu1 %v1059_v40  ;;  %v995_v13 = vsel %vm986_vm8, %v4935_v44, %v4940_v42  ;;  %v996_v16 = vsel %vm986_vm8, %v4936_v43, %v4941_v41  ;;  %v1027_v39 = vld [vmem:[#allocation10 + $0xc0] sm:$0xff]  ;;  %v1061_v40 = vld [vmem:[#allocation10 + $0x1d0] sm:$0xff]  ;;  %v1032_v41 = vld [vmem:[#allocation10 + $0xe8] sm:$0xff] }
 0x47c   :  { %v4949_v47 = vpop.permute.xlu0 %4948  ;;  %v4944_v48 = vpop.permute.xlu1 %4943  ;;  %1408 = vmatprep.mubr.f32.mxu0 %v1026_v45  ;;  %v4405_v49 = vpack.c.bf16 %v996_v16, %v995_v13  ;;  %v1060_v42 = vld [vmem:[#allocation10 + $0x1c8] sm:$0xff]  ;;  %v1037_v43 = vld [vmem:[#allocation10 + $0x110] sm:$0xff]  ;;  %v1066_v44 = vld [vmem:[#allocation10 + $0x1f8] sm:$0xff] }
 0x47d   :  { %v4951_v51 = vunpack.i.h.bf16 %v4949_v47  ;;  %v4950_v52 = vunpack.i.l.bf16 %v4949_v47  ;;  %v4946_v53 = vunpack.i.h.bf16 %v4944_v48  ;;  %v4945_v54 = vunpack.i.l.bf16 %v4944_v48  ;;  %1299 = vmatmul.mubr.f32.gmra.mrb[24].mxu1 %v1058_v46  ;;  %v1042_v45 = vld [vmem:[#allocation10 + $0x138] sm:$0xff]  ;;  %v1065_v46 = vld [vmem:[#allocation10 + $0x1f0] sm:$0xff]  ;;  %v1071_v13 = vld [vmem:[#allocation10 + $0x220] sm:$0xff] }
 0x47e   :  { %1409 = vmatmul.mubr.f32.gmra.mrb[26].mxu0 %v1025_v11  ;;  %4406 = vmatprep.subr.bf16.mxu1 %v4405_v49  ;;  %v1047_v11 = vld [vmem:[#allocation10 + $0x160] sm:$0xff]  ;;  %v1052_v16 = vld [vmem:[#allocation10 + $0x188] sm:$0xff]  ;;  %v1070_v47 = vld [vmem:[#allocation10 + $0x218] sm:$0xff] }
 0x47f   :  { %4408 = vmatpush3.bf16.msra.mxu1 %v4405_v49  ;;  %1303 = vmatprep.mubr.f32.mxu1 %v1064_v50  ;;  %v997_v57 = vsel %vm986_vm8, %v4945_v54, %v4950_v52  ;;  %v998_v61 = vsel %vm986_vm8, %v4946_v53, %v4951_v51  ;;  %v1057_v48 = vld [vmem:[#allocation10 + $0x1b0] sm:$0xff]  ;;  %v1076_v49 = vld [vmem:[#allocation10 + $0x248] sm:$0xff]  ;;  %v1062_v50 = vld [vmem:[#allocation10 + $0x1d8] sm:$0xff] }
 0x480   :  { %v4959_v59 = vpop.permute.xlu0 %4958  ;;  %1413 = vmatprep.mubr.f32.mxu0 %v1031_v15  ;;  %v4409_v60 = vpack.c.bf16 %v998_v61, %v997_v57  ;;  %v1075_v51 = vld [vmem:[#allocation10 + $0x240] sm:$0xff]  ;;  %v1081_v53 = vld [vmem:[#allocation10 + $0x270] sm:$0xff]  ;;  %v1072_v54 = vld [vmem:[#allocation10 + $0x228] sm:$0xff] }
 0x481   :  { %v4961_v2 = vunpack.i.h.bf16 %v4959_v59  ;;  %v4960_v6 = vunpack.i.l.bf16 %v4959_v59  ;;  %v4954_v10 = vpop.permute.xlu1 %4953  ;;  %1304 = vmatmul.mubr.f32.gmra.mrb[26].mxu1 %v1063_v17  ;;  %v1067_v52 = vld [vmem:[#allocation10 + $0x200] sm:$0xff]  ;;  %v1080_v15 = vld [vmem:[#allocation10 + $0x268] sm:$0xff]  ;;  %v1077_v17 = vld [vmem:[#allocation10 + $0x250] sm:$0xff] }
 0x482   :  { %v4956_v18 = vunpack.i.h.bf16 %v4954_v10  ;;  %v4955_v19 = vunpack.i.l.bf16 %v4954_v10  ;;  %1414 = vmatmul.mubr.f32.gmra.mrb[28].mxu0 %v1030_v20  ;;  %4410 = vmatprep.subr.bf16.mxu1 %v4409_v60  ;;  %v1082_v20 = vld [vmem:[#allocation10 + $0x278] sm:$0xff]  ;;  %v1662_v57 = vld [vmem:[#allocation11] sm:$0xff]  ;;  %v1663_v61 = vld [vmem:[#allocation11 + $0x8] sm:$0xff] }
 0x483   :  { %4412 = vmatpush3.bf16.msra.mxu1 %v4409_v60  ;;  %1308 = vmatprep.mubr.f32.mxu1 %v1069_v63  ;;  %v4421_v59 = vpack.c.bf16 %v1663_v61, %v1662_v57 }
 0x484   :  { %v4969_v24 = vpop.permute.xlu0 %4968  ;;  %1418 = vmatprep.mubr.f32.mxu0 %v1036_v14  ;;  %v999_v25 = vsel %vm986_vm8, %v4955_v19, %v4960_v6  ;;  %v1000_v62 = vsel %vm986_vm8, %v4956_v18, %v4961_v2 }
 0x485   :  { %v4971_v4 = vunpack.i.h.bf16 %v4969_v24  ;;  %v4970_v26 = vunpack.i.l.bf16 %v4969_v24  ;;  %v4964_v27 = vpop.permute.xlu1 %4963  ;;  %1309 = vmatmul.mubr.f32.gmra.mrb[28].mxu1 %v1068_v21  ;;  %v4413_v28 = vpack.c.bf16 %v1000_v62, %v999_v25  ;;  %4422 = vmatprep.subr.bf16.mxu0 %v4421_v59 }
 0x486   :  { %v4966_v29 = vunpack.i.h.bf16 %v4964_v27  ;;  %v4965_v30 = vunpack.i.l.bf16 %v4964_v27  ;;  %1419 = vmatmul.mubr.f32.gmra.mrb[30].mxu0 %v1035_v23  ;;  %1313 = vmatprep.mubr.f32.mxu1 %v1074_v22 }
 0x487   :  { %4414 = vmatprep.subr.bf16.mxu1 %v4413_v28  ;;  %1423 = vmatprep.mubr.f32.mxu0 %v1041_v1 }
 0x488   :  { %4416 = vmatpush3.bf16.msra.mxu1 %v4413_v28  ;;  %v1001_v3 = vsel %vm986_vm8, %v4965_v30, %v4970_v26  ;;  %v1002_v5 = vsel %vm986_vm8, %v4966_v29, %v4971_v4  ;;  %4424 = vmatpush3.bf16.msra.mxu0 %v4421_v59 }
 0x489   :  { %1314 = vmatmul.mubr.f32.gmra.mrb[30].mxu1 %v1073_v31  ;;  %v4417_v56 = vpack.c.bf16 %v1002_v5, %v1001_v3 }
 0x48a   :  { %1424 = vmatmul.mubr.f32.gmra.mrb[32].mxu0 %v1040_v32  ;;  %1318 = vmatprep.mubr.f32.mxu1 %v1079_v55 }
 0x48b   :  { %4418 = vmatprep.subr.bf16.mxu1 %v4417_v56  ;;  %1428 = vmatprep.mubr.f32.mxu0 %v1046_v8 }
 0x48c   :  { %4420 = vmatpush3.bf16.msra.mxu1 %v4417_v56 }
 0x48d   :  { %1319 = vmatmul.mubr.f32.gmra.mrb[32].mxu1 %v1078_v58 }
 0x48e   :  { %1429 = vmatmul.mubr.f32.gmra.mrb[34].mxu0 %v1045_v33  ;;  %4163 = vmatprep.mubr.f32.mxu1 %v1007_v34 }
 0x48f   :  { %1433 = vmatprep.mubr.f32.mxu0 %v1051_v35 }
 0x491   :  { %4164 = vmatmul.mubr.f32.vlgmr.msra.gmra.mrb[34].mxu1 %v1012_v36 }
 0x492   :  { %1434 = vmatmul.mubr.f32.gmra.mrb[36].mxu0 %v1050_v37  ;;  %4166 = vmatprep.mubr.f32.mxu1 %v1017_v38 }
 0x493   :  { %1438 = vmatprep.mubr.f32.mxu0 %v1056_v7 }
 0x495   :  { %4167 = vmatmul.mubr.f32.gmra.mrb[36].mxu1 %v1022_v9 }
 0x496   :  { %1439 = vmatmul.mubr.f32.gmra.mrb[38].mxu0 %v1055_v12  ;;  %4169 = vmatprep.mubr.f32.mxu1 %v1027_v39 }
 0x497   :  { %1443 = vmatprep.mubr.f32.mxu0 %v1061_v40 }
 0x499   :  { %4170 = vmatmul.mubr.f32.gmra.mrb[38].mxu1 %v1032_v41 }
 0x49a   :  { %1444 = vmatmul.mubr.f32.gmra.mrb[40].mxu0 %v1060_v42  ;;  %4172 = vmatprep.mubr.f32.mxu1 %v1037_v43 }
 0x49b   :  { %1448 = vmatprep.mubr.f32.mxu0 %v1066_v44  ;;  %v1102_v31 = vpop.permute.xlu1 %1101 }
 0x49d   :  { %4173 = vmatmul.mubr.f32.gmra.mrb[40].mxu1 %v1042_v45 }
 0x49e   :  { %1449 = vmatmul.mubr.f32.gmra.mrb[42].mxu0 %v1065_v46  ;;  %4175 = vmatprep.mubr.f32.mxu1 %v1047_v11 }
 0x49f   :  { %1453 = vmatprep.mubr.f32.mxu0 %v1071_v13  ;;  %v1107_v33 = vpop.permute.xlu0 %1106  ;;  %v1112_v7 = vpop.permute.xlu1 %1111 }
 0x4a1   :  { %4176 = vmatmul.mubr.f32.gmra.mrb[42].mxu1 %v1052_v16 }
 0x4a2   :  { %1454 = vmatmul.mubr.f32.gmra.mrb[44].mxu0 %v1070_v47  ;;  %4178 = vmatprep.mubr.f32.mxu1 %v1057_v48 }
 0x4a3   :  { %1458 = vmatprep.mubr.f32.mxu0 %v1076_v49  ;;  %v1117_v13 = vpop.permute.xlu1 %1116 }
 0x4a5   :  { %4179 = vmatmul.mubr.f32.gmra.mrb[44].mxu1 %v1062_v50 }
 0x4a6   :  { %1459 = vmatmul.mubr.f32.gmra.mrb[46].mxu0 %v1075_v51  ;;  %4181 = vmatprep.mubr.f32.mxu1 %v1067_v52 }
 0x4a7   :  { %1463 = vmatprep.mubr.f32.mxu0 %v1081_v53 }
 0x4a9   :  { %4182 = vmatmul.mubr.f32.gmra.mrb[46].mxu1 %v1072_v54  ;;  %v1122_v54 = vpop.permute.xlu0 %1121 }
 0x4aa   :  { %1464 = vmatmul.mubr.f32.gmra.mrb[48].mxu0 %v1080_v15  ;;  %4184 = vmatprep.mubr.f32.mxu1 %v1077_v17 }
 0x4ad   :  { %4185 = vmatmul.mubr.f32.gmra.mrb[48].mxu1 %v1082_v20 }
 0x524   :  { %v3685_v60 = vpop.f32.mrb[2].mxu1 }
 0x525   :  { %v3686_v63 = vpop.f32.mrb[3].mxu1 }
 0x526   :  { %v3687_v2 = vadd.f32 %v3686_v63, %v3685_v60 }
 0x528   :  { %v3688_v6 = vpop.f32.mrb[4].mxu1  ;;  %v1246_v56 = vadd.f32 %v3687_v2, %v1102_v31  ;;  %v1127_v2 = vpop.permute.xlu1 %1126 }
 0x529   :  { %v3689_v10 = vpop.f32.mrb[5].mxu1 }
 0x52a   :  { %v3690_v14 = vadd.f32 %v3689_v10, %v3688_v6 }
 0x52c   :  { %v3691_v18 = vpop.f32.mrb[6].mxu1  ;;  %v1251_v12 = vadd.f32 %v3690_v14, %v1107_v33 }
 0x52d   :  { %v3692_v19 = vpop.f32.mrb[7].mxu1 }
 0x52e   :  { %v3693_v21 = vadd.f32 %v3692_v19, %v3691_v18 }
 0x530   :  { %v3694_v23 = vpop.f32.mrb[8].mxu1  ;;  %v1256_v46 = vadd.f32 %v3693_v21, %v1112_v7 }
 0x531   :  { %v3695_v22 = vpop.f32.mrb[9].mxu1 }
 0x532   :  { %v3696_v24 = vadd.f32 %v3695_v22, %v3694_v23 }
 0x534   :  { %v3697_v25 = vpop.f32.mrb[10].mxu1  ;;  %v1261_v52 = vadd.f32 %v3696_v24, %v1117_v13  ;;  %v1132_v24 = vpop.permute.xlu0 %1131 }
 0x535   :  { %v3698_v62 = vpop.f32.mrb[11].mxu1 }
 0x536   :  { %v3699_v1 = vadd.f32 %v3698_v62, %v3697_v25 }
 0x538   :  { %v3700_v4 = vpop.f32.mrb[12].mxu1  ;;  %v1266_v60 = vadd.f32 %v3699_v1, %v1122_v54 }
 0x539   :  { %v3701_v26 = vpop.f32.mrb[13].mxu1 }
 0x53a   :  { %v3702_v27 = vadd.f32 %v3701_v26, %v3700_v4 }
 0x53c   :  { %v3703_v28 = vpop.f32.mrb[14].mxu1  ;;  %v1271_v23 = vadd.f32 %v3702_v27, %v1127_v2 }
 0x53d   :  { %v3704_v29 = vpop.f32.mrb[15].mxu1 }
 0x53e   :  { %v3705_v30 = vadd.f32 %v3704_v29, %v3703_v28 }
 0x540   :  { %v3706_v32 = vpop.f32.mrb[16].mxu1  ;;  %v1276_v1 = vadd.f32 %v3705_v30, %v1132_v24 }
 0x541   :  { %v3765_v55 = vpop.f32.mrb[18].mxu0  ;;  %v3707_v3 = vpop.f32.mrb[17].mxu1 }
 0x542   :  { %v3766_v5 = vpop.f32.mrb[19].mxu0  ;;  %v6360_v8 = vadd.f32 %v3707_v3, %v3706_v32  ;;  %v1137_v32 = vpop.permute.xlu1 %1136 }
 0x543   :  { %v3767_v58 = vadd.f32 %v3766_v5, %v3765_v55 }
 0x544   :  { %v3709_v34 = vpop.f32.mrb[18].mxu1  ;;  %v1281_v27 = vadd.f32 %v6360_v8, %v1137_v32 }
 0x545   :  { %v3768_v35 = vpop.f32.mrb[20].mxu0  ;;  %v3710_v36 = vpop.f32.mrb[19].mxu1  ;;  %v6362_v37 = vadd.f32 %v3767_v58, %v1246_v56 }
 0x546   :  { %v3769_v38 = vpop.f32.mrb[21].mxu0  ;;  %v6364_v9 = vadd.f32 %v3710_v36, %v3709_v34  ;;  %v1142_v36 = vpop.permute.xlu0 %1141 }
 0x547   :  { %v3770_v39 = vadd.f32 %v3769_v38, %v3768_v35 }
 0x548   :  { %v3712_v40 = vpop.f32.mrb[20].mxu1 }
 0x549   :  { %v3771_v41 = vpop.f32.mrb[22].mxu0  ;;  %v3713_v42 = vpop.f32.mrb[21].mxu1  ;;  %v1396_v43 = vadd.f32 %v3770_v39, %v1251_v12 }
 0x54a   :  { %v3772_v44 = vpop.f32.mrb[23].mxu0  ;;  %v6366_v45 = vadd.f32 %v3713_v42, %v3712_v40  ;;  %v1286_v40 = vadd.f32 %v6364_v9, %v1142_v36  ;;  %v1152_v9 = vpop.permute.xlu0 %1151 }
 0x54b   :  { %v3773_v11 = vadd.f32 %v3772_v44, %v3771_v41  ;;  %v1147_v44 = vpop.permute.xlu1 %1146 }
 0x54c   :  { %v3715_v16 = vpop.f32.mrb[22].mxu1 }
 0x54d   :  { %v3774_v47 = vpop.f32.mrb[24].mxu0  ;;  %v3716_v48 = vpop.f32.mrb[23].mxu1  ;;  %v6368_v49 = vadd.f32 %v3773_v11, %v1256_v46 }
 0x54e   :  { %v3775_v50 = vpop.f32.mrb[25].mxu0  ;;  %v6370_v51 = vadd.f32 %v3716_v48, %v3715_v16 }
 0x54f   :  { %v3776_v53 = vadd.f32 %v3775_v50, %v3774_v47  ;;  %v1291_v50 = vadd.f32 %v6366_v45, %v1147_v44 }
 0x550   :  { %v3718_v15 = vpop.f32.mrb[24].mxu1 }
 0x551   :  { %v3777_v17 = vpop.f32.mrb[26].mxu0  ;;  %v3719_v20 = vpop.f32.mrb[25].mxu1  ;;  %v1406_v57 = vadd.f32 %v3776_v53, %v1261_v52 }
 0x552   :  { %v3778_v61 = vpop.f32.mrb[27].mxu0  ;;  %v6372_v59 = vadd.f32 %v3719_v20, %v3718_v15 }
 0x553   :  { %v3779_v63 = vadd.f32 %v3778_v61, %v3777_v17 }
 0x554   :  { %v3721_v6 = vpop.f32.mrb[26].mxu1 }
 0x555   :  { %v3780_v10 = vpop.f32.mrb[28].mxu0  ;;  %v3722_v14 = vpop.f32.mrb[27].mxu1  ;;  %v6374_v18 = vadd.f32 %v3779_v63, %v1266_v60 }
 0x556   :  { %v3781_v19 = vpop.f32.mrb[29].mxu0  ;;  %v6376_v21 = vadd.f32 %v3722_v14, %v3721_v6  ;;  %v1296_v6 = vadd.f32 %v6370_v51, %v1152_v9 }
 0x557   :  { %v3782_v22 = vadd.f32 %v3781_v19, %v3780_v10 }
 0x558   :  { %v3724_v25 = vpop.f32.mrb[28].mxu1 }
 0x559   :  { %v3783_v62 = vpop.f32.mrb[30].mxu0  ;;  %v3725_v4 = vpop.f32.mrb[29].mxu1  ;;  %v1416_v26 = vadd.f32 %v3782_v22, %v1271_v23 }
 0x55a   :  { %v3784_v28 = vpop.f32.mrb[31].mxu0  ;;  %v6378_v29 = vadd.f32 %v3725_v4, %v3724_v25 }
 0x55b   :  { %v3785_v31 = vadd.f32 %v3784_v28, %v3783_v62 }
 0x55c   :  { %v3727_v55 = vpop.f32.mrb[30].mxu1 }
 0x55d   :  { %v3786_v3 = vpop.f32.mrb[32].mxu0  ;;  %v3728_v5 = vpop.f32.mrb[31].mxu1  ;;  %v6380_v56 = vadd.f32 %v3785_v31, %v1276_v1 }
 0x55e   :  { %v3787_v58 = vpop.f32.mrb[33].mxu0  ;;  %v6382_v33 = vadd.f32 %v3728_v5, %v3727_v55 }
 0x55f   :  { %v3788_v34 = vadd.f32 %v3787_v58, %v3786_v3 }
 0x560   :  { %v3730_v35 = vpop.f32.mrb[32].mxu1 }
 0x561   :  { %v3789_v38 = vpop.f32.mrb[34].mxu0  ;;  %v3731_v7 = vpop.f32.mrb[33].mxu1  ;;  %v1426_v12 = vadd.f32 %v3788_v34, %v1281_v27 }
 0x562   :  { %v6385_v39 = vadd.f32 %v3731_v7, %v3730_v35  ;;  %v3790_v30 = vpop.f32.mrb[35].mxu0 }
 0x563   :  { %v3791_v41 = vadd.f32 %v3790_v30, %v3789_v38 }
 0x564   :  { %v4165_v42 = vpop.f32.mrb[34].mxu1 }
 0x565   :  { %v1541_v46 = vadd.f32 %v4165_v42, %v1396_v43  ;;  %v1535_v11 = vpop.f32.mrb[35].mxu1  ;;  %v3792_v13 = vpop.f32.mrb[36].mxu0  ;;  %v6388_v16 = vadd.f32 %v3791_v41, %v1286_v40 }
 0x566   :  { %v1536_v8 = vadd.f32 %v1535_v11, %v6362_v37  ;;  %v3793_v47 = vpop.f32.mrb[37].mxu0 }
 0x567   :  { %v1631_v48 = vmul.f32 0.2, %v1541_v46  ;;  %v3794_v52 = vadd.f32 %v3793_v47, %v3792_v13  ;;  %vm1615_vm9 = vcmp.gt.f32.partialorder %v1541_v46, 0.0 }
 0x568   :  { %vm1614_vm10 = vcmp.gt.f32.partialorder %v1536_v8, 0.0  ;;  %v1630_v53 = vmul.f32 0.2, %v1536_v8  ;;  %v4168_v54 = vpop.f32.mrb[36].mxu1 }
 0x569   :  { %v1551_v15 = vadd.f32 %v4168_v54, %v1406_v57  ;;  %v1545_v17 = vpop.f32.mrb[37].mxu1  ;;  %v3795_v43 = vpop.f32.mrb[38].mxu0  ;;  %v1436_v20 = vadd.f32 %v3794_v52, %v1291_v50  ;;  %v1647_v37 = vsel %vm1615_vm9, %v1541_v46, %v1631_v48 }
 0x56a   :  { %v1546_v61 = vadd.f32 %v1545_v17, %v6368_v49  ;;  %v3796_v60 = vpop.f32.mrb[39].mxu0  ;;  %v1646_v63 = vsel %vm1614_vm10, %v1536_v8, %v1630_v53  ;;  %v1157_v57 = vpop.permute.xlu1 %1156 }
 0x56b   :  { %v1633_v2 = vmul.f32 0.2, %v1551_v15  ;;  %v3797_v45 = vadd.f32 %v3796_v60, %v3795_v43  ;;  %4191 = vmatprep.mubr.msk.f32.mxu0 %vm1664_vm11, %v1646_v63  ;;  %vm1617_vm12 = vcmp.gt.f32.partialorder %v1551_v15, 0.0  ;;  %v1301_v51 = vadd.f32 %v6372_v59, %v1157_v57 }
 0x56c   :  { %vm1616_vm13 = vcmp.gt.f32.partialorder %v1546_v61, 0.0  ;;  %v1632_v10 = vmul.f32 0.2, %v1546_v61  ;;  %v4171_v14 = vpop.f32.mrb[38].mxu1  ;;  %4192 = vmatmul.mubr.msk.f32.vlgmr.msra.gmra.mrb[50].mxu0 %vm1664_vm11, %v1647_v37 }
 0x56d   :  { %v1561_v19 = vadd.f32 %v4171_v14, %v1416_v26  ;;  %v1555_v23 = vpop.f32.mrb[39].mxu1  ;;  %v3798_v22 = vpop.f32.mrb[40].mxu0  ;;  %v1441_v49 = vadd.f32 %v3797_v45, %v1296_v6  ;;  %v1649_v1 = vsel %vm1617_vm12, %v1551_v15, %v1633_v2 }
 0x56e   :  { %v1556_v24 = vadd.f32 %v1555_v23, %v6374_v18  ;;  %v3799_v25 = vpop.f32.mrb[41].mxu0  ;;  %v1648_v62 = vsel %vm1616_vm13, %v1546_v61, %v1632_v10  ;;  %v1162_v26 = vpop.permute.xlu0 %1161 }
 0x56f   :  { %v1635_v4 = vmul.f32 0.2, %v1561_v19  ;;  %v3800_v28 = vadd.f32 %v3799_v25, %v3798_v22  ;;  %4194 = vmatprep.mubr.msk.f32.mxu0 %vm1664_vm11, %v1648_v62  ;;  %vm1619_vm14 = vcmp.gt.f32.partialorder %v1561_v19, 0.0  ;;  %v1306_v35 = vadd.f32 %v6376_v21, %v1162_v26 }
 0x570   :  { %vm1618_vm15 = vcmp.gt.f32.partialorder %v1556_v24, 0.0  ;;  %v1634_v31 = vmul.f32 0.2, %v1556_v24  ;;  %v4174_v32 = vpop.f32.mrb[40].mxu1  ;;  %4195 = vmatmul.mubr.msk.f32.gmra.mrb[52].mxu0 %vm1664_vm11, %v1649_v1 }
 0x571   :  { %v1571_v55 = vadd.f32 %v4174_v32, %v1426_v12  ;;  %v1565_v3 = vpop.f32.mrb[41].mxu1  ;;  %v3801_v18 = vpop.f32.mrb[42].mxu0  ;;  %v1446_v5 = vadd.f32 %v3800_v28, %v1301_v51  ;;  %v1651_v38 = vsel %vm1619_vm14, %v1561_v19, %v1635_v4  ;;  %vm1970_vm14 = vcmask 244736  }
 0x572   :  { %v1566_v58 = vadd.f32 %v1565_v3, %v6380_v56  ;;  %v3802_v27 = vpop.f32.mrb[43].mxu0  ;;  %v1650_v59 = vsel %vm1618_vm15, %v1556_v24, %v1634_v31  ;;  %v1167_v12 = vpop.permute.xlu1 %1166  ;;  %vm2755_vm15 = vcmask 261120  }
 0x573   :  { %v1637_v34 = vmul.f32 0.2, %v1571_v55  ;;  %v3803_v36 = vadd.f32 %v3802_v27, %v3801_v18  ;;  %4197 = vmatprep.mubr.msk.f32.mxu0 %vm1664_vm11, %v1650_v59  ;;  %vm1621_vm0 = vcmp.gt.f32.partialorder %v1571_v55, 0.0  ;;  %v1311_v13 = vadd.f32 %v6378_v29, %v1167_v12  ;;  %v1172_v52 = vpop.permute.xlu0 %1171 }
 0x574   :  { %vm1620_vm2 = vcmp.gt.f32.partialorder %v1566_v58, 0.0  ;;  %v1636_v7 = vmul.f32 0.2, %v1566_v58  ;;  %v4177_v30 = vpop.f32.mrb[42].mxu1  ;;  %4198 = vmatmul.mubr.msk.f32.gmra.mrb[54].mxu0 %vm1664_vm11, %v1651_v38 }
 0x575   :  { %v1581_v40 = vadd.f32 %v4177_v30, %v1436_v20  ;;  %v1575_v41 = vpop.f32.mrb[43].mxu1  ;;  %v3804_v56 = vpop.f32.mrb[44].mxu0  ;;  %v1451_v42 = vadd.f32 %v3803_v36, %v1306_v35  ;;  %v1653_v47 = vsel %vm1621_vm0, %v1571_v55, %v1637_v34  ;;  %v1316_v20 = vadd.f32 %v6382_v33, %v1172_v52 }
 0x576   :  { %v1576_v44 = vadd.f32 %v1575_v41, %v6388_v16  ;;  %v3805_v46 = vpop.f32.mrb[45].mxu0  ;;  %v1652_v21 = vsel %vm1620_vm2, %v1566_v58, %v1636_v7  ;;  %v1177_v57 = vpop.permute.xlu1 %1176 }
 0x577   :  { %v1639_v11 = vmul.f32 0.2, %v1581_v40  ;;  %v3806_v8 = vadd.f32 %v3805_v46, %v3804_v56  ;;  %4200 = vmatprep.mubr.msk.f32.mxu0 %vm1664_vm11, %v1652_v21  ;;  %vm1623_vm3 = vcmp.gt.f32.partialorder %v1581_v40, 0.0  ;;  %v1321_v22 = vadd.f32 %v6385_v39, %v1177_v57 }
 0x578   :  { %vm1622_vm4 = vcmp.gt.f32.partialorder %v1576_v44, 0.0  ;;  %v1638_v48 = vmul.f32 0.2, %v1576_v44  ;;  %v4180_v50 = vpop.f32.mrb[44].mxu1  ;;  %4201 = vmatmul.mubr.msk.f32.gmra.mrb[56].mxu0 %vm1664_vm11, %v1653_v47 }
 0x579   :  { %v1591_v53 = vadd.f32 %v4180_v50, %v1446_v5  ;;  %v1585_v54 = vpop.f32.mrb[45].mxu1  ;;  %v3807_v16 = vpop.f32.mrb[46].mxu0  ;;  %v1456_v9 = vadd.f32 %v3806_v8, %v1311_v13  ;;  %v1655_v60 = vsel %vm1623_vm3, %v1581_v40, %v1639_v11 }
 0x57a   :  { %v1586_v15 = vadd.f32 %v1585_v54, %v1441_v49  ;;  %v3808_v17 = vpop.f32.mrb[47].mxu0  ;;  %v1654_v43 = vsel %vm1622_vm4, %v1576_v44, %v1638_v48 }
 0x57b   :  { %v1641_v29 = vmul.f32 0.2, %v1591_v53  ;;  %v3809_v61 = vadd.f32 %v3808_v17, %v3807_v16  ;;  %4203 = vmatprep.mubr.msk.f32.mxu0 %vm1664_vm11, %v1654_v43  ;;  %vm1625_vm5 = vcmp.gt.f32.partialorder %v1591_v53, 0.0  ;;  %v2325_v43 = vld [vmem:[#allocation13 + $0x8] sm:$0xff] }
 0x57c   :  { %vm1624_vm6 = vcmp.gt.f32.partialorder %v1586_v15, 0.0  ;;  %v1640_v63 = vmul.f32 0.2, %v1586_v15  ;;  %v4183_v37 = vpop.f32.mrb[46].mxu1  ;;  %4204 = vmatmul.mubr.msk.f32.gmra.mrb[58].mxu0 %vm1664_vm11, %v1655_v60  ;;  %2476 = vmatprep.mubr.f32.mxu1 %v2325_v43 }
 0x57d   :  { %v1601_v2 = vadd.f32 %v4183_v37, %v1456_v9  ;;  %v3810_v6 = vpop.f32.mrb[48].mxu0  ;;  %v1595_v45 = vpop.f32.mrb[47].mxu1  ;;  %v1461_v10 = vadd.f32 %v3809_v61, %v1316_v20  ;;  %v1657_v24 = vsel %vm1625_vm5, %v1591_v53, %v1641_v29  ;;  %v2327_v29 = vld [vmem:[#allocation13 + $0x18] sm:$0xff] }
 0x57e   :  { %v1596_v14 = vadd.f32 %v1595_v45, %v1451_v42  ;;  %v3811_v19 = vpop.f32.mrb[49].mxu0  ;;  %v1656_v23 = vsel %vm1624_vm6, %v1586_v15, %v1640_v63 }
 0x57f   :  { %v1643_v33 = vmul.f32 0.2, %v1601_v2  ;;  %v3812_v49 = vadd.f32 %v3811_v19, %v3810_v6  ;;  %4206 = vmatprep.mubr.msk.f32.mxu0 %vm1664_vm11, %v1656_v23  ;;  %vm1627_vm9 = vcmp.gt.f32.partialorder %v1601_v2, 0.0 }
 0x580   :  { %vm1626_vm10 = vcmp.gt.f32.partialorder %v1596_v14, 0.0  ;;  %v1642_v25 = vmul.f32 0.2, %v1596_v14  ;;  %v4186_v62 = vpop.f32.mrb[48].mxu1  ;;  %4207 = vmatmul.mubr.msk.f32.gmra.mrb[60].mxu0 %vm1664_vm11, %v1657_v24 }
 0x581   :  { %v1466_v4 = vadd.f32 %v3812_v49, %v1321_v22  ;;  %v1605_v51 = vpop.f32.mrb[49].mxu1  ;;  %v1659_v32 = vsel %vm1627_vm9, %v1601_v2, %v1643_v33 }
 0x582   :  { %v1606_v28 = vadd.f32 %v1605_v51, %v1461_v10  ;;  %v1658_v1 = vsel %vm1626_vm10, %v1596_v14, %v1642_v25 }
 0x583   :  { %v1611_v31 = vadd.f32 %v4186_v62, %v1466_v4  ;;  %4209 = vmatprep.mubr.msk.f32.mxu0 %vm1664_vm11, %v1658_v1 }
 0x584   :  { %vm1628_vm12 = vcmp.gt.f32.partialorder %v1606_v28, 0.0  ;;  %v1644_v39 = vmul.f32 0.2, %v1606_v28  ;;  %4210 = vmatmul.mubr.msk.f32.gmra.mrb[62].mxu0 %vm1664_vm11, %v1659_v32 }
 0x585   :  { %vm1629_vm13 = vcmp.gt.f32.partialorder %v1611_v31, 0.0  ;;  %v1645_v26 = vmul.f32 0.2, %v1611_v31 }
 0x586   :  { %v1660_v55 = vsel %vm1628_vm12, %v1606_v28, %v1644_v39  ;;  %vm2941_vm12 = vcmask 506880  }
 0x587   :  { %4212 = vmatprep.mubr.msk.f32.mxu0 %vm1664_vm11, %v1660_v55  ;;  %v1661_v3 = vsel %vm1629_vm13, %v1611_v31, %v1645_v26  ;;  %v2365_v26 = vld [vmem:[%s7002_s10 + $0x8] sm:$0xff]  ;;  %vm2998_vm13 = vcmask 515072  }
 0x588   :  { %4213 = vmatmul.mubr.msk.f32.gmra.mrb[64].mxu0 %vm1664_vm11, %v1661_v3  ;;  %vm2083_vm11 = vcmask 252928  }
 0x589   :  { %2581 = vmatprep.mubr.f32.mxu0 %v2327_v29 }
 0x63f   :  { %v6423_v18 = vpop.f32.mrb[50].mxu0 }
 0x640   :  { %v6425_v5 = vpop.f32.mrb[51].mxu0 }
 0x641   :  { %v4979_v58 = vpack.i.bf16 %v6423_v18, %v6425_v5  ;;  %v4459_v59 = vpack.c.bf16 %v6423_v18, %v6425_v5  ;;  %v2369_v5 = vld [vmem:[%s7002_s10 + $0x28] sm:$0xff] }
 0x643   :  { %4980 = vrot.lane.b32.xlu1 %v4979_v58, %s5759_s7  ;;  %4975 = vrot.lane.b32.xlu0 %v4979_v58, %s5751_s0  ;;  %v6431_v27 = vpop.f32.mrb[52].mxu0 }
 0x644   :  { %v6435_v34 = vpop.f32.mrb[53].mxu0 }
 0x645   :  { %v5019_v35 = vpack.i.bf16 %v6431_v27, %v6435_v34  ;;  %v4463_v38 = vpack.c.bf16 %v6431_v27, %v6435_v34 }
 0x647   :  { %4990 = vrot.lane.b32.xlu1 %v4979_v58, %s5760_s18  ;;  %4985 = vrot.lane.b32.xlu0 %v4979_v58, %s5753_s21  ;;  %v6441_v36 = vpop.f32.mrb[54].mxu0 }
 0x648   :  { %v6445_v7 = vpop.f32.mrb[55].mxu0 }
 0x649   :  { %v6449_v30 = vpack.i.bf16 %v6441_v36, %v6445_v7  ;;  %v4467_v40 = vpack.c.bf16 %v6441_v36, %v6445_v7 }
 0x64b   :  { %5000 = vrot.lane.b32.xlu1 %v4979_v58, %s5754_s23  ;;  %4995 = vrot.lane.b32.xlu0 %v4979_v58, %s5761_s4  ;;  %v6453_v12 = vpop.f32.mrb[56].mxu0 }
 0x64c   :  { %v6457_v41 = vpop.f32.mrb[57].mxu0 }
 0x64d   :  { %v6461_v56 = vpack.i.bf16 %v6453_v12, %v6457_v41  ;;  %v4471_v44 = vpack.c.bf16 %v6453_v12, %v6457_v41 }
 0x64f   :  { %5010 = vrot.lane.b32.xlu1 %v4979_v58, %s5756_s2  ;;  %5005 = vrot.lane.b32.xlu0 %v4979_v58, %s5762_s24  ;;  %v6465_v42 = vpop.f32.mrb[58].mxu0 }
 0x650   :  { %v6469_v46 = vpop.f32.mrb[59].mxu0 }
 0x651   :  { %v6473_v21 = vpack.i.bf16 %v6465_v42, %v6469_v46  ;;  %v4475_v13 = vpack.c.bf16 %v6465_v42, %v6469_v46 }
 0x653   :  { %5020 = vrot.lane.b32.xlu1 %v5019_v35, %s5759_s7  ;;  %5015 = vrot.lane.b32.xlu0 %v5019_v35, %s5751_s0  ;;  %v6477_v11 = vpop.f32.mrb[60].mxu0 }
 0x654   :  { %v6481_v8 = vpop.f32.mrb[61].mxu0 }
 0x655   :  { %v6485_v47 = vpack.i.bf16 %v6477_v11, %v6481_v8  ;;  %v4479_v50 = vpack.c.bf16 %v6477_v11, %v6481_v8 }
 0x657   :  { %5030 = vrot.lane.b32.xlu1 %v5019_v35, %s5760_s18  ;;  %5025 = vrot.lane.b32.xlu0 %v5019_v35, %s5753_s21  ;;  %v6489_v48 = vpop.f32.mrb[62].mxu0 }
 0x658   :  { %v6493_v52 = vpop.f32.mrb[63].mxu0 }
 0x659   :  { %v6497_v53 = vpack.i.bf16 %v6489_v48, %v6493_v52  ;;  %v4483_v16 = vpack.c.bf16 %v6489_v48, %v6493_v52 }
 0x65b   :  { %5040 = vrot.lane.b32.xlu1 %v5019_v35, %s5754_s23  ;;  %5035 = vrot.lane.b32.xlu0 %v5019_v35, %s5761_s4  ;;  %v6501_v54 = vpop.f32.mrb[64].mxu0 }
 0x65c   :  { %v6505_v9 = vpop.f32.mrb[65].mxu0 }
 0x65d   :  { %v6509_v15 = vpack.i.bf16 %v6501_v54, %v6505_v9  ;;  %v4487_v17 = vpack.c.bf16 %v6501_v54, %v6505_v9  ;;  %v2344_v54 = vld [vmem:[#allocation13 + $0xa0] sm:$0xff]  ;;  %v2331_v9 = vld [vmem:[#allocation13 + $0x38] sm:$0xff] }
 0x65f   :  { %5050 = vrot.lane.b32.xlu1 %v5019_v35, %s5756_s2  ;;  %5045 = vrot.lane.b32.xlu0 %v5019_v35, %s5762_s24  ;;  %v2364_v35 = vld [vmem:[%s7002_s10] sm:$0xff] }
 0x663   :  { %5060 = vrot.lane.b32.xlu1 %v6449_v30, %s5759_s7  ;;  %5055 = vrot.lane.b32.xlu0 %v6449_v30, %s5751_s0 }
 0x667   :  { %5070 = vrot.lane.b32.xlu1 %v6449_v30, %s5760_s18  ;;  %5065 = vrot.lane.b32.xlu0 %v6449_v30, %s5753_s21 }
 0x66b   :  { %5080 = vrot.lane.b32.xlu1 %v6449_v30, %s5754_s23  ;;  %5075 = vrot.lane.b32.xlu0 %v6449_v30, %s5761_s4 }
 0x66f   :  { %5090 = vrot.lane.b32.xlu1 %v6461_v56, %s5759_s7  ;;  %5085 = vrot.lane.b32.xlu0 %v6461_v56, %s5751_s0 }
 0x673   :  { %5100 = vrot.lane.b32.xlu1 %v6461_v56, %s5760_s18  ;;  %5095 = vrot.lane.b32.xlu0 %v6461_v56, %s5753_s21 }
 0x677   :  { %5110 = vrot.lane.b32.xlu1 %v6461_v56, %s5754_s23  ;;  %5105 = vrot.lane.b32.xlu0 %v6461_v56, %s5761_s4 }
 0x67b   :  { %5120 = vrot.lane.b32.xlu1 %v6473_v21, %s5759_s7  ;;  %5115 = vrot.lane.b32.xlu0 %v6473_v21, %s5751_s0 }
 0x67f   :  { %5130 = vrot.lane.b32.xlu1 %v6473_v21, %s5760_s18  ;;  %5125 = vrot.lane.b32.xlu0 %v6473_v21, %s5753_s21 }
 0x683   :  { %5140 = vrot.lane.b32.xlu1 %v6473_v21, %s5754_s23  ;;  %5135 = vrot.lane.b32.xlu0 %v6473_v21, %s5761_s4 }
 0x687   :  { %5150 = vrot.lane.b32.xlu1 %v6485_v47, %s5759_s7  ;;  %5145 = vrot.lane.b32.xlu0 %v6485_v47, %s5751_s0 }
 0x68b   :  { %5160 = vrot.lane.b32.xlu1 %v6485_v47, %s5760_s18  ;;  %5155 = vrot.lane.b32.xlu0 %v6485_v47, %s5753_s21 }
 0x68f   :  { %5170 = vrot.lane.b32.xlu1 %v6485_v47, %s5754_s23  ;;  %5165 = vrot.lane.b32.xlu0 %v6485_v47, %s5761_s4 }
 0x693   :  { %5180 = vrot.lane.b32.xlu1 %v6497_v53, %s5759_s7  ;;  %5175 = vrot.lane.b32.xlu0 %v6497_v53, %s5751_s0 }
 0x697   :  { %5190 = vrot.lane.b32.xlu1 %v6497_v53, %s5760_s18  ;;  %5185 = vrot.lane.b32.xlu0 %v6497_v53, %s5753_s21 }
 0x69b   :  { %5200 = vrot.lane.b32.xlu1 %v6509_v15, %s5759_s7  ;;  %5195 = vrot.lane.b32.xlu0 %v6509_v15, %s5751_s0 }
 0x69f   :  { %5215 = vrot.lane.b32.xlu1 %v6509_v15, %s5760_s18  ;;  %5205 = vrot.lane.b32.xlu0 %v6509_v15, %s5753_s21 }
 0x6a3   :  { %5220 = vrot.lane.b32.xlu1 %v6497_v53, %s5754_s23  ;;  %5210 = vrot.lane.b32.xlu0 %v6497_v53, %s5761_s4 }
 0x6a7   :  { %5230 = vrot.lane.b32.xlu1 %v6449_v30, %s5756_s2  ;;  %5225 = vrot.lane.b32.xlu0 %v6449_v30, %s5762_s24  ;;  %v2367_v30 = vld [vmem:[%s7002_s10 + $0x18] sm:$0xff] }
 0x6ab   :  { %5245 = vrot.lane.b32.xlu1 %v6509_v15, %s5754_s23  ;;  %5235 = vrot.lane.b32.xlu0 %v6509_v15, %s5761_s4 }
 0x6af   :  { %5250 = vrot.lane.b32.xlu1 %v6461_v56, %s5756_s2  ;;  %5240 = vrot.lane.b32.xlu0 %v6461_v56, %s5762_s24 }
 0x6b3   :  { %5260 = vrot.lane.b32.xlu1 %v6473_v21, %s5756_s2  ;;  %5255 = vrot.lane.b32.xlu0 %v6473_v21, %s5762_s24 }
 0x6b5   :  { %v4981_v20 = vpop.permute.xlu1 %4980  ;;  %v4976_v61 = vpop.permute.xlu0 %4975 }
 0x6b6   :  { %v4983_v60 = vunpack.i.h.bf16 %v4981_v20  ;;  %v4982_v63 = vunpack.i.l.bf16 %v4981_v20  ;;  %v4978_v37 = vunpack.i.h.bf16 %v4976_v61  ;;  %v4977_v2 = vunpack.i.l.bf16 %v4976_v61 }
 0x6b7   :  { %5270 = vrot.lane.b32.xlu1 %v6485_v47, %s5756_s2  ;;  %5265 = vrot.lane.b32.xlu0 %v6485_v47, %s5762_s24  ;;  %v2366_v47 = vld [vmem:[%s7002_s10 + $0x10] sm:$0xff] }
 0x6b8   :  { %v2084_v6 = vsel %vm2083_vm11, %v4977_v2, %v4982_v63  ;;  %v2085_v45 = vsel %vm2083_vm11, %v4978_v37, %v4983_v60  ;;  %v2368_v63 = vld [vmem:[%s7002_s10 + $0x20] sm:$0xff] }
 0x6b9   :  { %v4991_v10 = vpop.permute.xlu1 %4990  ;;  %v4986_v14 = vpop.permute.xlu0 %4985  ;;  %v4425_v57 = vpack.c.bf16 %v2085_v45, %v2084_v6 }
 0x6ba   :  { %v4993_v19 = vunpack.i.h.bf16 %v4991_v10  ;;  %v4992_v23 = vunpack.i.l.bf16 %v4991_v10  ;;  %v4988_v33 = vunpack.i.h.bf16 %v4986_v14  ;;  %v4987_v22 = vunpack.i.l.bf16 %v4986_v14 }
 0x6bb   :  { %4426 = vmatprep.subr.bf16.mxu1 %v4425_v57  ;;  %5280 = vrot.lane.b32.xlu1 %v6497_v53, %s5756_s2  ;;  %v2371_v57 = vld [vmem:[%s7002_s10 + $0x38] sm:$0xff] }
 0x6bc   :  { %v1972_v49 = vsel %vm1970_vm14, %v4988_v33, %v4993_v19  ;;  %v1971_v24 = vsel %vm1970_vm14, %v4987_v22, %v4992_v23  ;;  %5275 = vrot.lane.b32.xlu0 %v6497_v53, %s5762_s24  ;;  %v2370_v22 = vld [vmem:[%s7002_s10 + $0x30] sm:$0xff] }
 0x6bd   :  { %v5001_v25 = vpop.permute.xlu1 %5000  ;;  %v4996_v62 = vpop.permute.xlu0 %4995  ;;  %v4427_v4 = vpack.c.bf16 %v1972_v49, %v1971_v24 }
 0x6be   :  { %v5003_v51 = vunpack.i.h.bf16 %v5001_v25  ;;  %v5002_v28 = vunpack.i.l.bf16 %v5001_v25  ;;  %v4998_v1 = vunpack.i.h.bf16 %v4996_v62  ;;  %v4997_v31 = vunpack.i.l.bf16 %v4996_v62 }
 0x6bf   :  { %4428 = vmatpush3.bf16.msra.mxu1 %v4427_v4  ;;  %5290 = vrot.lane.b32.xlu1 %v6509_v15, %s5756_s2 }
 0x6c0   :  { %5285 = vrot.lane.b32.xlu0 %v6509_v15, %s5762_s24  ;;  %v2196_v32 = vsel %vm873_vm7, %v4997_v31, %v5002_v28  ;;  %v2197_v39 = vsel %vm873_vm7, %v4998_v1, %v5003_v51 }
 0x6c1   :  { %v6620_v55 = vpop.permute.xlu1 %5010  ;;  %v6622_v3 = vpop.permute.xlu0 %5005  ;;  %v4457_v58 = vpack.c.bf16 %v2197_v39, %v2196_v32 }
 0x6c2   :  { %v5008_v11 = vunpack.i.h.bf16 %v6622_v3 }
 0x6c3   :  { %4458 = vmatprep.subr.bf16.mxu0 %v4457_v58  ;;  %2379 = vperm.xlu1 %4972, %v2365_v26  }
 0x6c4   :  { %2374 = vperm.xlu0 %4973, %v2364_v35   ;;  %4460 = vmatpush3.bf16.msra.mxu0 %v4459_v59 }
 0x6c5   :  { %v5021_v56 = vpop.permute.xlu1 %5020  ;;  %v5016_v21 = vpop.permute.xlu0 %5015 }
 0x6c6   :  { %v5023_v53 = vunpack.i.h.bf16 %v5021_v56  ;;  %v5022_v15 = vunpack.i.l.bf16 %v5021_v56  ;;  %v5018_v43 = vunpack.i.h.bf16 %v5016_v21  ;;  %v5017_v29 = vunpack.i.l.bf16 %v5016_v21 }
 0x6c7   :  { %2389 = vperm.xlu1 %4972, %v2367_v30  }
 0x6c8   :  { %2384 = vperm.xlu0 %4973, %v2366_v47   ;;  %v2086_v20 = vsel %vm2083_vm11, %v5017_v29, %v5022_v15  ;;  %v2087_v18 = vsel %vm2083_vm11, %v5018_v43, %v5023_v53 }
 0x6c9   :  { %v5031_v59 = vpop.permute.xlu1 %5030  ;;  %v5026_v61 = vpop.permute.xlu0 %5025  ;;  %v4429_v60 = vpack.c.bf16 %v2087_v18, %v2086_v20 }
 0x6ca   :  { %v5033_v37 = vunpack.i.h.bf16 %v5031_v59  ;;  %v5032_v2 = vunpack.i.l.bf16 %v5031_v59  ;;  %v5028_v6 = vunpack.i.h.bf16 %v5026_v61  ;;  %v5027_v45 = vunpack.i.l.bf16 %v5026_v61 }
 0x6cb   :  { %4430 = vmatprep.subr.bf16.mxu1 %v4429_v60  ;;  %2399 = vperm.xlu1 %4972, %v2369_v5  }
 0x6cc   :  { %v1974_v10 = vsel %vm1970_vm14, %v5028_v6, %v5033_v37  ;;  %v1973_v14 = vsel %vm1970_vm14, %v5027_v45, %v5032_v2  ;;  %2394 = vperm.xlu0 %4973, %v2368_v63  }
 0x6cd   :  { %v5041_v19 = vpop.permute.xlu1 %5040  ;;  %v5036_v23 = vpop.permute.xlu0 %5035  ;;  %v4431_v33 = vpack.c.bf16 %v1974_v10, %v1973_v14 }
 0x6ce   :  { %v5043_v49 = vunpack.i.h.bf16 %v5041_v19  ;;  %v5042_v24 = vunpack.i.l.bf16 %v5041_v19  ;;  %v5038_v25 = vunpack.i.h.bf16 %v5036_v23  ;;  %v5037_v62 = vunpack.i.l.bf16 %v5036_v23 }
 0x6cf   :  { %4432 = vmatpush3.bf16.msra.mxu1 %v4431_v33  ;;  %2409 = vperm.xlu1 %4972, %v2371_v57  }
 0x6d0   :  { %2404 = vperm.xlu0 %4973, %v2370_v22   ;;  %v2198_v4 = vsel %vm873_vm7, %v5037_v62, %v5042_v24  ;;  %v2199_v51 = vsel %vm873_vm7, %v5038_v25, %v5043_v49 }
 0x6d1   :  { %v6654_v28 = vpop.permute.xlu1 %5050  ;;  %v6656_v1 = vpop.permute.xlu0 %5045  ;;  %v4461_v31 = vpack.c.bf16 %v2199_v51, %v2198_v4 }
 0x6d3   :  { %4462 = vmatprep.subr.bf16.mxu0 %v4461_v31 }
 0x6d4   :  { %4464 = vmatpush3.bf16.msra.mxu0 %v4463_v38 }
 0x6d5   :  { %v5061_v32 = vpop.permute.xlu1 %5060  ;;  %v5056_v39 = vpop.permute.xlu0 %5055 }
 0x6d6   :  { %v5063_v26 = vunpack.i.h.bf16 %v5061_v32  ;;  %v5062_v58 = vunpack.i.l.bf16 %v5061_v32  ;;  %v5058_v35 = vunpack.i.h.bf16 %v5056_v39  ;;  %v5057_v30 = vunpack.i.l.bf16 %v5056_v39 }
 0x6d8   :  { %v2088_v56 = vsel %vm2083_vm11, %v5057_v30, %v5062_v58  ;;  %v2089_v21 = vsel %vm2083_vm11, %v5058_v35, %v5063_v26 }
 0x6d9   :  { %v5071_v47 = vpop.permute.xlu1 %5070  ;;  %v5066_v53 = vpop.permute.xlu0 %5065  ;;  %v4433_v15 = vpack.c.bf16 %v2089_v21, %v2088_v56 }
 0x6da   :  { %v5073_v43 = vunpack.i.h.bf16 %v5071_v47  ;;  %v5072_v29 = vunpack.i.l.bf16 %v5071_v47  ;;  %v5068_v20 = vunpack.i.h.bf16 %v5066_v53  ;;  %v5067_v18 = vunpack.i.l.bf16 %v5066_v53 }
 0x6db   :  { %4434 = vmatprep.subr.bf16.mxu1 %v4433_v15 }
 0x6dc   :  { %v1976_v27 = vsel %vm1970_vm14, %v5068_v20, %v5073_v43  ;;  %v1975_v34 = vsel %vm1970_vm14, %v5067_v18, %v5072_v29 }
 0x6dd   :  { %v5081_v38 = vpop.permute.xlu1 %5080  ;;  %v5076_v5 = vpop.permute.xlu0 %5075  ;;  %v4435_v59 = vpack.c.bf16 %v1976_v27, %v1975_v34 }
 0x6de   :  { %v5083_v61 = vunpack.i.h.bf16 %v5081_v38  ;;  %v5082_v60 = vunpack.i.l.bf16 %v5081_v38  ;;  %v5078_v63 = vunpack.i.h.bf16 %v5076_v5  ;;  %v5077_v37 = vunpack.i.l.bf16 %v5076_v5 }
 0x6df   :  { %4436 = vmatpush3.bf16.msra.mxu1 %v4435_v59 }
 0x6e0   :  { %v2200_v2 = vsel %vm873_vm7, %v5077_v37, %v5082_v60  ;;  %v2201_v6 = vsel %vm873_vm7, %v5078_v63, %v5083_v61 }
 0x6e1   :  { %v5091_v45 = vpop.permute.xlu1 %5090  ;;  %v5086_v10 = vpop.permute.xlu0 %5085  ;;  %v4465_v14 = vpack.c.bf16 %v2201_v6, %v2200_v2 }
 0x6e2   :  { %v5093_v57 = vunpack.i.h.bf16 %v5091_v45  ;;  %v5092_v19 = vunpack.i.l.bf16 %v5091_v45  ;;  %v5088_v23 = vunpack.i.h.bf16 %v5086_v10  ;;  %v5087_v33 = vunpack.i.l.bf16 %v5086_v10 }
 0x6e3   :  { %4466 = vmatprep.subr.bf16.mxu0 %v4465_v14 }
 0x6e4   :  { %4468 = vmatpush3.bf16.msra.mxu0 %v4467_v40  ;;  %v2090_v22 = vsel %vm2083_vm11, %v5087_v33, %v5092_v19  ;;  %v2091_v49 = vsel %vm2083_vm11, %v5088_v23, %v5093_v57 }
 0x6e5   :  { %v5101_v24 = vpop.permute.xlu1 %5100  ;;  %v5096_v25 = vpop.permute.xlu0 %5095  ;;  %v4437_v62 = vpack.c.bf16 %v2091_v49, %v2090_v22 }
 0x6e6   :  { %v5103_v4 = vunpack.i.h.bf16 %v5101_v24  ;;  %v5102_v51 = vunpack.i.l.bf16 %v5101_v24  ;;  %v5098_v31 = vunpack.i.h.bf16 %v5096_v25  ;;  %v5097_v32 = vunpack.i.l.bf16 %v5096_v25 }
 0x6e7   :  { %4438 = vmatprep.subr.bf16.mxu1 %v4437_v62 }
 0x6e8   :  { %v1978_v39 = vsel %vm1970_vm14, %v5098_v31, %v5103_v4  ;;  %v1977_v26 = vsel %vm1970_vm14, %v5097_v32, %v5102_v51 }
 0x6e9   :  { %v5111_v58 = vpop.permute.xlu1 %5110  ;;  %v5106_v35 = vpop.permute.xlu0 %5105  ;;  %v4439_v36 = vpack.c.bf16 %v1978_v39, %v1977_v26 }
 0x6ea   :  { %v5113_v7 = vunpack.i.h.bf16 %v5111_v58  ;;  %v5112_v40 = vunpack.i.l.bf16 %v5111_v58  ;;  %v5108_v30 = vunpack.i.h.bf16 %v5106_v35  ;;  %v5107_v56 = vunpack.i.l.bf16 %v5106_v35 }
 0x6eb   :  { %4440 = vmatpush3.bf16.msra.mxu1 %v4439_v36 }
 0x6ec   :  { %v2202_v21 = vsel %vm873_vm7, %v5107_v56, %v5112_v40  ;;  %v2203_v47 = vsel %vm873_vm7, %v5108_v30, %v5113_v7 }
 0x6ed   :  { %v5121_v53 = vpop.permute.xlu1 %5120  ;;  %v5116_v15 = vpop.permute.xlu0 %5115  ;;  %v4469_v43 = vpack.c.bf16 %v2203_v47, %v2202_v21 }
 0x6ee   :  { %v5123_v29 = vunpack.i.h.bf16 %v5121_v53  ;;  %v5122_v20 = vunpack.i.l.bf16 %v5121_v53  ;;  %v5118_v18 = vunpack.i.h.bf16 %v5116_v15  ;;  %v5117_v27 = vunpack.i.l.bf16 %v5116_v15 }
 0x6ef   :  { %4470 = vmatprep.subr.bf16.mxu0 %v4469_v43 }
 0x6f0   :  { %4472 = vmatpush3.bf16.msra.mxu0 %v4471_v44  ;;  %v2092_v34 = vsel %vm2083_vm11, %v5117_v27, %v5122_v20  ;;  %v2093_v38 = vsel %vm2083_vm11, %v5118_v18, %v5123_v29 }
 0x6f1   :  { %v5131_v5 = vpop.permute.xlu1 %5130  ;;  %v5126_v59 = vpop.permute.xlu0 %5125  ;;  %v4441_v61 = vpack.c.bf16 %v2093_v38, %v2092_v34 }
 0x6f2   :  { %v5133_v60 = vunpack.i.h.bf16 %v5131_v5  ;;  %v5132_v63 = vunpack.i.l.bf16 %v5131_v5  ;;  %v5128_v37 = vunpack.i.h.bf16 %v5126_v59  ;;  %v5127_v2 = vunpack.i.l.bf16 %v5126_v59 }
 0x6f3   :  { %4442 = vmatprep.subr.bf16.mxu1 %v4441_v61 }
 0x6f4   :  { %v1980_v6 = vsel %vm1970_vm14, %v5128_v37, %v5133_v60  ;;  %v1979_v45 = vsel %vm1970_vm14, %v5127_v2, %v5132_v63 }
 0x6f5   :  { %v4443_v10 = vpack.c.bf16 %v1980_v6, %v1979_v45  ;;  %v5141_v14 = vpop.permute.xlu1 %5140  ;;  %v5136_v12 = vpop.permute.xlu0 %5135 }
 0x6f6   :  { %v5143_v41 = vunpack.i.h.bf16 %v5141_v14  ;;  %v5142_v44 = vunpack.i.l.bf16 %v5141_v14  ;;  %v5138_v57 = vunpack.i.h.bf16 %v5136_v12  ;;  %v5137_v19 = vunpack.i.l.bf16 %v5136_v12 }
 0x6f7   :  { %4444 = vmatpush3.bf16.msra.mxu1 %v4443_v10  ;;  %v5012_v12 = vunpack.i.l.bf16 %v6620_v55 }
 0x6f8   :  { %v2204_v23 = vsel %vm873_vm7, %v5137_v19, %v5142_v44  ;;  %v2205_v33 = vsel %vm873_vm7, %v5138_v57, %v5143_v41  ;;  %v5007_v41 = vunpack.i.l.bf16 %v6622_v3  ;;  %v5013_v44 = vunpack.i.h.bf16 %v6620_v55 }
 0x6f9   :  { %v5151_v22 = vpop.permute.xlu1 %5150  ;;  %v5146_v49 = vpop.permute.xlu0 %5145  ;;  %v4473_v24 = vpack.c.bf16 %v2205_v33, %v2204_v23 }
 0x6fa   :  { %v5153_v25 = vunpack.i.h.bf16 %v5151_v22  ;;  %v5152_v62 = vunpack.i.l.bf16 %v5151_v22  ;;  %v5148_v4 = vunpack.i.h.bf16 %v5146_v49  ;;  %v5147_v51 = vunpack.i.l.bf16 %v5146_v49 }
 0x6fb   :  { %4474 = vmatprep.subr.bf16.mxu0 %v4473_v24 }
 0x6fc   :  { %4476 = vmatpush3.bf16.msra.mxu0 %v4475_v13  ;;  %v2094_v31 = vsel %vm2083_vm11, %v5147_v51, %v5152_v62  ;;  %v2095_v32 = vsel %vm2083_vm11, %v5148_v4, %v5153_v25  ;;  %v2308_v25 = vsel %vm986_vm8, %v5007_v41, %v5012_v12  ;;  %v5053_v62 = vunpack.i.h.bf16 %v6654_v28 }
 0x6fd   :  { %v5161_v39 = vpop.permute.xlu1 %5160  ;;  %v5156_v26 = vpop.permute.xlu0 %5155  ;;  %v4445_v58 = vpack.c.bf16 %v2095_v32, %v2094_v31  ;;  %v2309_v4 = vsel %vm986_vm8, %v5008_v11, %v5013_v44  ;;  %v5052_v51 = vunpack.i.l.bf16 %v6654_v28  ;;  %v5048_v31 = vunpack.i.h.bf16 %v6656_v1 }
 0x6fe   :  { %v5163_v35 = vunpack.i.h.bf16 %v5161_v39  ;;  %v5162_v36 = vunpack.i.l.bf16 %v5161_v39  ;;  %v5158_v7 = vunpack.i.h.bf16 %v5156_v26  ;;  %v5157_v40 = vunpack.i.l.bf16 %v5156_v26 }
 0x6ff   :  { %4446 = vmatprep.subr.bf16.mxu1 %v4445_v58  ;;  %v5047_v32 = vunpack.i.l.bf16 %v6656_v1  ;;  %v4489_v28 = vpack.c.bf16 %v2309_v4, %v2308_v25  ;;  %v2311_v1 = vsel %vm986_vm8, %v5048_v31, %v5053_v62  ;;  %v2339_v62 = vld [vmem:[#allocation13 + $0x78] sm:$0xff] }
 0x700   :  { %v1982_v30 = vsel %vm1970_vm14, %v5158_v7, %v5163_v35  ;;  %v1981_v56 = vsel %vm1970_vm14, %v5157_v40, %v5162_v36 }
 0x701   :  { %v4447_v21 = vpack.c.bf16 %v1982_v30, %v1981_v56  ;;  %v5171_v47 = vpop.permute.xlu1 %5170  ;;  %v5166_v42 = vpop.permute.xlu0 %5165 }
 0x702   :  { %v5173_v46 = vunpack.i.h.bf16 %v5171_v47  ;;  %v5172_v13 = vunpack.i.l.bf16 %v5171_v47  ;;  %v5168_v53 = vunpack.i.h.bf16 %v5166_v42  ;;  %v5167_v15 = vunpack.i.l.bf16 %v5166_v42 }
 0x703   :  { %4448 = vmatpush3.bf16.msra.mxu1 %v4447_v21 }
 0x704   :  { %v2206_v43 = vsel %vm873_vm7, %v5167_v15, %v5172_v13  ;;  %v2207_v29 = vsel %vm873_vm7, %v5168_v53, %v5173_v46  ;;  %v2310_v46 = vsel %vm986_vm8, %v5047_v32, %v5052_v51 }
 0x705   :  { %v5181_v20 = vpop.permute.xlu1 %5180  ;;  %v5176_v18 = vpop.permute.xlu0 %5175  ;;  %v4477_v27 = vpack.c.bf16 %v2207_v29, %v2206_v43  ;;  %v2324_v29 = vld [vmem:[#allocation13] sm:$0xff] }
 0x706   :  { %v5183_v34 = vunpack.i.h.bf16 %v5181_v20  ;;  %v5182_v38 = vunpack.i.l.bf16 %v5181_v20  ;;  %v5178_v5 = vunpack.i.h.bf16 %v5176_v18  ;;  %v5177_v59 = vunpack.i.l.bf16 %v5176_v18 }
 0x707   :  { %4478 = vmatprep.subr.bf16.mxu0 %v4477_v27 }
 0x708   :  { %4480 = vmatpush3.bf16.msra.mxu0 %v4479_v50  ;;  %v2096_v61 = vsel %vm2083_vm11, %v5177_v59, %v5182_v38  ;;  %v2097_v60 = vsel %vm2083_vm11, %v5178_v5, %v5183_v34  ;;  %v4493_v5 = vpack.c.bf16 %v2311_v1, %v2310_v46 }
 0x709   :  { %v5191_v63 = vpop.permute.xlu1 %5190  ;;  %v5186_v37 = vpop.permute.xlu0 %5185  ;;  %v4449_v2 = vpack.c.bf16 %v2097_v60, %v2096_v61 }
 0x70a   :  { %v5193_v6 = vunpack.i.h.bf16 %v5191_v63  ;;  %v5192_v45 = vunpack.i.l.bf16 %v5191_v63  ;;  %v5188_v10 = vunpack.i.h.bf16 %v5186_v37  ;;  %v5187_v14 = vunpack.i.l.bf16 %v5186_v37  ;;  %v2330_v37 = vld [vmem:[#allocation13 + $0x30] sm:$0xff] }
 0x70b   :  { %4450 = vmatprep.subr.bf16.mxu1 %v4449_v2  ;;  %v2329_v2 = vld [vmem:[#allocation13 + $0x28] sm:$0xff] }
 0x70c   :  { %v1984_v8 = vsel %vm1970_vm14, %v5188_v10, %v5193_v6  ;;  %v1983_v50 = vsel %vm1970_vm14, %v5187_v14, %v5192_v45  ;;  %v2335_v10 = vld [vmem:[#allocation13 + $0x58] sm:$0xff] }
 0x70d   :  { %v4451_v57 = vpack.c.bf16 %v1984_v8, %v1983_v50  ;;  %v5201_v19 = vpop.permute.xlu1 %5200  ;;  %v5196_v23 = vpop.permute.xlu0 %5195 }
 0x70e   :  { %v5203_v33 = vunpack.i.h.bf16 %v5201_v19  ;;  %v5202_v22 = vunpack.i.l.bf16 %v5201_v19  ;;  %v5198_v49 = vunpack.i.h.bf16 %v5196_v23  ;;  %v5197_v24 = vunpack.i.l.bf16 %v5196_v23 }
 0x70f   :  { %4452 = vmatpush3.bf16.msra.mxu1 %v4451_v57  ;;  %v2334_v57 = vld [vmem:[#allocation13 + $0x50] sm:$0xff] }
 0x710   :  { %v2098_v55 = vsel %vm2083_vm11, %v5197_v24, %v5202_v22  ;;  %v2099_v3 = vsel %vm2083_vm11, %v5198_v49, %v5203_v33  ;;  %v2340_v33 = vld [vmem:[#allocation13 + $0x80] sm:$0xff] }
 0x711   :  { %v5216_v39 = vpop.permute.xlu1 %5215  ;;  %v5206_v26 = vpop.permute.xlu0 %5205  ;;  %v4453_v58 = vpack.c.bf16 %v2099_v3, %v2098_v55  ;;  %v2326_v55 = vld [vmem:[#allocation13 + $0x10] sm:$0xff] }
 0x712   :  { %v5218_v35 = vunpack.i.h.bf16 %v5216_v39  ;;  %v5217_v36 = vunpack.i.l.bf16 %v5216_v39  ;;  %v5208_v7 = vunpack.i.h.bf16 %v5206_v26  ;;  %v5207_v40 = vunpack.i.l.bf16 %v5206_v26  ;;  %v2345_v39 = vld [vmem:[#allocation13 + $0xa8] sm:$0xff] }
 0x713   :  { %4454 = vmatprep.subr.bf16.mxu1 %v4453_v58 }
 0x714   :  { %v1986_v30 = vsel %vm1970_vm14, %v5208_v7, %v5218_v35  ;;  %v1985_v56 = vsel %vm1970_vm14, %v5207_v40, %v5217_v36  ;;  %v2332_v7 = vld [vmem:[#allocation13 + $0x40] sm:$0xff] }
 0x715   :  { %v4455_v21 = vpack.c.bf16 %v1986_v30, %v1985_v56  ;;  %v5221_v47 = vpop.permute.xlu1 %5220  ;;  %v5211_v42 = vpop.permute.xlu0 %5210 }
 0x716   :  { %v5223_v13 = vunpack.i.h.bf16 %v5221_v47  ;;  %v5222_v53 = vunpack.i.l.bf16 %v5221_v47  ;;  %v5213_v15 = vunpack.i.h.bf16 %v5211_v42  ;;  %v5212_v43 = vunpack.i.l.bf16 %v5211_v42  ;;  %v2350_v47 = vld [vmem:[#allocation13 + $0xd0] sm:$0xff] }
 0x717   :  { %4456 = vmatpush3.bf16.msra.mxu1 %v4455_v21 }
 0x718   :  { %4490 = vmatprep.subr.bf16.mxu1 %v4489_v28  ;;  %v2208_v20 = vsel %vm873_vm7, %v5212_v43, %v5222_v53  ;;  %v2209_v18 = vsel %vm873_vm7, %v5213_v15, %v5223_v13  ;;  %v2337_v13 = vld [vmem:[#allocation13 + $0x68] sm:$0xff]  ;;  %v2336_v15 = vld [vmem:[#allocation13 + $0x60] sm:$0xff] }
 0x719   :  { %v5231_v27 = vpop.permute.xlu1 %5230  ;;  %v5226_v34 = vpop.permute.xlu0 %5225  ;;  %v4481_v38 = vpack.c.bf16 %v2209_v18, %v2208_v20  ;;  %v2349_v53 = vld [vmem:[#allocation13 + $0xc8] sm:$0xff] }
 0x71a   :  { %v5233_v59 = vunpack.i.h.bf16 %v5231_v27  ;;  %v5232_v61 = vunpack.i.l.bf16 %v5231_v27  ;;  %v5228_v60 = vunpack.i.h.bf16 %v5226_v34  ;;  %v5227_v63 = vunpack.i.l.bf16 %v5226_v34  ;;  %2477 = vmatmul.mubr.f32.vlgmr.msra.gmra.mrb[50].mxu1 %v2324_v29  ;;  %v2355_v27 = vld [vmem:[#allocation13 + $0xf8] sm:$0xff] }
 0x71b   :  { %4482 = vmatprep.subr.bf16.mxu0 %v4481_v38  ;;  %4492 = vmatpush3.bf16.msra.mxu1 %v4489_v28 }
 0x71c   :  { %4484 = vmatpush3.bf16.msra.mxu0 %v4483_v16  ;;  %4494 = vmatprep.subr.bf16.mxu1 %v4493_v5  ;;  %v2312_v6 = vsel %vm986_vm8, %v5227_v63, %v5232_v61  ;;  %v2313_v45 = vsel %vm986_vm8, %v5228_v60, %v5233_v59  ;;  %v2342_v59 = vld [vmem:[#allocation13 + $0x90] sm:$0xff] }
 0x71d   :  { %v5246_v14 = vpop.permute.xlu1 %5245  ;;  %v5236_v12 = vpop.permute.xlu0 %5235  ;;  %2481 = vmatprep.mubr.f32.mxu1 %v2330_v37  ;;  %v4497_v41 = vpack.c.bf16 %v2313_v45, %v2312_v6  ;;  %v2354_v63 = vld [vmem:[#allocation13 + $0xf0] sm:$0xff]  ;;  %v2341_v37 = vld [vmem:[#allocation13 + $0x88] sm:$0xff] }
 0x71e   :  { %v5248_v44 = vunpack.i.h.bf16 %v5246_v14  ;;  %v5247_v11 = vunpack.i.l.bf16 %v5246_v14  ;;  %v5238_v8 = vunpack.i.h.bf16 %v5236_v12  ;;  %v5237_v50 = vunpack.i.l.bf16 %v5236_v12  ;;  %2482 = vmatmul.mubr.f32.gmra.mrb[52].mxu1 %v2329_v2  ;;  %v2360_v2 = vld [vmem:[#allocation13 + $0x120] sm:$0xff]  ;;  %v2347_v14 = vld [vmem:[#allocation13 + $0xb8] sm:$0xff] }
 0x71f   :  { %4496 = vmatpush3.bf16.msra.mxu1 %v4493_v5  ;;  %2486 = vmatprep.mubr.f32.mxu1 %v2335_v10 }
 0x720   :  { %4498 = vmatprep.subr.bf16.mxu1 %v4497_v41  ;;  %v2210_v48 = vsel %vm873_vm7, %v5237_v50, %v5247_v11  ;;  %v2211_v52 = vsel %vm873_vm7, %v5238_v8, %v5248_v44 }
 0x721   :  { %v5251_v16 = vpop.permute.xlu1 %5250  ;;  %v5241_v19 = vpop.permute.xlu0 %5240  ;;  %v4485_v23 = vpack.c.bf16 %v2211_v52, %v2210_v48  ;;  %v2346_v48 = vld [vmem:[#allocation13 + $0xb0] sm:$0xff]  ;;  %v2328_v52 = vld [vmem:[#allocation13 + $0x20] sm:$0xff] }
 0x722   :  { %v5253_v22 = vunpack.i.h.bf16 %v5251_v16  ;;  %v5252_v49 = vunpack.i.l.bf16 %v5251_v16  ;;  %v5243_v24 = vunpack.i.h.bf16 %v5241_v19  ;;  %v5242_v25 = vunpack.i.l.bf16 %v5241_v19  ;;  %2487 = vmatmul.mubr.f32.gmra.mrb[54].mxu1 %v2334_v57  ;;  %v2359_v57 = vld [vmem:[#allocation13 + $0x118] sm:$0xff] }
 0x723   :  { %4486 = vmatprep.subr.bf16.mxu0 %v4485_v23  ;;  %4500 = vmatpush3.bf16.msra.mxu1 %v4497_v41  ;;  %v2352_v23 = vld [vmem:[#allocation13 + $0xe0] sm:$0xff] }
 0x724   :  { %4488 = vmatpush3.bf16.msra.mxu0 %v4487_v17  ;;  %2491 = vmatprep.mubr.f32.mxu1 %v2340_v33  ;;  %v2314_v3 = vsel %vm986_vm8, %v5242_v25, %v5252_v49  ;;  %v2315_v4 = vsel %vm986_vm8, %v5243_v24, %v5253_v22  ;;  %v2351_v22 = vld [vmem:[#allocation13 + $0xd8] sm:$0xff]  ;;  %v2333_v49 = vld [vmem:[#allocation13 + $0x48] sm:$0xff]  ;;  %v2338_v25 = vld [vmem:[#allocation13 + $0x70] sm:$0xff] }
 0x725   :  { %v5261_v51 = vpop.permute.xlu1 %5260  ;;  %v5256_v31 = vpop.permute.xlu0 %5255  ;;  %v4501_v32 = vpack.c.bf16 %v2315_v4, %v2314_v3  ;;  %v2357_v24 = vld [vmem:[#allocation13 + $0x108] sm:$0xff]  ;;  %v2362_v3 = vld [vmem:[#allocation13 + $0x130] sm:$0xff]  ;;  %v2348_v4 = vld [vmem:[#allocation13 + $0xc0] sm:$0xff] }
 0x726   :  { %v5263_v26 = vunpack.i.h.bf16 %v5261_v51  ;;  %v5262_v58 = vunpack.i.l.bf16 %v5261_v51  ;;  %v5258_v35 = vunpack.i.h.bf16 %v5256_v31  ;;  %v5257_v36 = vunpack.i.l.bf16 %v5256_v31  ;;  %2492 = vmatmul.mubr.f32.gmra.mrb[56].mxu1 %v2339_v62  ;;  %v2356_v62 = vld [vmem:[#allocation13 + $0x100] sm:$0xff]  ;;  %v2361_v51 = vld [vmem:[#allocation13 + $0x128] sm:$0xff] }
 0x727   :  { %2582 = vmatmul.mubr.f32.vlgmr.msra.gmra.mrb[66].mxu0 %v2326_v55  ;;  %4502 = vmatprep.subr.bf16.mxu1 %v4501_v32  ;;  %v2343_v55 = vld [vmem:[#allocation13 + $0x98] sm:$0xff]  ;;  %v2353_v31 = vld [vmem:[#allocation13 + $0xe8] sm:$0xff] }
 0x728   :  { %4504 = vmatpush3.bf16.msra.mxu1 %v4501_v32  ;;  %2496 = vmatprep.mubr.f32.mxu1 %v2345_v39  ;;  %v2316_v17 = vsel %vm986_vm8, %v5257_v36, %v5262_v58  ;;  %v2317_v40 = vsel %vm986_vm8, %v5258_v35, %v5263_v26  ;;  %v2358_v32 = vld [vmem:[#allocation13 + $0x110] sm:$0xff]  ;;  %v2363_v39 = vld [vmem:[#allocation13 + $0x138] sm:$0xff]  ;;  %v2752_v58 = vld [vmem:[%s7003_s11 + $0x8] sm:$0xff] }
 0x729   :  { %v5271_v30 = vpop.permute.xlu1 %5270  ;;  %v5266_v56 = vpop.permute.xlu0 %5265  ;;  %2586 = vmatprep.mubr.f32.mxu0 %v2332_v7  ;;  %v4505_v21 = vpack.c.bf16 %v2317_v40, %v2316_v17  ;;  %v2751_v26 = vld [vmem:[%s7003_s11] sm:$0xff]  ;;  %v2753_v36 = vld [vmem:[%s7003_s11 + $0x10] sm:$0xff]  ;;  %v2754_v7 = vld [vmem:[%s7003_s11 + $0x18] sm:$0xff]  ;;  %s5763_s11 = smov 62  }
 0x72a   :  { %v5273_v42 = vunpack.i.h.bf16 %v5271_v30  ;;  %v5272_v28 = vunpack.i.l.bf16 %v5271_v30  ;;  %v5268_v46 = vunpack.i.h.bf16 %v5266_v56  ;;  %v5267_v1 = vunpack.i.l.bf16 %v5266_v56  ;;  %2497 = vmatmul.mubr.f32.gmra.mrb[58].mxu1 %v2344_v54 }
 0x72b   :  { %2587 = vmatmul.mubr.f32.gmra.mrb[68].mxu0 %v2331_v9  ;;  %4506 = vmatprep.subr.bf16.mxu1 %v4505_v21  ;;  %v4521_v35 = vpack.c.bf16 %v2752_v58, %v2751_v26  ;;  %v4525_v54 = vpack.c.bf16 %v2754_v7, %v2753_v36 }
 0x72c   :  { %4508 = vmatpush3.bf16.msra.mxu1 %v4505_v21  ;;  %2501 = vmatprep.mubr.f32.mxu1 %v2350_v47  ;;  %v2318_v43 = vsel %vm986_vm8, %v5267_v1, %v5272_v28  ;;  %v2319_v29 = vsel %vm986_vm8, %v5268_v46, %v5273_v42 }
 0x72d   :  { %v5281_v20 = vpop.permute.xlu1 %5280  ;;  %2591 = vmatprep.mubr.f32.mxu0 %v2337_v13  ;;  %v4509_v18 = vpack.c.bf16 %v2319_v29, %v2318_v43  ;;  %4522 = vmatprep.subr.bf16.mxu0 %v4521_v35 }
 0x72e   :  { %v5283_v34 = vunpack.i.h.bf16 %v5281_v20  ;;  %v5282_v38 = vunpack.i.l.bf16 %v5281_v20  ;;  %v5276_v5 = vpop.permute.xlu0 %5275  ;;  %2502 = vmatmul.mubr.f32.gmra.mrb[60].mxu1 %v2349_v53  ;;  %4524 = vmatpush3.bf16.msra.mxu0 %v4521_v35 }
 0x72f   :  { %v5278_v61 = vunpack.i.h.bf16 %v5276_v5  ;;  %v5277_v60 = vunpack.i.l.bf16 %v5276_v5  ;;  %2592 = vmatmul.mubr.f32.gmra.mrb[70].mxu0 %v2336_v15  ;;  %4510 = vmatprep.subr.bf16.mxu1 %v4509_v18 }
 0x730   :  { %4512 = vmatpush3.bf16.msra.mxu1 %v4509_v18  ;;  %2506 = vmatprep.mubr.f32.mxu1 %v2355_v27 }
 0x731   :  { %v5291_v6 = vpop.permute.xlu1 %5290  ;;  %2596 = vmatprep.mubr.f32.mxu0 %v2342_v59  ;;  %v2320_v45 = vsel %vm986_vm8, %v5277_v60, %v5282_v38  ;;  %v2321_v10 = vsel %vm986_vm8, %v5278_v61, %v5283_v34  ;;  %4526 = vmatprep.subr.bf16.mxu0 %v4525_v54 }
 0x732   :  { %v5293_v12 = vunpack.i.h.bf16 %v5291_v6  ;;  %v5292_v41 = vunpack.i.l.bf16 %v5291_v6  ;;  %v5286_v44 = vpop.permute.xlu0 %5285  ;;  %2507 = vmatmul.mubr.f32.gmra.mrb[62].mxu1 %v2354_v63  ;;  %v4513_v11 = vpack.c.bf16 %v2321_v10, %v2320_v45  ;;  %4528 = vmatpush3.bf16.msra.mxu0 %v4525_v54 }
 0x733   :  { %v5288_v8 = vunpack.i.h.bf16 %v5286_v44  ;;  %v5287_v50 = vunpack.i.l.bf16 %v5286_v44  ;;  %2597 = vmatmul.mubr.f32.gmra.mrb[72].mxu0 %v2341_v37  ;;  %2511 = vmatprep.mubr.f32.mxu1 %v2360_v2 }
 0x734   :  { %4514 = vmatprep.subr.bf16.mxu1 %v4513_v11  ;;  %2601 = vmatprep.mubr.f32.mxu0 %v2347_v14 }
 0x735   :  { %4516 = vmatpush3.bf16.msra.mxu1 %v4513_v11  ;;  %v2322_v16 = vsel %vm986_vm8, %v5287_v50, %v5292_v41  ;;  %v2323_v19 = vsel %vm986_vm8, %v5288_v8, %v5293_v12  ;;  %4577 = vmatprep.subr.bf16.mxu0 %v5734_v0 }
 0x736   :  { %2512 = vmatmul.mubr.f32.gmra.mrb[64].mxu1 %v2359_v57  ;;  %v4517_v33 = vpack.c.bf16 %v2323_v19, %v2322_v16 }
 0x737   :  { %2602 = vmatmul.mubr.f32.gmra.mrb[74].mxu0 %v2346_v48  ;;  %4247 = vmatprep.mubr.f32.mxu1 %v2328_v52 }
 0x738   :  { %4518 = vmatprep.subr.bf16.mxu1 %v4517_v33  ;;  %2606 = vmatprep.mubr.f32.mxu0 %v2352_v23 }
 0x739   :  { %4520 = vmatpush3.bf16.msra.mxu1 %v4517_v33 }
 0x73b   :  { %2607 = vmatmul.mubr.f32.gmra.mrb[76].mxu0 %v2351_v22 }
 0x73c   :  { %4248 = vmatmul.mubr.f32.vlgmr.msra.gmra.mrb[66].mxu1 %v2333_v49  ;;  %2611 = vmatprep.mubr.f32.mxu0 %v2357_v24 }
 0x73d   :  { %4250 = vmatprep.mubr.f32.mxu1 %v2338_v25 }
 0x73f   :  { %2612 = vmatmul.mubr.f32.gmra.mrb[78].mxu0 %v2356_v62 }
 0x740   :  { %4251 = vmatmul.mubr.f32.gmra.mrb[68].mxu1 %v2343_v55  ;;  %2616 = vmatprep.mubr.f32.mxu0 %v2362_v3 }
 0x741   :  { %4253 = vmatprep.mubr.f32.mxu1 %v2348_v4 }
 0x742   :  { %v2380_v5 = vpop.permute.xlu1 %2379 }
 0x743   :  { %2617 = vmatmul.mubr.f32.gmra.mrb[80].mxu0 %v2361_v51  ;;  %v2375_v53 = vpop.permute.xlu0 %2374 }
 0x744   :  { %4254 = vmatmul.mubr.f32.gmra.mrb[70].mxu1 %v2353_v31 }
 0x745   :  { %4256 = vmatprep.mubr.f32.mxu1 %v2358_v32 }
 0x746   :  { %v2390_v48 = vpop.permute.xlu1 %2389 }
 0x747   :  { %v2385_v10 = vpop.permute.xlu0 %2384 }
 0x748   :  { %4257 = vmatmul.mubr.f32.gmra.mrb[72].mxu1 %v2363_v39 }
 0x74a   :  { %v2400_v51 = vpop.permute.xlu1 %2399 }
 0x74b   :  { %v2395_v25 = vpop.permute.xlu0 %2394 }
 0x7ed   :  { %v3895_v9 = vpop.f32.mrb[50].mxu1 }
 0x7ee   :  { %v3896_v17 = vpop.f32.mrb[51].mxu1 }
 0x7ef   :  { %v3897_v40 = vadd.f32 %v3896_v17, %v3895_v9  ;;  %v2405_v9 = vpop.permute.xlu0 %2404 }
 0x7f1   :  { %v3898_v30 = vpop.f32.mrb[52].mxu1  ;;  %v2479_v29 = vadd.f32 %v3897_v40, %v2375_v53 }
 0x7f2   :  { %v3899_v56 = vpop.f32.mrb[53].mxu1 }
 0x7f3   :  { %v3900_v21 = vadd.f32 %v3899_v56, %v3898_v30 }
 0x7f5   :  { %v3901_v47 = vpop.f32.mrb[54].mxu1  ;;  %v2484_v60 = vadd.f32 %v3900_v21, %v2380_v5 }
 0x7f6   :  { %v3902_v42 = vpop.f32.mrb[55].mxu1 }
 0x7f7   :  { %v3903_v28 = vadd.f32 %v3902_v42, %v3901_v47 }
 0x7f9   :  { %v3904_v46 = vpop.f32.mrb[56].mxu1  ;;  %v2489_v41 = vadd.f32 %v3903_v28, %v2385_v10 }
 0x7fa   :  { %v3905_v1 = vpop.f32.mrb[57].mxu1  ;;  %v3951_v13 = vpop.f32.mrb[66].mxu0 }
 0x7fb   :  { %v3906_v15 = vadd.f32 %v3905_v1, %v3904_v46  ;;  %v3952_v43 = vpop.f32.mrb[67].mxu0 }
 0x7fc   :  { %v3953_v20 = vadd.f32 %v3952_v43, %v3951_v13 }
 0x7fd   :  { %v3907_v18 = vpop.f32.mrb[58].mxu1  ;;  %v2494_v19 = vadd.f32 %v3906_v15, %v2390_v48  ;;  %v2410_v15 = vpop.permute.xlu1 %2409 }
 0x7fe   :  { %v3908_v27 = vpop.f32.mrb[59].mxu1  ;;  %v3954_v34 = vpop.f32.mrb[68].mxu0  ;;  %v2584_v38 = vadd.f32 %v3953_v20, %v2479_v29 }
 0x7ff   :  { %v3909_v59 = vadd.f32 %v3908_v27, %v3907_v18  ;;  %v3955_v61 = vpop.f32.mrb[69].mxu0 }
 0x800   :  { %v3956_v63 = vadd.f32 %v3955_v61, %v3954_v34 }
 0x801   :  { %v3910_v37 = vpop.f32.mrb[60].mxu1  ;;  %v2499_v3 = vadd.f32 %v3909_v59, %v2395_v25 }
 0x802   :  { %v3911_v2 = vpop.f32.mrb[61].mxu1  ;;  %v3957_v6 = vpop.f32.mrb[70].mxu0  ;;  %v2589_v45 = vadd.f32 %v3956_v63, %v2484_v60 }
 0x803   :  { %v3912_v14 = vadd.f32 %v3911_v2, %v3910_v37  ;;  %v3958_v12 = vpop.f32.mrb[71].mxu0 }
 0x804   :  { %v3959_v44 = vadd.f32 %v3958_v12, %v3957_v6 }
 0x805   :  { %v3913_v11 = vpop.f32.mrb[62].mxu1  ;;  %v2504_v58 = vadd.f32 %v3912_v14, %v2400_v51 }
 0x806   :  { %v3914_v8 = vpop.f32.mrb[63].mxu1  ;;  %v3960_v50 = vpop.f32.mrb[72].mxu0  ;;  %v2594_v57 = vadd.f32 %v3959_v44, %v2489_v41 }
 0x807   :  { %v3915_v52 = vadd.f32 %v3914_v8, %v3913_v11  ;;  %v3961_v16 = vpop.f32.mrb[73].mxu0 }
 0x808   :  { %v3962_v23 = vadd.f32 %v3961_v16, %v3960_v50 }
 0x809   :  { %v3916_v33 = vpop.f32.mrb[64].mxu1  ;;  %v2509_v42 = vadd.f32 %v3915_v52, %v2405_v9 }
 0x80a   :  { %v3917_v22 = vpop.f32.mrb[65].mxu1  ;;  %v3963_v49 = vpop.f32.mrb[74].mxu0  ;;  %v2599_v24 = vadd.f32 %v3962_v23, %v2494_v19 }
 0x80b   :  { %v3918_v62 = vadd.f32 %v3917_v22, %v3916_v33  ;;  %v3964_v55 = vpop.f32.mrb[75].mxu0 }
 0x80c   :  { %v3965_v4 = vadd.f32 %v3964_v55, %v3963_v49 }
 0x80d   :  { %v2514_v5 = vadd.f32 %v3918_v62, %v2410_v15 }
 0x80e   :  { %v3966_v31 = vpop.f32.mrb[76].mxu0  ;;  %v2604_v32 = vadd.f32 %v3965_v4, %v2499_v3 }
 0x80f   :  { %v4249_v39 = vpop.f32.mrb[66].mxu1  ;;  %v3967_v26 = vpop.f32.mrb[77].mxu0 }
 0x810   :  { %v2694_v35 = vadd.f32 %v4249_v39, %v2589_v45  ;;  %v3968_v36 = vadd.f32 %v3967_v26, %v3966_v31  ;;  %v2688_v7 = vpop.f32.mrb[67].mxu1  ;;  %v3120_v26 = vld [vmem:[%s7004_s12 + $0x8] sm:$0xff] }
 0x811   :  { %v2689_v54 = vadd.f32 %v2688_v7, %v2584_v38  ;;  %3231 = vmatprep.mubr.f32.mxu1 %v3120_v26  ;;  %v3133_v7 = vld [vmem:[%s7005_s13 + $0x10] sm:$0xff] }
 0x812   :  { %v2736_v17 = vmul.f32 0.2, %v2694_v35  ;;  %v3969_v40 = vpop.f32.mrb[78].mxu0  ;;  %v2609_v30 = vadd.f32 %v3968_v36, %v2504_v58  ;;  %vm2728_vm0 = vcmp.gt.f32.partialorder %v2694_v35, 0.0  ;;  %v3132_v58 = vld [vmem:[%s7005_s13 + $0x8] sm:$0xff]  ;;  %v3134_v36 = vld [vmem:[%s7005_s13 + $0x18] sm:$0xff] }
 0x813   :  { %vm2727_vm2 = vcmp.gt.f32.partialorder %v2689_v54, 0.0  ;;  %v2735_v56 = vmul.f32 0.2, %v2689_v54  ;;  %v4252_v21 = vpop.f32.mrb[68].mxu1  ;;  %v3970_v47 = vpop.f32.mrb[79].mxu0 }
 0x814   :  { %v2704_v28 = vadd.f32 %v4252_v21, %v2599_v24  ;;  %v3971_v46 = vadd.f32 %v3970_v47, %v3969_v40  ;;  %v2698_v1 = vpop.f32.mrb[69].mxu1  ;;  %v2744_v43 = vsel %vm2728_vm0, %v2694_v35, %v2736_v17  ;;  %v3131_v35 = vld [vmem:[%s7005_s13] sm:$0xff] }
 0x815   :  { %v2699_v13 = vadd.f32 %v2698_v1, %v2594_v57  ;;  %v2743_v53 = vsel %vm2727_vm2, %v2689_v54, %v2735_v56 }
 0x816   :  { %v2738_v29 = vmul.f32 0.2, %v2704_v28  ;;  %4267 = vmatprep.mubr.msk.f32.mxu0 %vm2755_vm15, %v2743_v53  ;;  %v3972_v20 = vpop.f32.mrb[80].mxu0  ;;  %v2614_v18 = vadd.f32 %v3971_v46, %v2509_v42  ;;  %vm2730_vm3 = vcmp.gt.f32.partialorder %v2704_v28, 0.0 }
 0x817   :  { %vm2729_vm4 = vcmp.gt.f32.partialorder %v2699_v13, 0.0  ;;  %v2737_v27 = vmul.f32 0.2, %v2699_v13  ;;  %v4255_v34 = vpop.f32.mrb[70].mxu1  ;;  %4268 = vmatmul.mubr.msk.f32.vlgmr.msra.gmra.mrb[82].mxu0 %vm2755_vm15, %v2744_v43  ;;  %v3973_v38 = vpop.f32.mrb[81].mxu0 }
 0x818   :  { %v2714_v59 = vadd.f32 %v4255_v34, %v2609_v30  ;;  %v3974_v61 = vadd.f32 %v3973_v38, %v3972_v20  ;;  %v2708_v60 = vpop.f32.mrb[71].mxu1  ;;  %v2746_v45 = vsel %vm2730_vm3, %v2704_v28, %v2738_v29 }
 0x819   :  { %v2709_v63 = vadd.f32 %v2708_v60, %v2604_v32  ;;  %v2745_v37 = vsel %vm2729_vm4, %v2699_v13, %v2737_v27 }
 0x81a   :  { %v2740_v2 = vmul.f32 0.2, %v2714_v59  ;;  %4270 = vmatprep.mubr.msk.f32.mxu0 %vm2755_vm15, %v2745_v37  ;;  %v2619_v6 = vadd.f32 %v3974_v61, %v2514_v5  ;;  %vm2732_vm5 = vcmp.gt.f32.partialorder %v2714_v59, 0.0 }
 0x81b   :  { %vm2731_vm6 = vcmp.gt.f32.partialorder %v2709_v63, 0.0  ;;  %v2739_v10 = vmul.f32 0.2, %v2709_v63  ;;  %v4258_v14 = vpop.f32.mrb[72].mxu1  ;;  %4271 = vmatmul.mubr.msk.f32.gmra.mrb[84].mxu0 %vm2755_vm15, %v2746_v45 }
 0x81c   :  { %v2724_v12 = vadd.f32 %v4258_v14, %v2619_v6  ;;  %v2718_v41 = vpop.f32.mrb[73].mxu1  ;;  %v2748_v50 = vsel %vm2732_vm5, %v2714_v59, %v2740_v2 }
 0x81d   :  { %v2719_v44 = vadd.f32 %v2718_v41, %v2614_v18  ;;  %v2747_v11 = vsel %vm2731_vm6, %v2709_v63, %v2739_v10 }
 0x81e   :  { %vm2734_vm9 = vcmp.gt.f32.partialorder %v2724_v12, 0.0  ;;  %v2742_v8 = vmul.f32 0.2, %v2724_v12  ;;  %4273 = vmatprep.mubr.msk.f32.mxu0 %vm2755_vm15, %v2747_v11 }
 0x81f   :  { %vm2733_vm10 = vcmp.gt.f32.partialorder %v2719_v44, 0.0  ;;  %v2741_v57 = vmul.f32 0.2, %v2719_v44  ;;  %4274 = vmatmul.mubr.msk.f32.gmra.mrb[86].mxu0 %vm2755_vm15, %v2748_v50 }
 0x820   :  { %v2750_v48 = vsel %vm2734_vm9, %v2724_v12, %v2742_v8 }
 0x821   :  { %v2749_v52 = vsel %vm2733_vm10, %v2719_v44, %v2741_v57 }
 0x822   :  { %4276 = vmatprep.mubr.msk.f32.mxu0 %vm2755_vm15, %v2749_v52 }
 0x823   :  { %4277 = vmatmul.mubr.msk.f32.gmra.mrb[88].mxu0 %vm2755_vm15, %v2750_v48 }
 0x8ea   :  { %v4269_v16 = vpop.f32.mrb[82].mxu0 }
 0x8eb   :  { %v2846_v19 = vpop.f32.mrb[83].mxu0 }
 0x8ec   :  { %v5299_v23 = vpack.i.bf16 %v4269_v16, %v2846_v19  ;;  %v4529_v33 = vpack.c.bf16 %v4269_v16, %v2846_v19 }
 0x8ee   :  { %5300 = vrot.lane.b32.xlu1 %v5299_v23, %s5763_s11  ;;  %5295 = vrot.lane.b32.xlu0 %v5299_v23, %s5753_s21  ;;  %v6762_v22 = vpop.f32.mrb[84].mxu0 }
 0x8ef   :  { %4530 = vmatprep.subr.bf16.mxu1 %v4529_v33  ;;  %v6764_v49 = vpop.f32.mrb[85].mxu0 }
 0x8f0   :  { %v5329_v24 = vpack.i.bf16 %v6762_v22, %v6764_v49  ;;  %v4533_v62 = vpack.c.bf16 %v6762_v22, %v6764_v49 }
 0x8f2   :  { %5310 = vrot.lane.b32.xlu1 %v5299_v23, %s5754_s23  ;;  %5305 = vrot.lane.b32.xlu0 %v5299_v23, %s5764_s1  ;;  %v6770_v25 = vpop.f32.mrb[86].mxu0 }
 0x8f3   :  { %v6774_v55 = vpop.f32.mrb[87].mxu0 }
 0x8f4   :  { %v5359_v3 = vpack.i.bf16 %v6770_v25, %v6774_v55  ;;  %v4537_v51 = vpack.c.bf16 %v6770_v25, %v6774_v55 }
 0x8f6   :  { %5320 = vrot.lane.b32.xlu1 %v5299_v23, %s5765_s26  ;;  %5315 = vrot.lane.b32.xlu0 %v5299_v23, %s5751_s0  ;;  %v6780_v4 = vpop.f32.mrb[88].mxu0 }
 0x8f7   :  { %v6784_v31 = vpop.f32.mrb[89].mxu0 }
 0x8f8   :  { %v5374_v32 = vpack.i.bf16 %v6780_v4, %v6784_v31  ;;  %v4541_v39 = vpack.c.bf16 %v6780_v4, %v6784_v31 }
 0x8fa   :  { %5330 = vrot.lane.b32.xlu1 %v5329_v24, %s5763_s11  ;;  %5325 = vrot.lane.b32.xlu0 %v5329_v24, %s5753_s21 }
 0x8fe   :  { %5340 = vrot.lane.b32.xlu1 %v5329_v24, %s5754_s23  ;;  %5335 = vrot.lane.b32.xlu0 %v5329_v24, %s5764_s1 }
 0x902   :  { %5350 = vrot.lane.b32.xlu1 %v5329_v24, %s5765_s26  ;;  %5345 = vrot.lane.b32.xlu0 %v5329_v24, %s5751_s0 }
 0x906   :  { %5360 = vrot.lane.b32.xlu1 %v5359_v3, %s5763_s11  ;;  %5355 = vrot.lane.b32.xlu0 %v5359_v3, %s5753_s21 }
 0x90a   :  { %5375 = vrot.lane.b32.xlu1 %v5374_v32, %s5763_s11  ;;  %5365 = vrot.lane.b32.xlu0 %v5374_v32, %s5753_s21 }
 0x90e   :  { %5380 = vrot.lane.b32.xlu1 %v5359_v3, %s5754_s23  ;;  %5370 = vrot.lane.b32.xlu0 %v5359_v3, %s5764_s1 }
 0x912   :  { %5390 = vrot.lane.b32.xlu1 %v5359_v3, %s5765_s26  ;;  %5385 = vrot.lane.b32.xlu0 %v5359_v3, %s5751_s0 }
 0x916   :  { %5400 = vrot.lane.b32.xlu1 %v5374_v32, %s5754_s23  ;;  %5395 = vrot.lane.b32.xlu0 %v5374_v32, %s5764_s1 }
 0x91a   :  { %5415 = vrot.lane.b32.xlu1 %v5374_v32, %s5765_s26  ;;  %5405 = vrot.lane.b32.xlu0 %v5374_v32, %s5751_s0 }
 0x91e   :  { %5420 = vrot.lane.b32.xlu1 %v5299_v23, %s5756_s2  ;;  %5410 = vrot.lane.b32.xlu0 %v5299_v23, %s5766_s17 }
 0x922   :  { %5430 = vrot.lane.b32.xlu1 %v5329_v24, %s5756_s2  ;;  %5425 = vrot.lane.b32.xlu0 %v5329_v24, %s5766_s17 }
 0x926   :  { %5440 = vrot.lane.b32.xlu1 %v5359_v3, %s5756_s2  ;;  %5435 = vrot.lane.b32.xlu0 %v5359_v3, %s5766_s17 }
 0x92a   :  { %5450 = vrot.lane.b32.xlu1 %v5374_v32, %s5756_s2  ;;  %5445 = vrot.lane.b32.xlu0 %v5374_v32, %s5766_s17 }
 0x92e   :  { %3142 = vperm.xlu1 %4972, %v3132_v58   ;;  %3137 = vperm.xlu0 %4973, %v3131_v35  }
 0x932   :  { %3152 = vperm.xlu1 %4972, %v3134_v36   ;;  %3147 = vperm.xlu0 %4973, %v3133_v7  }
 0x960   :  { %v5301_v54 = vpop.permute.xlu1 %5300  ;;  %v5296_v9 = vpop.permute.xlu0 %5295 }
 0x961   :  { %v5303_v17 = vunpack.i.h.bf16 %v5301_v54  ;;  %v5302_v40 = vunpack.i.l.bf16 %v5301_v54  ;;  %v5298_v30 = vunpack.i.h.bf16 %v5296_v9  ;;  %v5297_v56 = vunpack.i.l.bf16 %v5296_v9 }
 0x963   :  { %v2943_v21 = vsel %vm2941_vm12, %v5298_v30, %v5303_v17  ;;  %v2942_v47 = vsel %vm2941_vm12, %v5297_v56, %v5302_v40 }
 0x964   :  { %v4531_v42 = vpack.c.bf16 %v2943_v21, %v2942_v47  ;;  %v5311_v28 = vpop.permute.xlu1 %5310  ;;  %v5306_v46 = vpop.permute.xlu0 %5305 }
 0x965   :  { %v5313_v61 = vunpack.i.h.bf16 %v5311_v28  ;;  %v5312_v60 = vunpack.i.l.bf16 %v5311_v28  ;;  %v5308_v63 = vunpack.i.h.bf16 %v5306_v46  ;;  %v5307_v37 = vunpack.i.l.bf16 %v5306_v46 }
 0x966   :  { %4532 = vmatpush3.bf16.msra.mxu1 %v4531_v42 }
 0x967   :  { %4534 = vmatprep.subr.bf16.mxu1 %v4533_v62  ;;  %v3055_v41 = vsel %vm873_vm7, %v5307_v37, %v5312_v60  ;;  %v3056_v44 = vsel %vm873_vm7, %v5308_v63, %v5313_v61 }
 0x968   :  { %v5321_v1 = vpop.permute.xlu1 %5320  ;;  %v5316_v13 = vpop.permute.xlu0 %5315  ;;  %v4545_v35 = vpack.c.bf16 %v3056_v44, %v3055_v41 }
 0x969   :  { %v5323_v45 = vunpack.i.h.bf16 %v5321_v1  ;;  %v5322_v10 = vunpack.i.l.bf16 %v5321_v1  ;;  %v5318_v48 = vunpack.i.h.bf16 %v5316_v13  ;;  %v5317_v52 = vunpack.i.l.bf16 %v5316_v13 }
 0x96b   :  { %v3000_v26 = vsel %vm2998_vm13, %v5318_v48, %v5323_v45  ;;  %v2999_v58 = vsel %vm2998_vm13, %v5317_v52, %v5322_v10 }
 0x96c   :  { %v5331_v53 = vpop.permute.xlu1 %5330  ;;  %v5326_v15 = vpop.permute.xlu0 %5325 }
 0x96d   :  { %v5333_v43 = vunpack.i.h.bf16 %v5331_v53  ;;  %v5332_v29 = vunpack.i.l.bf16 %v5331_v53  ;;  %v5328_v20 = vunpack.i.h.bf16 %v5326_v15  ;;  %v5327_v18 = vunpack.i.l.bf16 %v5326_v15 }
 0x96e   :  { %v4547_v53 = vpack.c.bf16 %v3000_v26, %v2999_v58 }
 0x96f   :  { %v2945_v27 = vsel %vm2941_vm12, %v5328_v20, %v5333_v43  ;;  %v2944_v34 = vsel %vm2941_vm12, %v5327_v18, %v5332_v29 }
 0x970   :  { %v4535_v38 = vpack.c.bf16 %v2945_v27, %v2944_v34  ;;  %v5341_v5 = vpop.permute.xlu1 %5340  ;;  %v5336_v59 = vpop.permute.xlu0 %5335 }
 0x971   :  { %v5342_v16 = vunpack.i.l.bf16 %v5341_v5  ;;  %v5337_v19 = vunpack.i.l.bf16 %v5336_v59  ;;  %v5343_v23 = vunpack.i.h.bf16 %v5341_v5  ;;  %v5338_v33 = vunpack.i.h.bf16 %v5336_v59 }
 0x972   :  { %4536 = vmatpush3.bf16.msra.mxu1 %v4535_v38 }
 0x973   :  { %4538 = vmatprep.subr.bf16.mxu1 %v4537_v51  ;;  %v3057_v36 = vsel %vm873_vm7, %v5337_v19, %v5342_v16  ;;  %v3058_v17 = vsel %vm873_vm7, %v5338_v33, %v5343_v23 }
 0x974   :  { %v5351_v2 = vpop.permute.xlu1 %5350  ;;  %v5346_v6 = vpop.permute.xlu0 %5345  ;;  %v4549_v15 = vpack.c.bf16 %v3058_v17, %v3057_v36  ;;  %v3122_v17 = vld [vmem:[%s7004_s12 + $0x18] sm:$0xff] }
 0x975   :  { %v5353_v7 = vunpack.i.h.bf16 %v5351_v2  ;;  %v5352_v40 = vunpack.i.l.bf16 %v5351_v2  ;;  %v5348_v30 = vunpack.i.h.bf16 %v5346_v6  ;;  %v5347_v56 = vunpack.i.l.bf16 %v5346_v6 }
 0x977   :  { %v3002_v43 = vsel %vm2998_vm13, %v5348_v30, %v5353_v7  ;;  %v3001_v4 = vsel %vm2998_vm13, %v5347_v56, %v5352_v40  ;;  %v3126_v56 = vld [vmem:[%s7004_s12 + $0x38] sm:$0xff] }
 0x978   :  { %v5361_v14 = vpop.permute.xlu1 %5360  ;;  %v5356_v12 = vpop.permute.xlu0 %5355  ;;  %v4551_v5 = vpack.c.bf16 %v3002_v43, %v3001_v4  ;;  %v3129_v4 = vld [vmem:[%s7004_s12 + $0x50] sm:$0xff] }
 0x979   :  { %v5363_v11 = vunpack.i.h.bf16 %v5361_v14  ;;  %v5362_v8 = vunpack.i.l.bf16 %v5361_v14  ;;  %v5358_v50 = vunpack.i.h.bf16 %v5356_v12  ;;  %v5357_v57 = vunpack.i.l.bf16 %v5356_v12 }
 0x97b   :  { %v2947_v22 = vsel %vm2941_vm12, %v5358_v50, %v5363_v11  ;;  %v2946_v49 = vsel %vm2941_vm12, %v5357_v57, %v5362_v8 }
 0x97c   :  { %v4539_v24 = vpack.c.bf16 %v2947_v22, %v2946_v49  ;;  %v5376_v25 = vpop.permute.xlu1 %5375  ;;  %v5366_v62 = vpop.permute.xlu0 %5365 }
 0x97d   :  { %v5378_v55 = vunpack.i.h.bf16 %v5376_v25  ;;  %v5377_v3 = vunpack.i.l.bf16 %v5376_v25  ;;  %v5368_v51 = vunpack.i.h.bf16 %v5366_v62  ;;  %v5367_v32 = vunpack.i.l.bf16 %v5366_v62 }
 0x97e   :  { %4540 = vmatpush3.bf16.msra.mxu1 %v4539_v24 }
 0x97f   :  { %v2949_v54 = vsel %vm2941_vm12, %v5368_v51, %v5378_v55  ;;  %v2948_v9 = vsel %vm2941_vm12, %v5367_v32, %v5377_v3  ;;  %4542 = vmatprep.subr.bf16.mxu1 %v4541_v39  ;;  %v3119_v55 = vld [vmem:[%s7004_s12] sm:$0xff] }
 0x980   :  { %v4543_v21 = vpack.c.bf16 %v2949_v54, %v2948_v9  ;;  %v5381_v47 = vpop.permute.xlu1 %5380  ;;  %v5371_v42 = vpop.permute.xlu0 %5370  ;;  %v3123_v32 = vld [vmem:[%s7004_s12 + $0x20] sm:$0xff] }
 0x981   :  { %v5383_v28 = vunpack.i.h.bf16 %v5381_v47  ;;  %v5382_v46 = vunpack.i.l.bf16 %v5381_v47  ;;  %v5373_v1 = vunpack.i.h.bf16 %v5371_v42  ;;  %v5372_v13 = vunpack.i.l.bf16 %v5371_v42 }
 0x982   :  { %4544 = vmatpush3.bf16.msra.mxu1 %v4543_v21 }
 0x983   :  { %4546 = vmatprep.subr.bf16.mxu1 %v4545_v35  ;;  %v3059_v29 = vsel %vm873_vm7, %v5372_v13, %v5382_v46  ;;  %v3060_v20 = vsel %vm873_vm7, %v5373_v1, %v5383_v28 }
 0x984   :  { %v5391_v31 = vpop.permute.xlu1 %5390  ;;  %v5386_v39 = vpop.permute.xlu0 %5385  ;;  %v4553_v37 = vpack.c.bf16 %v3060_v20, %v3059_v29 }
 0x985   :  { %v5393_v18 = vunpack.i.h.bf16 %v5391_v31  ;;  %v5392_v27 = vunpack.i.l.bf16 %v5391_v31  ;;  %v5388_v34 = vunpack.i.h.bf16 %v5386_v39  ;;  %v5387_v38 = vunpack.i.l.bf16 %v5386_v39 }
 0x986   :  { %4548 = vmatpush3.bf16.msra.mxu1 %v4547_v53  ;;  %v3125_v53 = vld [vmem:[%s7004_s12 + $0x30] sm:$0xff] }
 0x987   :  { %4550 = vmatprep.subr.bf16.mxu1 %v4549_v15  ;;  %v3004_v59 = vsel %vm2998_vm13, %v5388_v34, %v5393_v18  ;;  %v3003_v61 = vsel %vm2998_vm13, %v5387_v38, %v5392_v27  ;;  %v3128_v38 = vld [vmem:[%s7004_s12 + $0x48] sm:$0xff] }
 0x988   :  { %v5401_v60 = vpop.permute.xlu1 %5400  ;;  %v5396_v63 = vpop.permute.xlu0 %5395  ;;  %v4555_v41 = vpack.c.bf16 %v3004_v59, %v3003_v61  ;;  %v3121_v61 = vld [vmem:[%s7004_s12 + $0x10] sm:$0xff] }
 0x989   :  { %v5403_v2 = vunpack.i.h.bf16 %v5401_v60  ;;  %v5402_v6 = vunpack.i.l.bf16 %v5401_v60  ;;  %v5398_v45 = vunpack.i.h.bf16 %v5396_v63  ;;  %v5397_v10 = vunpack.i.l.bf16 %v5396_v63  ;;  %v3124_v63 = vld [vmem:[%s7004_s12 + $0x28] sm:$0xff] }
 0x98a   :  { %4552 = vmatpush3.bf16.msra.mxu1 %v4551_v5 }
 0x98b   :  { %4554 = vmatprep.subr.bf16.mxu1 %v4553_v37  ;;  %v3061_v14 = vsel %vm873_vm7, %v5397_v10, %v5402_v6  ;;  %v3062_v12 = vsel %vm873_vm7, %v5398_v45, %v5403_v2  ;;  %v3127_v37 = vld [vmem:[%s7004_s12 + $0x40] sm:$0xff]  ;;  %v3130_v2 = vld [vmem:[%s7004_s12 + $0x58] sm:$0xff] }
 0x98c   :  { %v5416_v44 = vpop.permute.xlu1 %5415  ;;  %v5406_v11 = vpop.permute.xlu0 %5405  ;;  %v4557_v8 = vpack.c.bf16 %v3062_v12, %v3061_v14 }
 0x98d   :  { %v5418_v50 = vunpack.i.h.bf16 %v5416_v44  ;;  %v5417_v57 = vunpack.i.l.bf16 %v5416_v44  ;;  %v5408_v48 = vunpack.i.h.bf16 %v5406_v11  ;;  %v5407_v52 = vunpack.i.l.bf16 %v5406_v11 }
 0x98e   :  { %4556 = vmatpush3.bf16.msra.mxu1 %v4555_v41 }
 0x98f   :  { %v3006_v16 = vsel %vm2998_vm13, %v5408_v48, %v5418_v50  ;;  %v3005_v19 = vsel %vm2998_vm13, %v5407_v52, %v5417_v57  ;;  %4558 = vmatprep.subr.bf16.mxu1 %v4557_v8 }
 0x990   :  { %v4559_v23 = vpack.c.bf16 %v3006_v16, %v3005_v19  ;;  %v5421_v33 = vpop.permute.xlu1 %5420  ;;  %v5411_v22 = vpop.permute.xlu0 %5410 }
 0x991   :  { %v5423_v49 = vunpack.i.h.bf16 %v5421_v33  ;;  %v5422_v24 = vunpack.i.l.bf16 %v5421_v33  ;;  %v5413_v25 = vunpack.i.h.bf16 %v5411_v22  ;;  %v5412_v62 = vunpack.i.l.bf16 %v5411_v22 }
 0x992   :  { %4560 = vmatpush3.bf16.msra.mxu1 %v4559_v23 }
 0x993   :  { %v3111_v3 = vsel %vm986_vm8, %v5412_v62, %v5422_v24  ;;  %v3112_v51 = vsel %vm986_vm8, %v5413_v25, %v5423_v49 }
 0x994   :  { %v5431_v26 = vpop.permute.xlu1 %5430  ;;  %v5426_v58 = vpop.permute.xlu0 %5425  ;;  %v4561_v35 = vpack.c.bf16 %v3112_v51, %v3111_v3 }
 0x995   :  { %v5433_v36 = vunpack.i.h.bf16 %v5431_v26  ;;  %v5432_v7 = vunpack.i.l.bf16 %v5431_v26  ;;  %v5428_v54 = vunpack.i.h.bf16 %v5426_v58  ;;  %v5427_v9 = vunpack.i.l.bf16 %v5426_v58  ;;  %3232 = vmatmul.mubr.f32.vlgmr.msra.gmra.mrb[74].mxu1 %v3119_v55 }
 0x996   :  { %4562 = vmatprep.subr.bf16.mxu1 %v4561_v35  ;;  %3236 = vmatprep.mubr.f32.mxu1 %v3123_v32 }
 0x997   :  { %4564 = vmatpush3.bf16.msra.mxu1 %v4561_v35  ;;  %v3113_v40 = vsel %vm986_vm8, %v5427_v9, %v5432_v7  ;;  %v3114_v30 = vsel %vm986_vm8, %v5428_v54, %v5433_v36 }
 0x998   :  { %v5441_v21 = vpop.permute.xlu1 %5440  ;;  %v5436_v47 = vpop.permute.xlu0 %5435  ;;  %v4565_v42 = vpack.c.bf16 %v3114_v30, %v3113_v40 }
 0x999   :  { %v5443_v28 = vunpack.i.h.bf16 %v5441_v21  ;;  %v5442_v46 = vunpack.i.l.bf16 %v5441_v21  ;;  %v5438_v1 = vunpack.i.h.bf16 %v5436_v47  ;;  %v5437_v13 = vunpack.i.l.bf16 %v5436_v47  ;;  %3237 = vmatmul.mubr.f32.gmra.mrb[76].mxu1 %v3122_v17 }
 0x99a   :  { %4566 = vmatprep.subr.bf16.mxu1 %v4565_v42  ;;  %3241 = vmatprep.mubr.f32.mxu1 %v3126_v56 }
 0x99b   :  { %4568 = vmatpush3.bf16.msra.mxu1 %v4565_v42  ;;  %v3115_v15 = vsel %vm986_vm8, %v5437_v13, %v5442_v46  ;;  %v3116_v43 = vsel %vm986_vm8, %v5438_v1, %v5443_v28  ;;  %v3466_v28 = vld [vmem:[%s7006_s14 + $0x8] sm:$0xff]  ;;  %v3467_v46 = vld [vmem:[%s7007_s15] sm:$0xff] }
 0x99c   :  { %v5451_v31 = vpop.permute.xlu1 %5450  ;;  %v5446_v39 = vpop.permute.xlu0 %5445  ;;  %v4569_v29 = vpack.c.bf16 %v3116_v43, %v3115_v15  ;;  %3617 = vmatprep.mubr.msk.f32.mxu0 %vm2755_vm15, %v3466_v28 }
 0x99d   :  { %v5453_v20 = vunpack.i.h.bf16 %v5451_v31  ;;  %v5452_v18 = vunpack.i.l.bf16 %v5451_v31  ;;  %v5448_v27 = vunpack.i.h.bf16 %v5446_v39  ;;  %v5447_v34 = vunpack.i.l.bf16 %v5446_v39  ;;  %3242 = vmatmul.mubr.f32.gmra.mrb[78].mxu1 %v3125_v53 }
 0x99e   :  { %4570 = vmatprep.subr.bf16.mxu1 %v4569_v29  ;;  %3246 = vmatprep.mubr.f32.mxu1 %v3129_v4 }
 0x99f   :  { %4572 = vmatpush3.bf16.msra.mxu1 %v4569_v29  ;;  %v3117_v5 = vsel %vm986_vm8, %v5447_v34, %v5452_v18  ;;  %v3118_v59 = vsel %vm986_vm8, %v5448_v27, %v5453_v20 }
 0x9a0   :  { %v4573_v60 = vpack.c.bf16 %v3118_v59, %v3117_v5 }
 0x9a1   :  { %3247 = vmatmul.mubr.f32.gmra.mrb[80].mxu1 %v3128_v38 }
 0x9a2   :  { %4574 = vmatprep.subr.bf16.mxu1 %v4573_v60  ;;  %4295 = vmatprep.mubr.msk.f32.mxu1 %vm157_vm1, %v3121_v61 }
 0x9a3   :  { %4576 = vmatpush3.bf16.msra.mxu1 %v4573_v60 }
 0x9a6   :  { %4296 = vmatmul.mubr.msk.f32.vlgmr.msra.gmra.mrb[82].mxu1 %vm157_vm1, %v3124_v63 }
 0x9a7   :  { %4298 = vmatprep.mubr.msk.f32.mxu1 %vm157_vm1, %v3127_v37 }
 0x9aa   :  { %4299 = vmatmul.mubr.msk.f32.gmra.mrb[84].mxu1 %vm157_vm1, %v3130_v2 }
 0x9ad   :  { %v3143_v57 = vpop.permute.xlu1 %3142  ;;  %v3138_v52 = vpop.permute.xlu0 %3137 }
 0x9b1   :  { %v3153_v24 = vpop.permute.xlu1 %3152  ;;  %v3148_v62 = vpop.permute.xlu0 %3147 }
 0xa68   :  { %v4043_v6 = vpop.f32.mrb[74].mxu1 }
 0xa69   :  { %v4044_v45 = vpop.f32.mrb[75].mxu1 }
 0xa6a   :  { %v4045_v10 = vadd.f32 %v4044_v45, %v4043_v6 }
 0xa6c   :  { %v4046_v14 = vpop.f32.mrb[76].mxu1  ;;  %v3234_v33 = vadd.f32 %v4045_v10, %v3138_v52 }
 0xa6d   :  { %v4047_v12 = vpop.f32.mrb[77].mxu1 }
 0xa6e   :  { %v4048_v41 = vadd.f32 %v4047_v12, %v4046_v14 }
 0xa70   :  { %v4049_v44 = vpop.f32.mrb[78].mxu1  ;;  %v3239_v19 = vadd.f32 %v4048_v41, %v3143_v57 }
 0xa71   :  { %v4050_v11 = vpop.f32.mrb[79].mxu1 }
 0xa72   :  { %v4051_v8 = vadd.f32 %v4050_v11, %v4049_v44 }
 0xa74   :  { %v4052_v50 = vpop.f32.mrb[80].mxu1  ;;  %v3244_v26 = vadd.f32 %v4051_v8, %v3148_v62 }
 0xa75   :  { %v4053_v48 = vpop.f32.mrb[81].mxu1 }
 0xa76   :  { %v4054_v16 = vadd.f32 %v4053_v48, %v4052_v50 }
 0xa78   :  { %v3249_v3 = vadd.f32 %v4054_v16, %v3153_v24 }
 0xa79   :  { %v4297_v23 = vpop.f32.mrb[82].mxu1 }
 0xa7a   :  { %v3324_v22 = vadd.f32 %v4297_v23, %v3239_v19  ;;  %v3318_v49 = vpop.f32.mrb[83].mxu1 }
 0xa7b   :  { %v3319_v25 = vadd.f32 %v3318_v49, %v3234_v33 }
 0xa7c   :  { %vm3338_vm11 = vcmp.gt.f32.partialorder %v3324_v22, 0.0  ;;  %v3342_v55 = vmul.f32 0.2, %v3324_v22 }
 0xa7d   :  { %vm3337_vm14 = vcmp.gt.f32.partialorder %v3319_v25, 0.0  ;;  %v3341_v51 = vmul.f32 0.2, %v3319_v25  ;;  %v4300_v32 = vpop.f32.mrb[84].mxu1 }
 0xa7e   :  { %v6906_v58 = vsel %vm3338_vm11, %v3324_v22, %v3342_v55  ;;  %v3334_v35 = vadd.f32 %v4300_v32, %v3249_v3  ;;  %v3328_v36 = vpop.f32.mrb[85].mxu1 }
 0xa7f   :  { %v6908_v7 = vsel %vm3337_vm14, %v3319_v25, %v3341_v51  ;;  %v3329_v54 = vadd.f32 %v3328_v36, %v3244_v26 }
 0xa80   :  { %vm3340_vm0 = vcmp.gt.f32.partialorder %v3334_v35, 0.0  ;;  %v3344_v9 = vmul.f32 0.2, %v3334_v35  ;;  %v5459_v17 = vpack.i.bf16 %v6906_v58, %v6908_v7  ;;  %v4590_v21 = vpack.c.bf16 %v6906_v58, %v6908_v7 }
 0xa81   :  { %vm3339_vm2 = vcmp.gt.f32.partialorder %v3329_v54, 0.0  ;;  %v3343_v40 = vmul.f32 0.2, %v3329_v54 }
 0xa82   :  { %v6912_v30 = vsel %vm3340_vm0, %v3334_v35, %v3344_v9  ;;  %5460 = vrot.lane.b32.xlu1 %v5459_v17, %s5763_s11  ;;  %5455 = vrot.lane.b32.xlu0 %v5459_v17, %s5753_s21 }
 0xa83   :  { %v6916_v56 = vsel %vm3339_vm2, %v3329_v54, %v3343_v40 }
 0xa84   :  { %v5474_v47 = vpack.i.bf16 %v6912_v30, %v6916_v56  ;;  %v4593_v42 = vpack.c.bf16 %v6912_v30, %v6916_v56 }
 0xa86   :  { %5475 = vrot.lane.b32.xlu1 %v5474_v47, %s5763_s11  ;;  %5465 = vrot.lane.b32.xlu0 %v5474_v47, %s5753_s21 }
 0xa8a   :  { %5480 = vrot.lane.b32.xlu1 %v5459_v17, %s5765_s26  ;;  %5470 = vrot.lane.b32.xlu0 %v5459_v17, %s5751_s0 }
 0xa8e   :  { %5490 = vrot.lane.b32.xlu1 %v5474_v47, %s5765_s26  ;;  %5485 = vrot.lane.b32.xlu0 %v5474_v47, %s5751_s0 }
 0xa92   :  { %5500 = vrot.lane.b32.xlu1 %v5459_v17, %s5754_s23  ;;  %5495 = vrot.lane.b32.xlu0 %v5459_v17, %s5764_s1 }
 0xa96   :  { %5515 = vrot.lane.b32.xlu1 %v5474_v47, %s5754_s23  ;;  %5505 = vrot.lane.b32.xlu0 %v5474_v47, %s5764_s1 }
 0xa9a   :  { %5520 = vrot.lane.b32.xlu1 %v5459_v17, %s5756_s2  ;;  %5510 = vrot.lane.b32.xlu0 %v5459_v17, %s5766_s17 }
 0xa9e   :  { %5530 = vrot.lane.b32.xlu1 %v5474_v47, %s5756_s2  ;;  %5525 = vrot.lane.b32.xlu0 %v5474_v47, %s5766_s17  ;;  %s5767_s2 = smov [#allocation14]  }
 0xa9f   :  { %s3557_s1 = sshll.u32 %s5767_s2, 4  ;;  %s3558_s1 = int_to_ptr.vmem [resolvable:$true] %s3557_s1 }
 0xaa0   :  { %s5691_s26 = scalar_lea.vmem %s3558_s1, 128  ;;  %p5696_p1 = scmp.lt.s32.totalorder %s3558_s1, %s3558_s1 }
 0xaa1   :  { %p5692_p0 = scmp.ne.s32.totalorder %s3558_s1, %s5691_s26  ;;  %p5697_p2 = scmp.lt.s32.totalorder %s5691_s26, %s5691_s26 }
 0xaa2   :  { %3470 = vperm.xlu0 %4973, %v3467_v46  }
 0xaa3   :  { %p5698_p3 = por %p5697_p2, %p5696_p1 }
 0xaa5   :  { %p5699_p4 = pnand %p5698_p3, %p5692_p0 }
 0xaf4   :  { %v5461_v1 = vpop.permute.xlu1 %5460  ;;  %v5456_v13 = vpop.permute.xlu0 %5455 }
 0xaf5   :  { %v5463_v53 = vunpack.i.h.bf16 %v5461_v1  ;;  %v5462_v15 = vunpack.i.l.bf16 %v5461_v1  ;;  %v5458_v43 = vunpack.i.h.bf16 %v5456_v13  ;;  %v5457_v4 = vunpack.i.l.bf16 %v5456_v13 }
 0xaf7   :  { %v3378_v31 = vsel %vm2941_vm12, %v5458_v43, %v5463_v53  ;;  %v3377_v39 = vsel %vm2941_vm12, %v5457_v4, %v5462_v15 }
 0xaf8   :  { %v4578_v29 = vpack.c.bf16 %v3378_v31, %v3377_v39  ;;  %v5476_v20 = vpop.permute.xlu1 %5475  ;;  %v5466_v18 = vpop.permute.xlu0 %5465 }
 0xaf9   :  { %v5478_v27 = vunpack.i.h.bf16 %v5476_v20  ;;  %v5477_v34 = vunpack.i.l.bf16 %v5476_v20  ;;  %v5468_v38 = vunpack.i.h.bf16 %v5466_v18  ;;  %v5467_v5 = vunpack.i.l.bf16 %v5466_v18  ;;  %v3465_v20 = vld [vmem:[%s7006_s14] sm:$0xff] }
 0xafa   :  { %4579 = vmatpush1.bf16.msra.mxu0 %v4578_v29 }
 0xafb   :  { %v3380_v59 = vsel %vm2941_vm12, %v5468_v38, %v5478_v27  ;;  %v3379_v61 = vsel %vm2941_vm12, %v5467_v5, %v5477_v34  ;;  %4580 = vmatprep.subr.bf16.mxu0 %v5734_v0  ;;  %v5536_v5 = vld [vmem:[#allocation2] sm:$0xff] }
 0xafc   :  { %v4581_v60 = vpack.c.bf16 %v3380_v59, %v3379_v61  ;;  %v5481_v63 = vpop.permute.xlu1 %5480  ;;  %v5471_v37 = vpop.permute.xlu0 %5470 }
 0xafd   :  { %v5483_v2 = vunpack.i.h.bf16 %v5481_v63  ;;  %v5482_v6 = vunpack.i.l.bf16 %v5481_v63  ;;  %v5473_v45 = vunpack.i.h.bf16 %v5471_v37  ;;  %v5472_v10 = vunpack.i.l.bf16 %v5471_v37 }
 0xafe   :  { %4582 = vmatpush1.bf16.msra.mxu0 %v4581_v60 }
 0xaff   :  { %v3406_v14 = vsel %vm2998_vm13, %v5473_v45, %v5483_v2  ;;  %v3405_v12 = vsel %vm2998_vm13, %v5472_v10, %v5482_v6  ;;  %4583 = vmatprep.subr.bf16.mxu0 %v5734_v0 }
 0xb00   :  { %v4584_v41 = vpack.c.bf16 %v3406_v14, %v3405_v12  ;;  %v5491_v44 = vpop.permute.xlu1 %5490  ;;  %v5486_v11 = vpop.permute.xlu0 %5485 }
 0xb01   :  { %v5493_v8 = vunpack.i.h.bf16 %v5491_v44  ;;  %v5492_v50 = vunpack.i.l.bf16 %v5491_v44  ;;  %v5488_v57 = vunpack.i.h.bf16 %v5486_v11  ;;  %v5487_v48 = vunpack.i.l.bf16 %v5486_v11 }
 0xb02   :  { %4585 = vmatpush1.bf16.msra.mxu0 %v4584_v41 }
 0xb03   :  { %v3408_v52 = vsel %vm2998_vm13, %v5488_v57, %v5493_v8  ;;  %v3407_v16 = vsel %vm2998_vm13, %v5487_v48, %v5492_v50  ;;  %4586 = vmatprep.subr.bf16.mxu0 %v5734_v0 }
 0xb04   :  { %v4587_v19 = vpack.c.bf16 %v3408_v52, %v3407_v16  ;;  %v5501_v23 = vpop.permute.xlu1 %5500  ;;  %v5496_v33 = vpop.permute.xlu0 %5495 }
 0xb05   :  { %v5503_v22 = vunpack.i.h.bf16 %v5501_v23  ;;  %v5502_v49 = vunpack.i.l.bf16 %v5501_v23  ;;  %v5498_v24 = vunpack.i.h.bf16 %v5496_v33  ;;  %v5497_v25 = vunpack.i.l.bf16 %v5496_v33 }
 0xb06   :  { %4588 = vmatpush1.bf16.msra.mxu0 %v4587_v19 }
 0xb07   :  { %4589 = vmatprep.subr.bf16.mxu0 %v5734_v0  ;;  %v3434_v3 = vsel %vm873_vm7, %v5498_v24, %v5503_v22  ;;  %v3433_v51 = vsel %vm873_vm7, %v5497_v25, %v5502_v49 }
 0xb08   :  { %v5516_v62 = vpop.permute.xlu1 %5515  ;;  %v5506_v55 = vpop.permute.xlu0 %5505  ;;  %v4596_v17 = vpack.c.bf16 %v3434_v3, %v3433_v51 }
 0xb09   :  { %v5518_v35 = vunpack.i.h.bf16 %v5516_v62  ;;  %v5517_v36 = vunpack.i.l.bf16 %v5516_v62  ;;  %v5508_v54 = vunpack.i.h.bf16 %v5506_v55  ;;  %v5507_v9 = vunpack.i.l.bf16 %v5506_v55 }
 0xb0a   :  { %4591 = vmatpush1.bf16.msra.mxu0 %v4590_v21 }
 0xb0b   :  { %4592 = vmatprep.subr.bf16.mxu0 %v5734_v0  ;;  %v3436_v47 = vsel %vm873_vm7, %v5508_v54, %v5518_v35  ;;  %v3435_v28 = vsel %vm873_vm7, %v5507_v9, %v5517_v36 }
 0xb0c   :  { %v5521_v32 = vpop.permute.xlu1 %5520  ;;  %v5511_v26 = vpop.permute.xlu0 %5510  ;;  %v4599_v13 = vpack.c.bf16 %v3436_v47, %v3435_v28 }
 0xb0d   :  { %v5523_v58 = vunpack.i.h.bf16 %v5521_v32  ;;  %v5522_v7 = vunpack.i.l.bf16 %v5521_v32  ;;  %v5513_v40 = vunpack.i.h.bf16 %v5511_v26  ;;  %v5512_v21 = vunpack.i.l.bf16 %v5511_v26 }
 0xb0e   :  { %4594 = vmatpush1.bf16.msra.mxu0 %v4593_v42 }
 0xb0f   :  { %4595 = vmatprep.subr.bf16.mxu0 %v5734_v0  ;;  %v3462_v30 = vsel %vm986_vm8, %v5513_v40, %v5523_v58  ;;  %v3461_v56 = vsel %vm986_vm8, %v5512_v21, %v5522_v7 }
 0xb10   :  { %v5531_v46 = vpop.permute.xlu1 %5530  ;;  %v5526_v1 = vpop.permute.xlu0 %5525  ;;  %v4602_v4 = vpack.c.bf16 %v3462_v30, %v3461_v56 }
 0xb11   :  { %v5533_v42 = vunpack.i.h.bf16 %v5531_v46  ;;  %v5532_v53 = vunpack.i.l.bf16 %v5531_v46  ;;  %v5528_v15 = vunpack.i.h.bf16 %v5526_v1  ;;  %v5527_v43 = vunpack.i.l.bf16 %v5526_v1 }
 0xb12   :  { %4597 = vmatpush1.bf16.msra.mxu0 %v4596_v17 }
 0xb13   :  { %4598 = vmatprep.subr.bf16.mxu0 %v5734_v0  ;;  %v3464_v31 = vsel %vm986_vm8, %v5528_v15, %v5533_v42  ;;  %v3463_v39 = vsel %vm986_vm8, %v5527_v43, %v5532_v53 }
 0xb14   :  { %v4605_v29 = vpack.c.bf16 %v3464_v31, %v3463_v39 }
 0xb16   :  { %4600 = vmatpush1.bf16.msra.mxu0 %v4599_v13 }
 0xb17   :  { %4601 = vmatprep.subr.bf16.mxu0 %v5734_v0 }
 0xb1a   :  { %4603 = vmatpush1.bf16.msra.mxu0 %v4602_v4 }
 0xb1b   :  { %4604 = vmatprep.subr.bf16.mxu0 %v5734_v0 }
 0xb1e   :  { %4606 = vmatpush1.bf16.msra.mxu0 %v4605_v29 }
 0xb21   :  { %3541 = vmatmul.mubr.f32.vlgmr.msra.gmra.mrb[90].mxu0 %v3465_v20  ;;  %v3471_v18 = vpop.permute.xlu0 %3470 }
 0xbf4   :  { %v3542_v27 = vpop.f32.mrb[90].mxu0 }
 0xbf5   :  { %v3543_v34 = vadd.f32 %v3542_v27, %v3471_v18  ;;  %v3544_v38 = vpop.f32.mrb[91].mxu0 }
 0xbf7   :  { %v3546_v59 = vadd.f32 %v5536_v5, %v3543_v34 }
 0xbf9   :  { %v3547_v61 = vmul.f32 100.0, %v3546_v59 }
 0xbfb   :  { %5534 = vtanh.f32 %v3547_v61 }
 0xc05   :  { %v5535_v60 = vpop.eup %5534 }
 0xc06   :  { %v3549_v63 = vmul.f32 1.05, %v5535_v60 }
 0xc08   :  { %3550 = vst.msk [vmem:[#allocation14] sm:$0xff] %vm157_vm1, %v3549_v63 }
 0xc09   :  { %5702 = shalt.err (!%p5699_p4)
}
 0xc0a   :  { %s5703_s18 = scalar_lea.hbm %s7008_s16, 128 }
 0xc0b   :  { %p5704_p5 = scmp.ne.s32.totalorder %s7008_s16, %s5703_s18  ;;  %p5707_p6 = scmp.lt.u32.totalorder %s5703_s18, %s7008_s16 }
 0xc0d   :  { %p5709_p7 = pnand %p5707_p6, %p5704_p5 }
 0xc0f   :  { %5712 = shalt.err (!%p5709_p7)
}
 0xc10   :  { %3560 = dma.vmem_to_hbm [thread:$0]  %s3558_s1, 128, %s7008_s16, [#allocation4]  }
 0xc11   :  { %5721 = dma.done.wait [#allocation4], 128  }
 0xc12   :  { %5722 = vsyncadd [#allocation4], 4294967168 }
 0xc13   :  { %3564 = vsyncpa [#allocation3], 1 }
 0xc14   :  { %3565 = vsyncpa [#allocation6], 1 }
 0xc15   :  { %3566 = vsyncpa [#allocation9], 1 }
 0xc16   :  { %3567 = vsyncpa [#allocation12], 1 }
 0xc17   :  { %3568 = vsyncpa [#allocation4], 1 }

</bundles_post_ra>
